<compile_context>
chip_gen: v5e
topology: v5e:2x2
jax: 0.10.0
libtpu: 0.0.40
codegen_flags: <defaults>
</compile_context>

<pallas_src>
import jax
import jax.numpy as jnp
import numpy as np
from jax import lax
from jax.experimental import pallas as pl
from jax.experimental.pallas import tpu as pltpu

SEQ_LEN = 64
DILATIONS = (1, 2, 4, 8, 16, 32)
NCH = 80   # hidden channels
NIN = 3    # input channels

# row layout of the packed parameter slab (all offsets multiples of 8)
W0_ROWS = 2 * NCH            # 160: block-0 conv1 (rows 0..79) + downsample (80..159)
W0B_ROW = W0_ROWS            # 160: block-0 conv2
HEAD_ROW = W0B_ROW + NCH     # 240: rank-1 head W_head, b_head
SLAB_ROWS = HEAD_ROW + NCH   # 320
SLAB_COLS = 128 * ((max(NCH + 1, SEQ_LEN + 1, NIN + 1) + 127) // 128)  # 128


def _relu(x):
    return jnp.maximum(x, 0.0)


def discriminator_kernel(x_ref, slab_ref, wconv_ref, out_ref):
    T = x_ref.shape[1]
    x = x_ref[...]                                        # (3, T)

    # ---- TemporalBlock 0 (kernel_size=1) fused with its downsample conv ----
    # one (160, 3) @ (3, T) matmul instead of two pathologically-padded K=3 ones
    w0 = slab_ref[0:W0_ROWS, 0:NIN + 1]                   # (160, NIN+1)
    y0 = (jnp.dot(w0[:, :NIN], x, preferred_element_type=jnp.float32)
          + w0[:, NIN:NIN + 1])                           # (160, T)
    h = _relu(y0[:NCH])                                   # conv1 + bias + relu
    res = y0[NCH:]                                        # downsample + bias (no relu)
    w0b = slab_ref[W0B_ROW:W0B_ROW + NCH, 0:NCH + 1]      # (80, NCH+1)
    out = _relu(jnp.dot(w0b[:, :NCH], h, preferred_element_type=jnp.float32)
                + w0b[:, NCH:NCH + 1])
    skip_sum = out
    cur = _relu(out + res)                                # (80, T)

    # ---- hoisted lane iota only (JAX does not CSE it); mask rebuilt per block ----
    lane_idx = lax.broadcasted_iota(jnp.int32, (NCH, T), 1)

    def causal_conv(z, wcb, d, mask):
        # y[:, t] = w_past @ z[:, t-d] + w_cur @ z[:, t] + b (zero-padded past)
        # == Conv1d(kernel=2, dilation=d, padding=d) followed by Chomp1d(d),
        # fused as one K=2*NCH matmul: [w_past | w_cur] @ [z_shift ; z].
        # bias rides in wcb's last column (free: 161 lane-pads to 256 anyway).
        if d < T:
            z_shift = jnp.where(mask, pltpu.roll(z, d, 1), 0.0)
        else:  # dead for SEQ_LEN=64 / max dilation 32, kept for generality
            z_shift = jnp.zeros_like(z)
        z_cat = jnp.concatenate([z_shift, z], axis=0)     # (160, T) sublane concat
        return (jnp.dot(wcb[:, :2 * NCH], z_cat, preferred_element_type=jnp.float32)
                + wcb[:, 2 * NCH:2 * NCH + 1])

    # ---- TemporalBlocks 1..6: causal dilated convs, kernel_size=2 ----
    # TODO(synk): nn.Dropout is identity at inference; training-time dropout
    # masks are not implemented.
    for i, d in enumerate(DILATIONS):
        mask = lane_idx >= d                              # reused by both convs, then dead
        h = _relu(causal_conv(cur, wconv_ref[2 * i], d, mask))
        out = _relu(causal_conv(h, wconv_ref[2 * i + 1], d, mask))
        skip_sum = skip_sum + out
        cur = _relu(out + cur)

    # ---- rank-1 head: last 1x1 conv + Linear(seq_len, 1) + Sigmoid ----
    # logit = sum(total * outer(last_w, lin_w)) + last_b*sum(lin_w) + lin_b
    total = cur + skip_sum                                # (80, T)
    w_head = slab_ref[HEAD_ROW:HEAD_ROW + NCH, 0:T]       # (80, T)
    b_head = slab_ref[HEAD_ROW:HEAD_ROW + 1, T:T + 1]     # (1, 1)
    logit = jnp.sum(total * w_head, keepdims=True) + b_head
    out_ref[...] = 1.0 / (1.0 + jnp.exp(-logit))          # (1, 1)


def discriminator_forward(x, kp):
    # whole model (~2 MiB padded) fits VMEM on every generation -> no grid, no tiling
    args = (x, kp["slab"], kp["wconv"])
    vmem = pl.BlockSpec(memory_space=pltpu.MemorySpace.VMEM)
    out = pl.pallas_call(
        discriminator_kernel,
        out_shape=jax.ShapeDtypeStruct((1, 1), jnp.float32),
        in_specs=[vmem] * len(args),
        out_specs=vmem,
    )(*args)
    return out.reshape(())   # matches torch .squeeze() -> 0-d scalar


# ---------------- deterministic synthetic parameters ----------------
def init_params(key, seq_len):
    keys = iter(jax.random.split(key, 64))

    def nrm(shape, scale):
        return (scale * jax.random.normal(next(keys), shape)).astype(jnp.float32)

    def weight_norm(v, g):
        # torch weight_norm: W = g * v / ||v||, norm per output channel (dim 0).
        n = jnp.sqrt(jnp.sum(v * v, axis=(1, 2), keepdims=True))
        return g.reshape(-1, 1, 1) * v / n

    tp = {}  # torch-layout (Cout, Cin, K) effective weights (for the reference)
    # block 0 (kernel_size=1, padding=0, with downsample)
    v = nrm((NCH, NIN, 1), 0.5 / np.sqrt(NIN)); g = 1.0 + nrm((NCH,), 0.1)
    tp["blk0_w1"] = weight_norm(v, g); tp["blk0_b1"] = nrm((NCH,), 0.1)
    v = nrm((NCH, NCH, 1), 0.5 / np.sqrt(NCH)); g = 1.0 + nrm((NCH,), 0.1)
    tp["blk0_w2"] = weight_norm(v, g); tp["blk0_b2"] = nrm((NCH,), 0.1)
    tp["ds_w"] = nrm((NCH, NIN, 1), 0.5 / np.sqrt(NIN))
    tp["ds_b"] = nrm((NCH,), 0.1)
    # blocks 1..6 (kernel_size=2, dilation=padding=d)
    for i in range(len(DILATIONS)):
        v = nrm((NCH, NCH, 2), 0.5 / np.sqrt(2 * NCH)); g = 1.0 + nrm((NCH,), 0.1)
        tp[f"b{i}_w1"] = weight_norm(v, g); tp[f"b{i}_b1"] = nrm((NCH,), 0.1)
        v = nrm((NCH, NCH, 2), 0.5 / np.sqrt(2 * NCH)); g = 1.0 + nrm((NCH,), 0.1)
        tp[f"b{i}_w2"] = weight_norm(v, g); tp[f"b{i}_b2"] = nrm((NCH,), 0.1)
    tp["last_w"] = nrm((1, NCH, 1), 0.5 / np.sqrt(NCH))
    tp["last_b"] = nrm((1,), 0.1)
    tp["lin_w"] = nrm((1, seq_len), 1.0 / np.sqrt(seq_len))
    tp["lin_b"] = nrm((1,), 0.1)

    # ---- pack for the kernel: 2 contiguous slabs, fused-tap weights ----
    assert seq_len + 1 <= SLAB_COLS and NCH + 1 <= SLAB_COLS
    nblk = len(DILATIONS)

    # slab rows 0..159: block-0 conv1 (0..79) + downsample (80..159), bias in col NIN
    w0 = jnp.concatenate(
        [jnp.concatenate([tp["blk0_w1"][:, :, 0], tp["ds_w"][:, :, 0]], axis=0),
         jnp.concatenate([tp["blk0_b1"], tp["ds_b"]], axis=0)[:, None]],
        axis=1)                                               # (160, NIN+1)
    # slab rows 160..239: block-0 conv2, bias in col NCH
    w0b = jnp.concatenate(
        [tp["blk0_w2"][:, :, 0], tp["blk0_b2"][:, None]], axis=1)  # (80, NCH+1)
    # slab rows 240..319: rank-1 head (outer product) + scalar bias
    w_head = tp["last_w"][0, :, 0][:, None] * tp["lin_w"][0][None, :]   # (80, seq_len)
    b_head = tp["last_b"][0] * jnp.sum(tp["lin_w"][0]) + tp["lin_b"][0]

    slab = jnp.zeros((SLAB_ROWS, SLAB_COLS), jnp.float32)
    slab = slab.at[0:W0_ROWS, 0:NIN + 1].set(w0)
    slab = slab.at[W0B_ROW:W0B_ROW + NCH, 0:NCH + 1].set(w0b)
    slab = slab.at[HEAD_ROW:HEAD_ROW + NCH, 0:seq_len].set(w_head)
    slab = slab.at[HEAD_ROW, seq_len].set(b_head)

    # dilated convs: [w_past | w_cur | bias] per conv (bias column is free:
    # 160 already lane-pads to 256 in VMEM)
    wconv = []
    for i in range(nblk):
        for wname, bname in (("w1", "b1"), ("w2", "b2")):
            w = tp[f"b{i}_{wname}"]                           # (80, 80, 2)
            wconv.append(jnp.concatenate(
                [w[:, :, 0], w[:, :, 1], tp[f"b{i}_{bname}"][:, None]], axis=1))
    wconv = jnp.stack(wconv, axis=0)                          # (12, 80, 161)

    kp = {"slab": slab, "wconv": wconv}
    return tp, kp


# ---------------- pure-JAX reference (mirrors PyTorch semantics) ----------------
def _conv1d_ref(x, w, b, dilation, padding):
    y = lax.conv_general_dilated(
        x[None], w, window_strides=(1,), padding=[(padding, padding)],
        rhs_dilation=(dilation,), dimension_numbers=("NCH", "OIH", "NCH"),
        precision=lax.Precision.HIGHEST)
    return y[0] + b[:, None]


def reference_forward(x, tp):
    L = x.shape[1]
    skips = []
    h = _relu(_conv1d_ref(x, tp["blk0_w1"], tp["blk0_b1"], 1, 0))
    out = _relu(_conv1d_ref(h, tp["blk0_w2"], tp["blk0_b2"], 1, 0))
    res = _conv1d_ref(x, tp["ds_w"], tp["ds_b"], 1, 0)
    skips.append(out)
    cur = _relu(out + res)
    for i, d in enumerate(DILATIONS):
        h = _relu(_conv1d_ref(cur, tp[f"b{i}_w1"], tp[f"b{i}_b1"], d, d)[:, :L])
        out = _relu(_conv1d_ref(h, tp[f"b{i}_w2"], tp[f"b{i}_b2"], d, d)[:, :L])
        skips.append(out)
        cur = _relu(out + cur)
    total = cur + sum(skips)
    y = _conv1d_ref(total, tp["last_w"], tp["last_b"], 1, 0)   # (1, L)
    logit = y @ tp["lin_w"].T + tp["lin_b"]                    # (1, 1)
    return jax.nn.sigmoid(logit).reshape(())


if __name__ == "__main__":
    key = jax.random.PRNGKey(0)
    kx, kparams = jax.random.split(key)
    x = jax.random.normal(kx, (NIN, SEQ_LEN), jnp.float32)
    tp, kp = init_params(kparams, SEQ_LEN)

    out = discriminator_forward(x, kp)
    out = jax.block_until_ready(out)

    ref = reference_forward(x, tp)
    np.testing.assert_allclose(np.asarray(out), np.asarray(ref),
                               rtol=1e-3, atol=1e-3)
    print("KERNEL_OK")
</pallas_src>

<mosaic_0001>
module attributes {stable_mosaic.version = 11 : i64} {
  func.func @discriminator_kernel(%arg0: memref<3x64xf32, #tpu.memory_space<vmem>>, %arg1: memref<320x128xf32, #tpu.memory_space<vmem>>, %arg2: memref<12x80x161xf32, #tpu.memory_space<vmem>>, %arg3: memref<1x1xf32, #tpu.memory_space<vmem>>) attributes {dimension_semantics = [], scalar_prefetch = 0 : i64, scratch_operands = 0 : i64, tpu.core_type = #tpu.core_type<tc>} {
    %c0 = arith.constant 0 : index
    %c0_0 = arith.constant 0 : index
    %0 = vector.load %arg0[%c0, %c0_0] : memref<3x64xf32, #tpu.memory_space<vmem>>, vector<3x64xf32>
    %c0_1 = arith.constant 0 : index
    %c0_2 = arith.constant 0 : index
    %1 = vector.load %arg1[%c0_1, %c0_2] : memref<320x128xf32, #tpu.memory_space<vmem>>, vector<160x4xf32>
    %2 = vector.extract_strided_slice %1 {offsets = [0, 0], sizes = [160, 3], strides = [1, 1]} : vector<160x4xf32> to vector<160x3xf32>
    %cst = arith.constant dense<0.000000e+00> : vector<160x64xf32>
    %3 = tpu.matmul %2, %0, %cst {dimension_numbers = #tpu.dot_dimension_numbers<[1], [0], [0], [1], [0, 0, 1, 1], [], []>} : vector<160x3xf32>, vector<3x64xf32>, vector<160x64xf32> -> vector<160x64xf32>
    %4 = vector.extract_strided_slice %1 {offsets = [0, 3], sizes = [160, 1], strides = [1, 1]} : vector<160x4xf32> to vector<160x1xf32>
    %5 = vector.broadcast %4 : vector<160x1xf32> to vector<160x64xf32>
    %6 = arith.addf %3, %5 : vector<160x64xf32>
    %7 = vector.extract_strided_slice %6 {offsets = [0, 0], sizes = [80, 64], strides = [1, 1]} : vector<160x64xf32> to vector<80x64xf32>
    %cst_3 = arith.constant 0.000000e+00 : f32
    %8 = vector.broadcast %cst_3 : f32 to vector<80x64xf32>
    %9 = arith.maximumf %7, %8 : vector<80x64xf32>
    %10 = vector.extract_strided_slice %6 {offsets = [80, 0], sizes = [80, 64], strides = [1, 1]} : vector<160x64xf32> to vector<80x64xf32>
    %c160 = arith.constant 160 : index
    %c0_4 = arith.constant 0 : index
    %11 = vector.load %arg1[%c160, %c0_4] : memref<320x128xf32, #tpu.memory_space<vmem>>, vector<80x81xf32>
    %12 = vector.extract_strided_slice %11 {offsets = [0, 0], sizes = [80, 80], strides = [1, 1]} : vector<80x81xf32> to vector<80x80xf32>
    %cst_5 = arith.constant dense<0.000000e+00> : vector<80x64xf32>
    %13 = tpu.matmul %12, %9, %cst_5 {dimension_numbers = #tpu.dot_dimension_numbers<[1], [0], [0], [1], [0, 0, 1, 1], [], []>} : vector<80x80xf32>, vector<80x64xf32>, vector<80x64xf32> -> vector<80x64xf32>
    %14 = vector.extract_strided_slice %11 {offsets = [0, 80], sizes = [80, 1], strides = [1, 1]} : vector<80x81xf32> to vector<80x1xf32>
    %15 = vector.broadcast %14 : vector<80x1xf32> to vector<80x64xf32>
    %16 = arith.addf %13, %15 : vector<80x64xf32>
    %cst_6 = arith.constant 0.000000e+00 : f32
    %17 = vector.broadcast %cst_6 : f32 to vector<80x64xf32>
    %18 = arith.maximumf %16, %17 : vector<80x64xf32>
    %19 = arith.addf %18, %10 : vector<80x64xf32>
    %cst_7 = arith.constant 0.000000e+00 : f32
    %20 = vector.broadcast %cst_7 : f32 to vector<80x64xf32>
    %21 = arith.maximumf %19, %20 : vector<80x64xf32>
    %22 = tpu.iota {dimensions = array<i32: 1>} : vector<80x64xi32>
    %c1_i32 = arith.constant 1 : i32
    %23 = vector.broadcast %c1_i32 : i32 to vector<80x64xi32>
    %24 = arith.cmpi sge, %22, %23 : vector<80x64xi32>
    %c0_8 = arith.constant 0 : index
    %c0_9 = arith.constant 0 : index
    %c0_10 = arith.constant 0 : index
    %25 = vector.load %arg2[%c0_8, %c0_9, %c0_10] : memref<12x80x161xf32, #tpu.memory_space<vmem>>, vector<1x80x161xf32>
    %26 = vector.shape_cast %25 : vector<1x80x161xf32> to vector<80x161xf32>
    %c1_i32_11 = arith.constant 1 : i32
    %27 = tpu.dynamic_rotate %21 by %c1_i32_11 dim 1 : vector<80x64xf32>, i32 -> vector<80x64xf32>
    %cst_12 = arith.constant 0.000000e+00 : f32
    %28 = vector.broadcast %cst_12 : f32 to vector<80x64xf32>
    %29 = arith.select %24, %27, %28 : vector<80x64xi1>, vector<80x64xf32>
    %30 = tpu.concatenate %29, %21 in 0 : vector<80x64xf32>, vector<80x64xf32> -> vector<160x64xf32>
    %31 = vector.extract_strided_slice %26 {offsets = [0, 0], sizes = [80, 160], strides = [1, 1]} : vector<80x161xf32> to vector<80x160xf32>
    %cst_13 = arith.constant dense<0.000000e+00> : vector<80x64xf32>
    %32 = tpu.matmul %31, %30, %cst_13 {dimension_numbers = #tpu.dot_dimension_numbers<[1], [0], [0], [1], [0, 0, 1, 1], [], []>} : vector<80x160xf32>, vector<160x64xf32>, vector<80x64xf32> -> vector<80x64xf32>
    %33 = vector.extract_strided_slice %26 {offsets = [0, 160], sizes = [80, 1], strides = [1, 1]} : vector<80x161xf32> to vector<80x1xf32>
    %34 = vector.broadcast %33 : vector<80x1xf32> to vector<80x64xf32>
    %35 = arith.addf %32, %34 : vector<80x64xf32>
    %cst_14 = arith.constant 0.000000e+00 : f32
    %36 = vector.broadcast %cst_14 : f32 to vector<80x64xf32>
    %37 = arith.maximumf %35, %36 : vector<80x64xf32>
    %c1 = arith.constant 1 : index
    %c0_15 = arith.constant 0 : index
    %c0_16 = arith.constant 0 : index
    %38 = vector.load %arg2[%c1, %c0_15, %c0_16] : memref<12x80x161xf32, #tpu.memory_space<vmem>>, vector<1x80x161xf32>
    %39 = vector.shape_cast %38 : vector<1x80x161xf32> to vector<80x161xf32>
    %c1_i32_17 = arith.constant 1 : i32
    %40 = tpu.dynamic_rotate %37 by %c1_i32_17 dim 1 : vector<80x64xf32>, i32 -> vector<80x64xf32>
    %cst_18 = arith.constant 0.000000e+00 : f32
    %41 = vector.broadcast %cst_18 : f32 to vector<80x64xf32>
    %42 = arith.select %24, %40, %41 : vector<80x64xi1>, vector<80x64xf32>
    %43 = tpu.concatenate %42, %37 in 0 : vector<80x64xf32>, vector<80x64xf32> -> vector<160x64xf32>
    %44 = vector.extract_strided_slice %39 {offsets = [0, 0], sizes = [80, 160], strides = [1, 1]} : vector<80x161xf32> to vector<80x160xf32>
    %cst_19 = arith.constant dense<0.000000e+00> : vector<80x64xf32>
    %45 = tpu.matmul %44, %43, %cst_19 {dimension_numbers = #tpu.dot_dimension_numbers<[1], [0], [0], [1], [0, 0, 1, 1], [], []>} : vector<80x160xf32>, vector<160x64xf32>, vector<80x64xf32> -> vector<80x64xf32>
    %46 = vector.extract_strided_slice %39 {offsets = [0, 160], sizes = [80, 1], strides = [1, 1]} : vector<80x161xf32> to vector<80x1xf32>
    %47 = vector.broadcast %46 : vector<80x1xf32> to vector<80x64xf32>
    %48 = arith.addf %45, %47 : vector<80x64xf32>
    %cst_20 = arith.constant 0.000000e+00 : f32
    %49 = vector.broadcast %cst_20 : f32 to vector<80x64xf32>
    %50 = arith.maximumf %48, %49 : vector<80x64xf32>
    %51 = arith.addf %18, %50 : vector<80x64xf32>
    %52 = arith.addf %50, %21 : vector<80x64xf32>
    %cst_21 = arith.constant 0.000000e+00 : f32
    %53 = vector.broadcast %cst_21 : f32 to vector<80x64xf32>
    %54 = arith.maximumf %52, %53 : vector<80x64xf32>
    %c2_i32 = arith.constant 2 : i32
    %55 = vector.broadcast %c2_i32 : i32 to vector<80x64xi32>
    %56 = arith.cmpi sge, %22, %55 : vector<80x64xi32>
    %c2 = arith.constant 2 : index
    %c0_22 = arith.constant 0 : index
    %c0_23 = arith.constant 0 : index
    %57 = vector.load %arg2[%c2, %c0_22, %c0_23] : memref<12x80x161xf32, #tpu.memory_space<vmem>>, vector<1x80x161xf32>
    %58 = vector.shape_cast %57 : vector<1x80x161xf32> to vector<80x161xf32>
    %c2_i32_24 = arith.constant 2 : i32
    %59 = tpu.dynamic_rotate %54 by %c2_i32_24 dim 1 : vector<80x64xf32>, i32 -> vector<80x64xf32>
    %cst_25 = arith.constant 0.000000e+00 : f32
    %60 = vector.broadcast %cst_25 : f32 to vector<80x64xf32>
    %61 = arith.select %56, %59, %60 : vector<80x64xi1>, vector<80x64xf32>
    %62 = tpu.concatenate %61, %54 in 0 : vector<80x64xf32>, vector<80x64xf32> -> vector<160x64xf32>
    %63 = vector.extract_strided_slice %58 {offsets = [0, 0], sizes = [80, 160], strides = [1, 1]} : vector<80x161xf32> to vector<80x160xf32>
    %cst_26 = arith.constant dense<0.000000e+00> : vector<80x64xf32>
    %64 = tpu.matmul %63, %62, %cst_26 {dimension_numbers = #tpu.dot_dimension_numbers<[1], [0], [0], [1], [0, 0, 1, 1], [], []>} : vector<80x160xf32>, vector<160x64xf32>, vector<80x64xf32> -> vector<80x64xf32>
    %65 = vector.extract_strided_slice %58 {offsets = [0, 160], sizes = [80, 1], strides = [1, 1]} : vector<80x161xf32> to vector<80x1xf32>
    %66 = vector.broadcast %65 : vector<80x1xf32> to vector<80x64xf32>
    %67 = arith.addf %64, %66 : vector<80x64xf32>
    %cst_27 = arith.constant 0.000000e+00 : f32
    %68 = vector.broadcast %cst_27 : f32 to vector<80x64xf32>
    %69 = arith.maximumf %67, %68 : vector<80x64xf32>
    %c3 = arith.constant 3 : index
    %c0_28 = arith.constant 0 : index
    %c0_29 = arith.constant 0 : index
    %70 = vector.load %arg2[%c3, %c0_28, %c0_29] : memref<12x80x161xf32, #tpu.memory_space<vmem>>, vector<1x80x161xf32>
    %71 = vector.shape_cast %70 : vector<1x80x161xf32> to vector<80x161xf32>
    %c2_i32_30 = arith.constant 2 : i32
    %72 = tpu.dynamic_rotate %69 by %c2_i32_30 dim 1 : vector<80x64xf32>, i32 -> vector<80x64xf32>
    %cst_31 = arith.constant 0.000000e+00 : f32
    %73 = vector.broadcast %cst_31 : f32 to vector<80x64xf32>
    %74 = arith.select %56, %72, %73 : vector<80x64xi1>, vector<80x64xf32>
    %75 = tpu.concatenate %74, %69 in 0 : vector<80x64xf32>, vector<80x64xf32> -> vector<160x64xf32>
    %76 = vector.extract_strided_slice %71 {offsets = [0, 0], sizes = [80, 160], strides = [1, 1]} : vector<80x161xf32> to vector<80x160xf32>
    %cst_32 = arith.constant dense<0.000000e+00> : vector<80x64xf32>
    %77 = tpu.matmul %76, %75, %cst_32 {dimension_numbers = #tpu.dot_dimension_numbers<[1], [0], [0], [1], [0, 0, 1, 1], [], []>} : vector<80x160xf32>, vector<160x64xf32>, vector<80x64xf32> -> vector<80x64xf32>
    %78 = vector.extract_strided_slice %71 {offsets = [0, 160], sizes = [80, 1], strides = [1, 1]} : vector<80x161xf32> to vector<80x1xf32>
    %79 = vector.broadcast %78 : vector<80x1xf32> to vector<80x64xf32>
    %80 = arith.addf %77, %79 : vector<80x64xf32>
    %cst_33 = arith.constant 0.000000e+00 : f32
    %81 = vector.broadcast %cst_33 : f32 to vector<80x64xf32>
    %82 = arith.maximumf %80, %81 : vector<80x64xf32>
    %83 = arith.addf %51, %82 : vector<80x64xf32>
    %84 = arith.addf %82, %54 : vector<80x64xf32>
    %cst_34 = arith.constant 0.000000e+00 : f32
    %85 = vector.broadcast %cst_34 : f32 to vector<80x64xf32>
    %86 = arith.maximumf %84, %85 : vector<80x64xf32>
    %c4_i32 = arith.constant 4 : i32
    %87 = vector.broadcast %c4_i32 : i32 to vector<80x64xi32>
    %88 = arith.cmpi sge, %22, %87 : vector<80x64xi32>
    %c4 = arith.constant 4 : index
    %c0_35 = arith.constant 0 : index
    %c0_36 = arith.constant 0 : index
    %89 = vector.load %arg2[%c4, %c0_35, %c0_36] : memref<12x80x161xf32, #tpu.memory_space<vmem>>, vector<1x80x161xf32>
    %90 = vector.shape_cast %89 : vector<1x80x161xf32> to vector<80x161xf32>
    %c4_i32_37 = arith.constant 4 : i32
    %91 = tpu.dynamic_rotate %86 by %c4_i32_37 dim 1 : vector<80x64xf32>, i32 -> vector<80x64xf32>
    %cst_38 = arith.constant 0.000000e+00 : f32
    %92 = vector.broadcast %cst_38 : f32 to vector<80x64xf32>
    %93 = arith.select %88, %91, %92 : vector<80x64xi1>, vector<80x64xf32>
    %94 = tpu.concatenate %93, %86 in 0 : vector<80x64xf32>, vector<80x64xf32> -> vector<160x64xf32>
    %95 = vector.extract_strided_slice %90 {offsets = [0, 0], sizes = [80, 160], strides = [1, 1]} : vector<80x161xf32> to vector<80x160xf32>
    %cst_39 = arith.constant dense<0.000000e+00> : vector<80x64xf32>
    %96 = tpu.matmul %95, %94, %cst_39 {dimension_numbers = #tpu.dot_dimension_numbers<[1], [0], [0], [1], [0, 0, 1, 1], [], []>} : vector<80x160xf32>, vector<160x64xf32>, vector<80x64xf32> -> vector<80x64xf32>
    %97 = vector.extract_strided_slice %90 {offsets = [0, 160], sizes = [80, 1], strides = [1, 1]} : vector<80x161xf32> to vector<80x1xf32>
    %98 = vector.broadcast %97 : vector<80x1xf32> to vector<80x64xf32>
    %99 = arith.addf %96, %98 : vector<80x64xf32>
    %cst_40 = arith.constant 0.000000e+00 : f32
    %100 = vector.broadcast %cst_40 : f32 to vector<80x64xf32>
    %101 = arith.maximumf %99, %100 : vector<80x64xf32>
    %c5 = arith.constant 5 : index
    %c0_41 = arith.constant 0 : index
    %c0_42 = arith.constant 0 : index
    %102 = vector.load %arg2[%c5, %c0_41, %c0_42] : memref<12x80x161xf32, #tpu.memory_space<vmem>>, vector<1x80x161xf32>
    %103 = vector.shape_cast %102 : vector<1x80x161xf32> to vector<80x161xf32>
    %c4_i32_43 = arith.constant 4 : i32
    %104 = tpu.dynamic_rotate %101 by %c4_i32_43 dim 1 : vector<80x64xf32>, i32 -> vector<80x64xf32>
    %cst_44 = arith.constant 0.000000e+00 : f32
    %105 = vector.broadcast %cst_44 : f32 to vector<80x64xf32>
    %106 = arith.select %88, %104, %105 : vector<80x64xi1>, vector<80x64xf32>
    %107 = tpu.concatenate %106, %101 in 0 : vector<80x64xf32>, vector<80x64xf32> -> vector<160x64xf32>
    %108 = vector.extract_strided_slice %103 {offsets = [0, 0], sizes = [80, 160], strides = [1, 1]} : vector<80x161xf32> to vector<80x160xf32>
    %cst_45 = arith.constant dense<0.000000e+00> : vector<80x64xf32>
    %109 = tpu.matmul %108, %107, %cst_45 {dimension_numbers = #tpu.dot_dimension_numbers<[1], [0], [0], [1], [0, 0, 1, 1], [], []>} : vector<80x160xf32>, vector<160x64xf32>, vector<80x64xf32> -> vector<80x64xf32>
    %110 = vector.extract_strided_slice %103 {offsets = [0, 160], sizes = [80, 1], strides = [1, 1]} : vector<80x161xf32> to vector<80x1xf32>
    %111 = vector.broadcast %110 : vector<80x1xf32> to vector<80x64xf32>
    %112 = arith.addf %109, %111 : vector<80x64xf32>
    %cst_46 = arith.constant 0.000000e+00 : f32
    %113 = vector.broadcast %cst_46 : f32 to vector<80x64xf32>
    %114 = arith.maximumf %112, %113 : vector<80x64xf32>
    %115 = arith.addf %83, %114 : vector<80x64xf32>
    %116 = arith.addf %114, %86 : vector<80x64xf32>
    %cst_47 = arith.constant 0.000000e+00 : f32
    %117 = vector.broadcast %cst_47 : f32 to vector<80x64xf32>
    %118 = arith.maximumf %116, %117 : vector<80x64xf32>
    %c8_i32 = arith.constant 8 : i32
    %119 = vector.broadcast %c8_i32 : i32 to vector<80x64xi32>
    %120 = arith.cmpi sge, %22, %119 : vector<80x64xi32>
    %c6 = arith.constant 6 : index
    %c0_48 = arith.constant 0 : index
    %c0_49 = arith.constant 0 : index
    %121 = vector.load %arg2[%c6, %c0_48, %c0_49] : memref<12x80x161xf32, #tpu.memory_space<vmem>>, vector<1x80x161xf32>
    %122 = vector.shape_cast %121 : vector<1x80x161xf32> to vector<80x161xf32>
    %c8_i32_50 = arith.constant 8 : i32
    %123 = tpu.dynamic_rotate %118 by %c8_i32_50 dim 1 : vector<80x64xf32>, i32 -> vector<80x64xf32>
    %cst_51 = arith.constant 0.000000e+00 : f32
    %124 = vector.broadcast %cst_51 : f32 to vector<80x64xf32>
    %125 = arith.select %120, %123, %124 : vector<80x64xi1>, vector<80x64xf32>
    %126 = tpu.concatenate %125, %118 in 0 : vector<80x64xf32>, vector<80x64xf32> -> vector<160x64xf32>
    %127 = vector.extract_strided_slice %122 {offsets = [0, 0], sizes = [80, 160], strides = [1, 1]} : vector<80x161xf32> to vector<80x160xf32>
    %cst_52 = arith.constant dense<0.000000e+00> : vector<80x64xf32>
    %128 = tpu.matmul %127, %126, %cst_52 {dimension_numbers = #tpu.dot_dimension_numbers<[1], [0], [0], [1], [0, 0, 1, 1], [], []>} : vector<80x160xf32>, vector<160x64xf32>, vector<80x64xf32> -> vector<80x64xf32>
    %129 = vector.extract_strided_slice %122 {offsets = [0, 160], sizes = [80, 1], strides = [1, 1]} : vector<80x161xf32> to vector<80x1xf32>
    %130 = vector.broadcast %129 : vector<80x1xf32> to vector<80x64xf32>
    %131 = arith.addf %128, %130 : vector<80x64xf32>
    %cst_53 = arith.constant 0.000000e+00 : f32
    %132 = vector.broadcast %cst_53 : f32 to vector<80x64xf32>
    %133 = arith.maximumf %131, %132 : vector<80x64xf32>
    %c7 = arith.constant 7 : index
    %c0_54 = arith.constant 0 : index
    %c0_55 = arith.constant 0 : index
    %134 = vector.load %arg2[%c7, %c0_54, %c0_55] : memref<12x80x161xf32, #tpu.memory_space<vmem>>, vector<1x80x161xf32>
    %135 = vector.shape_cast %134 : vector<1x80x161xf32> to vector<80x161xf32>
    %c8_i32_56 = arith.constant 8 : i32
    %136 = tpu.dynamic_rotate %133 by %c8_i32_56 dim 1 : vector<80x64xf32>, i32 -> vector<80x64xf32>
    %cst_57 = arith.constant 0.000000e+00 : f32
    %137 = vector.broadcast %cst_57 : f32 to vector<80x64xf32>
    %138 = arith.select %120, %136, %137 : vector<80x64xi1>, vector<80x64xf32>
    %139 = tpu.concatenate %138, %133 in 0 : vector<80x64xf32>, vector<80x64xf32> -> vector<160x64xf32>
    %140 = vector.extract_strided_slice %135 {offsets = [0, 0], sizes = [80, 160], strides = [1, 1]} : vector<80x161xf32> to vector<80x160xf32>
    %cst_58 = arith.constant dense<0.000000e+00> : vector<80x64xf32>
    %141 = tpu.matmul %140, %139, %cst_58 {dimension_numbers = #tpu.dot_dimension_numbers<[1], [0], [0], [1], [0, 0, 1, 1], [], []>} : vector<80x160xf32>, vector<160x64xf32>, vector<80x64xf32> -> vector<80x64xf32>
    %142 = vector.extract_strided_slice %135 {offsets = [0, 160], sizes = [80, 1], strides = [1, 1]} : vector<80x161xf32> to vector<80x1xf32>
    %143 = vector.broadcast %142 : vector<80x1xf32> to vector<80x64xf32>
    %144 = arith.addf %141, %143 : vector<80x64xf32>
    %cst_59 = arith.constant 0.000000e+00 : f32
    %145 = vector.broadcast %cst_59 : f32 to vector<80x64xf32>
    %146 = arith.maximumf %144, %145 : vector<80x64xf32>
    %147 = arith.addf %115, %146 : vector<80x64xf32>
    %148 = arith.addf %146, %118 : vector<80x64xf32>
    %cst_60 = arith.constant 0.000000e+00 : f32
    %149 = vector.broadcast %cst_60 : f32 to vector<80x64xf32>
    %150 = arith.maximumf %148, %149 : vector<80x64xf32>
    %c16_i32 = arith.constant 16 : i32
    %151 = vector.broadcast %c16_i32 : i32 to vector<80x64xi32>
    %152 = arith.cmpi sge, %22, %151 : vector<80x64xi32>
    %c8 = arith.constant 8 : index
    %c0_61 = arith.constant 0 : index
    %c0_62 = arith.constant 0 : index
    %153 = vector.load %arg2[%c8, %c0_61, %c0_62] : memref<12x80x161xf32, #tpu.memory_space<vmem>>, vector<1x80x161xf32>
    %154 = vector.shape_cast %153 : vector<1x80x161xf32> to vector<80x161xf32>
    %c16_i32_63 = arith.constant 16 : i32
    %155 = tpu.dynamic_rotate %150 by %c16_i32_63 dim 1 : vector<80x64xf32>, i32 -> vector<80x64xf32>
    %cst_64 = arith.constant 0.000000e+00 : f32
    %156 = vector.broadcast %cst_64 : f32 to vector<80x64xf32>
    %157 = arith.select %152, %155, %156 : vector<80x64xi1>, vector<80x64xf32>
    %158 = tpu.concatenate %157, %150 in 0 : vector<80x64xf32>, vector<80x64xf32> -> vector<160x64xf32>
    %159 = vector.extract_strided_slice %154 {offsets = [0, 0], sizes = [80, 160], strides = [1, 1]} : vector<80x161xf32> to vector<80x160xf32>
    %cst_65 = arith.constant dense<0.000000e+00> : vector<80x64xf32>
    %160 = tpu.matmul %159, %158, %cst_65 {dimension_numbers = #tpu.dot_dimension_numbers<[1], [0], [0], [1], [0, 0, 1, 1], [], []>} : vector<80x160xf32>, vector<160x64xf32>, vector<80x64xf32> -> vector<80x64xf32>
    %161 = vector.extract_strided_slice %154 {offsets = [0, 160], sizes = [80, 1], strides = [1, 1]} : vector<80x161xf32> to vector<80x1xf32>
    %162 = vector.broadcast %161 : vector<80x1xf32> to vector<80x64xf32>
    %163 = arith.addf %160, %162 : vector<80x64xf32>
    %cst_66 = arith.constant 0.000000e+00 : f32
    %164 = vector.broadcast %cst_66 : f32 to vector<80x64xf32>
    %165 = arith.maximumf %163, %164 : vector<80x64xf32>
    %c9 = arith.constant 9 : index
    %c0_67 = arith.constant 0 : index
    %c0_68 = arith.constant 0 : index
    %166 = vector.load %arg2[%c9, %c0_67, %c0_68] : memref<12x80x161xf32, #tpu.memory_space<vmem>>, vector<1x80x161xf32>
    %167 = vector.shape_cast %166 : vector<1x80x161xf32> to vector<80x161xf32>
    %c16_i32_69 = arith.constant 16 : i32
    %168 = tpu.dynamic_rotate %165 by %c16_i32_69 dim 1 : vector<80x64xf32>, i32 -> vector<80x64xf32>
    %cst_70 = arith.constant 0.000000e+00 : f32
    %169 = vector.broadcast %cst_70 : f32 to vector<80x64xf32>
    %170 = arith.select %152, %168, %169 : vector<80x64xi1>, vector<80x64xf32>
    %171 = tpu.concatenate %170, %165 in 0 : vector<80x64xf32>, vector<80x64xf32> -> vector<160x64xf32>
    %172 = vector.extract_strided_slice %167 {offsets = [0, 0], sizes = [80, 160], strides = [1, 1]} : vector<80x161xf32> to vector<80x160xf32>
    %cst_71 = arith.constant dense<0.000000e+00> : vector<80x64xf32>
    %173 = tpu.matmul %172, %171, %cst_71 {dimension_numbers = #tpu.dot_dimension_numbers<[1], [0], [0], [1], [0, 0, 1, 1], [], []>} : vector<80x160xf32>, vector<160x64xf32>, vector<80x64xf32> -> vector<80x64xf32>
    %174 = vector.extract_strided_slice %167 {offsets = [0, 160], sizes = [80, 1], strides = [1, 1]} : vector<80x161xf32> to vector<80x1xf32>
    %175 = vector.broadcast %174 : vector<80x1xf32> to vector<80x64xf32>
    %176 = arith.addf %173, %175 : vector<80x64xf32>
    %cst_72 = arith.constant 0.000000e+00 : f32
    %177 = vector.broadcast %cst_72 : f32 to vector<80x64xf32>
    %178 = arith.maximumf %176, %177 : vector<80x64xf32>
    %179 = arith.addf %147, %178 : vector<80x64xf32>
    %180 = arith.addf %178, %150 : vector<80x64xf32>
    %cst_73 = arith.constant 0.000000e+00 : f32
    %181 = vector.broadcast %cst_73 : f32 to vector<80x64xf32>
    %182 = arith.maximumf %180, %181 : vector<80x64xf32>
    %c32_i32 = arith.constant 32 : i32
    %183 = vector.broadcast %c32_i32 : i32 to vector<80x64xi32>
    %184 = arith.cmpi sge, %22, %183 : vector<80x64xi32>
    %c10 = arith.constant 10 : index
    %c0_74 = arith.constant 0 : index
    %c0_75 = arith.constant 0 : index
    %185 = vector.load %arg2[%c10, %c0_74, %c0_75] : memref<12x80x161xf32, #tpu.memory_space<vmem>>, vector<1x80x161xf32>
    %186 = vector.shape_cast %185 : vector<1x80x161xf32> to vector<80x161xf32>
    %c32_i32_76 = arith.constant 32 : i32
    %187 = tpu.dynamic_rotate %182 by %c32_i32_76 dim 1 : vector<80x64xf32>, i32 -> vector<80x64xf32>
    %cst_77 = arith.constant 0.000000e+00 : f32
    %188 = vector.broadcast %cst_77 : f32 to vector<80x64xf32>
    %189 = arith.select %184, %187, %188 : vector<80x64xi1>, vector<80x64xf32>
    %190 = tpu.concatenate %189, %182 in 0 : vector<80x64xf32>, vector<80x64xf32> -> vector<160x64xf32>
    %191 = vector.extract_strided_slice %186 {offsets = [0, 0], sizes = [80, 160], strides = [1, 1]} : vector<80x161xf32> to vector<80x160xf32>
    %cst_78 = arith.constant dense<0.000000e+00> : vector<80x64xf32>
    %192 = tpu.matmul %191, %190, %cst_78 {dimension_numbers = #tpu.dot_dimension_numbers<[1], [0], [0], [1], [0, 0, 1, 1], [], []>} : vector<80x160xf32>, vector<160x64xf32>, vector<80x64xf32> -> vector<80x64xf32>
    %193 = vector.extract_strided_slice %186 {offsets = [0, 160], sizes = [80, 1], strides = [1, 1]} : vector<80x161xf32> to vector<80x1xf32>
    %194 = vector.broadcast %193 : vector<80x1xf32> to vector<80x64xf32>
    %195 = arith.addf %192, %194 : vector<80x64xf32>
    %cst_79 = arith.constant 0.000000e+00 : f32
    %196 = vector.broadcast %cst_79 : f32 to vector<80x64xf32>
    %197 = arith.maximumf %195, %196 : vector<80x64xf32>
    %c11 = arith.constant 11 : index
    %c0_80 = arith.constant 0 : index
    %c0_81 = arith.constant 0 : index
    %198 = vector.load %arg2[%c11, %c0_80, %c0_81] : memref<12x80x161xf32, #tpu.memory_space<vmem>>, vector<1x80x161xf32>
    %199 = vector.shape_cast %198 : vector<1x80x161xf32> to vector<80x161xf32>
    %c32_i32_82 = arith.constant 32 : i32
    %200 = tpu.dynamic_rotate %197 by %c32_i32_82 dim 1 : vector<80x64xf32>, i32 -> vector<80x64xf32>
    %cst_83 = arith.constant 0.000000e+00 : f32
    %201 = vector.broadcast %cst_83 : f32 to vector<80x64xf32>
    %202 = arith.select %184, %200, %201 : vector<80x64xi1>, vector<80x64xf32>
    %203 = tpu.concatenate %202, %197 in 0 : vector<80x64xf32>, vector<80x64xf32> -> vector<160x64xf32>
    %204 = vector.extract_strided_slice %199 {offsets = [0, 0], sizes = [80, 160], strides = [1, 1]} : vector<80x161xf32> to vector<80x160xf32>
    %cst_84 = arith.constant dense<0.000000e+00> : vector<80x64xf32>
    %205 = tpu.matmul %204, %203, %cst_84 {dimension_numbers = #tpu.dot_dimension_numbers<[1], [0], [0], [1], [0, 0, 1, 1], [], []>} : vector<80x160xf32>, vector<160x64xf32>, vector<80x64xf32> -> vector<80x64xf32>
    %206 = vector.extract_strided_slice %199 {offsets = [0, 160], sizes = [80, 1], strides = [1, 1]} : vector<80x161xf32> to vector<80x1xf32>
    %207 = vector.broadcast %206 : vector<80x1xf32> to vector<80x64xf32>
    %208 = arith.addf %205, %207 : vector<80x64xf32>
    %cst_85 = arith.constant 0.000000e+00 : f32
    %209 = vector.broadcast %cst_85 : f32 to vector<80x64xf32>
    %210 = arith.maximumf %208, %209 : vector<80x64xf32>
    %211 = arith.addf %179, %210 : vector<80x64xf32>
    %212 = arith.addf %210, %182 : vector<80x64xf32>
    %cst_86 = arith.constant 0.000000e+00 : f32
    %213 = vector.broadcast %cst_86 : f32 to vector<80x64xf32>
    %214 = arith.maximumf %212, %213 : vector<80x64xf32>
    %215 = arith.addf %214, %211 : vector<80x64xf32>
    %c240 = arith.constant 240 : index
    %c0_87 = arith.constant 0 : index
    %216 = vector.load %arg1[%c240, %c0_87] : memref<320x128xf32, #tpu.memory_space<vmem>>, vector<80x64xf32>
    %c240_88 = arith.constant 240 : index
    %c64 = arith.constant 64 : index
    %217 = vector.load %arg1[%c240_88, %c64] : memref<320x128xf32, #tpu.memory_space<vmem>>, vector<1x1xf32>
    %218 = arith.mulf %215, %216 : vector<80x64xf32>
    %219 = vector.shape_cast %218 : vector<80x64xf32> to vector<1x80x64xf32>
    %cst_89 = arith.constant dense<0.000000e+00> : vector<1xf32>
    %220 = vector.multi_reduction <add>, %219, %cst_89 [1, 2] : vector<1x80x64xf32> to vector<1xf32>
    %221 = vector.shape_cast %220 : vector<1xf32> to vector<1x1x1xf32>
    %222 = vector.extract %221[0, 0, 0] : f32 from vector<1x1x1xf32>
    %223 = vector.broadcast %222 : f32 to vector<1x1xf32>
    %224 = arith.addf %223, %217 : vector<1x1xf32>
    %cst_90 = arith.constant 0.000000e+00 : f32
    %225 = vector.broadcast %cst_90 : f32 to vector<1x1xf32>
    %226 = arith.subf %225, %224 : vector<1x1xf32>
    %227 = math.exp %226 : vector<1x1xf32>
    %cst_91 = arith.constant 1.000000e+00 : f32
    %228 = vector.broadcast %cst_91 : f32 to vector<1x1xf32>
    %229 = arith.addf %228, %227 : vector<1x1xf32>
    %cst_92 = arith.constant 1.000000e+00 : f32
    %230 = vector.broadcast %cst_92 : f32 to vector<1x1xf32>
    %231 = arith.divf %230, %229 : vector<1x1xf32>
    %c0_93 = arith.constant 0 : index
    %c0_94 = arith.constant 0 : index
    %232 = vector.load %arg3[%c0_93, %c0_94] : memref<1x1xf32, #tpu.memory_space<vmem>>, vector<1x1xf32>
    tpu.vector_store %arg3[%c0_93, %c0_94], %231 {strides = array<i32>} : memref<1x1xf32, #tpu.memory_space<vmem>>, vector<1x1xf32>,
    return
  }
}

</mosaic_0001>

<bundles_post_ra>
// kernel: tpu_custom_call.1
= control target key start
LH: loop header
LB: loop body
LE: loop exit
PB: predicated region body
PF: predicated region fallthrough
CT: control target
= control target key end

     0   :  { %8 = vsyncpa [#allocation3], 0  ;;  %s7025_s0 = inlined_call_operand.hbm [shape: f32[3,64], index: 0, kind: input, shape index: {}]   ;;  %s7026_s1 = inlined_call_operand.hbm [shape: f32[320,128], index: 1, kind: input, shape index: {}]   ;;  %s7027_s2 = inlined_call_operand.hbm [shape: f32[12,80,161], index: 2, kind: input, shape index: {}]   ;;  %s7028_s3 = inlined_call_operand.hbm [shape: f32[1,1], index: 3, kind: output, shape index: {}]  }
   0x1   :  { %9 = vsyncpa [#allocation6], 0  ;;  %s26_s14 = sshll.u32 %s7026_s1, 4  ;;  %s27_s14 = int_to_ptr.hbm [resolvable:$true] %s26_s14 }
   0x2   :  { %10 = vsyncpa [#allocation4], 0  ;;  %s4859_s15 = smov [#allocation5]   ;;  %s16_s19 = sshll.u32 %s7025_s0, 4  ;;  %s17_s19 = int_to_ptr.hbm [resolvable:$true] %s16_s19 }
   0x3   :  { %s28_s16 = sshll.u32 %s4859_s15, 4  ;;  %s4860_s20 = smov 128   ;;  %s29_s16 = int_to_ptr.vmem [resolvable:$true] %s28_s16 }
   0x4   :  { %s4861_s21 = smov 8   ;;  %s4862_s22 = smov [#allocation2]  }
   0x5   :  { %34 = dma.hbm_to_vmem [thread:$0]  %s27_s14, 5120, %s29_s16, [#allocation6], %s4860_s20, %s4860_s20, %s4861_s21  }
   0x6   :  { %s18_s23 = sshll.u32 %s4862_s22, 4  ;;  %s39_s26 = sshll.u32 %s7027_s2, 4  ;;  %s19_s23 = int_to_ptr.vmem [resolvable:$true] %s18_s23  ;;  %s40_s26 = int_to_ptr.hbm [resolvable:$true] %s39_s26 }
   0x7   :  { %21 = dma.hbm_to_vmem [thread:$0]  %s17_s19, 64, %s19_s23, [#allocation3]  }
   0x8   :  { %s4863_s1 = smov [#allocation7]   ;;  %s4864_s28 = smov 256  }
   0x9   :  { %s41_s27 = sshll.u32 %s4863_s1, 4  ;;  %s4865_s29 = smov 16   ;;  %s42_s27 = int_to_ptr.vmem [resolvable:$true] %s41_s27 }
   0xa   :  { %47 = dma.hbm_to_vmem [thread:$0]  %s40_s26, 30720, %s42_s27, [#allocation6], %s4864_s28, %s4864_s28, %s4865_s29  }
   0xb   :  { %4853 = dma.done.wait [#allocation3], 64  }
   0xc   :  { %4854 = vsyncadd [#allocation3], 4294967232 }
   0xd   :  { %4855 = dma.done.wait [#allocation6], 35840  }
   0xe   :  { %4856 = vsyncadd [#allocation6], 4294931456  ;;  %v4866_v0 = vmov 3   ;;  %vm222_vm0 = vcmask 1042432   ;;  %vm181_vm1 = vcmask 23552   ;;  %v70_v1 = vld [vmem:[#allocation5 + $0x48] sm:$0xff] }
   0xf   :  { %4736 = vset.pattern.permute.xlu0 %v4866_v0  ;;  %4737 = vset.pattern.permute.xlu1 %v4866_v0  ;;  %v60_v2 = vld [vmem:[#allocation2] sm:$0x7]  ;;  %v61_v3 = vld [vmem:[#allocation5] sm:$0xff]  ;;  %v66_v5 = vld [vmem:[#allocation5 + $0x28] sm:$0xff]  ;;  %v4867_v24 = vmov 80   ;;  %vm373_vm2 = vcmask 654336  }
  0x10   :  { %4738 = vset.pattern.permute.xlu2 %v4866_v0  ;;  %128 = vperm.xlu0 %4736, %v70_v1   ;;  %v68_v4 = vld [vmem:[#allocation5 + $0x38] sm:$0xff]  ;;  %v69_v6 = vld [vmem:[#allocation5 + $0x40] sm:$0xff]  ;;  %v62_v7 = vld [vmem:[#allocation5 + $0x8] sm:$0xff]  ;;  %s4868_s0 = smov 64   ;;  %vm494_vm3 = vcmask 1048064   ;;  %s4869_s2 = smov 65  }
  0x11   :  { %4425 = vmatpush.msk.msra.mxu0 %vm222_vm0, %v60_v2  ;;  %118 = vperm.xlu1 %4737, %v68_v4   ;;  %v67_v8 = vld [vmem:[#allocation5 + $0x30] sm:$0xff]  ;;  %v65_v9 = vld [vmem:[#allocation5 + $0x20] sm:$0xff]  ;;  %v64_v10 = vld [vmem:[#allocation5 + $0x18] sm:$0xff]  ;;  %vm655_vm4 = vcmask 261120   ;;  %s4871_s30 = smov 66   ;;  %s4872_s4 = smov 68  }
  0x12   :  { %4426 = vmatmul.msk.f32.vlgmr.msra.gmra.mxu0 %vm181_vm1, %v61_v3  ;;  %108 = vperm.xlu2 %4738, %v66_v5   ;;  %v63_v11 = vld [vmem:[#allocation5 + $0x10] sm:$0xff]  ;;  %v77_v12 = vld [vmem:[#allocation5 + $0x80] sm:$0xff]  ;;  %v80_v13 = vld [vmem:[#allocation5 + $0x98] sm:$0xff]  ;;  %s4873_s5 = smov 72   ;;  %s4874_s6 = smov 80   ;;  %vm4351_vm11 = vcmask 523264  }
  0x13   :  { %v4919_v14 = vld [vmem:[#allocation5 + $0x50] sm:$0xff]  ;;  %v4923_v15 = vld [vmem:[#allocation5 + $0x58] sm:$0xff]  ;;  %v73_v16 = vld [vmem:[#allocation5 + $0x60] sm:$0xff]  ;;  %s4875_s7 = smov 96   ;;  %s4876_s9 = smov [#allocation8]   ;;  %vm4405_vm0 = vcmask 0  }
  0x14   :  { %v74_v17 = vld [vmem:[#allocation5 + $0x68] sm:$0xff]  ;;  %v75_v18 = vld [vmem:[#allocation5 + $0x70] sm:$0xff]  ;;  %v76_v19 = vld [vmem:[#allocation5 + $0x78] sm:$0xff]  ;;  %s4412_s10 = sshll.u32 %s4876_s9, 4  ;;  %s4414_s13 = sshll.u32 %s7028_s3, 4  ;;  %s4413_s10 = int_to_ptr.vmem [resolvable:$true] %s4412_s10  ;;  %s4415_s13 = int_to_ptr.hbm [resolvable:$true] %s4414_s13 }
  0x15   :  { %v78_v22 = vld [vmem:[#allocation5 + $0x88] sm:$0xff]  ;;  %v79_v26 = vld [vmem:[#allocation5 + $0x90] sm:$0xff]  ;;  %v4952_v32 = vld [vmem:[#allocation5 + $0xc0] sm:$0xff] }
  0x16   :  { %v4936_v23 = vld [vmem:[#allocation5 + $0xe8] sm:$0xff]  ;;  %v4955_v33 = vld [vmem:[#allocation5 + $0xd8] sm:$0xff]  ;;  %v4959_v36 = vld [vmem:[#allocation5 + $0xd0] sm:$0xff] }
  0x17   :  { %v4949_v30 = vld [vmem:[#allocation5 + $0xc8] sm:$0xff]  ;;  %v4962_v40 = vld [vmem:[#allocation5 + $0xe0] sm:$0xff]  ;;  %v316_v44 = vld [vmem:[#allocation5 + $0xb8] sm:$0xff] }
  0x18   :  { %123 = vperm.xlu0 %4736, %v69_v6   ;;  %v313_v48 = vld [vmem:[#allocation5 + $0xa0] sm:$0xff]  ;;  %v315_v61 = vld [vmem:[#allocation5 + $0xb0] sm:$0xff] }
  0x19   :  { %113 = vperm.xlu1 %4737, %v67_v8  }
  0x1a   :  { %4427 = vmatmul.msk.f32.gmra.mxu0 %vm181_vm1, %v62_v7  ;;  %103 = vperm.xlu2 %4738, %v65_v9  }
  0x20   :  { %98 = vperm.xlu0 %4736, %v64_v10  }
  0x21   :  { %93 = vperm.xlu1 %4737, %v63_v11  }
  0x22   :  { %4428 = vmatmul.msk.f32.gmra.mxu0 %vm181_vm1, %v63_v11  ;;  %88 = vperm.xlu2 %4738, %v62_v7  }
  0x28   :  { %83 = vperm.xlu0 %4736, %v61_v3  }
  0x29   :  { %4739 = vset.pattern.permute.xlu1 %v4867_v24 }
  0x2a   :  { %4429 = vmatmul.msk.f32.gmra.mxu0 %vm181_vm1, %v64_v10  ;;  %178 = vperm.xlu2 %4738, %v80_v13  }
  0x2b   :  { %370 = vperm.xlu1 %4739, %v4936_v23  }
  0x30   :  { %163 = vperm.xlu0 %4736, %v77_v12  }
  0x32   :  { %4430 = vmatmul.msk.f32.gmra.mxu0 %vm181_vm1, %v65_v9  ;;  %4741 = vset.pattern.permute.xlu2 %v4867_v24 }
  0x33   :  { %4740 = vset.pattern.permute.xlu1 %v4866_v0  ;;  %360 = vperm.xlu2 %4741, %v4955_v33  }
  0x34   :  { %173 = vperm.xlu1 %4740, %v79_v26  }
  0x38   :  { %4742 = vset.pattern.permute.xlu0 %v4867_v24 }
  0x39   :  { %365 = vperm.xlu0 %4742, %v4962_v40  }
  0x3a   :  { %4431 = vmatmul.msk.f32.gmra.mxu0 %vm181_vm1, %v66_v5 }
  0x3b   :  { %355 = vperm.xlu2 %4741, %v4959_v36  }
  0x3c   :  { %168 = vperm.xlu1 %4740, %v78_v22  }
  0x41   :  { %340 = vperm.xlu0 %4742, %v316_v44  }
  0x42   :  { %4432 = vmatmul.msk.f32.gmra.mxu0 %vm181_vm1, %v67_v8  ;;  %v314_v8 = vld [vmem:[#allocation5 + $0xa8] sm:$0xff] }
  0x43   :  { %4744 = vset.pattern.permute.xlu2 %v4866_v0 }
  0x44   :  { %4743 = vset.pattern.permute.xlu1 %v4867_v24  ;;  %158 = vperm.xlu2 %4744, %v76_v19  }
  0x45   :  { %350 = vperm.xlu1 %4743, %v4949_v30  }
  0x49   :  { %4747 = vset.pattern.permute.xlu0 %v4866_v0 }
  0x4a   :  { %4433 = vmatmul.msk.f32.gmra.mxu0 %vm181_vm1, %v68_v4  ;;  %138 = vperm.xlu0 %4747, %v4923_v15  }
  0x4c   :  { %153 = vperm.xlu2 %4744, %v75_v18  }
  0x4d   :  { %345 = vperm.xlu1 %4743, %v4952_v32  }
  0x52   :  { %4434 = vmatmul.msk.f32.gmra.mxu0 %vm181_vm1, %v69_v6 }
  0x54   :  { %4746 = vset.pattern.permute.xlu2 %v4867_v24 }
  0x55   :  { %4745 = vset.pattern.permute.xlu1 %v4866_v0  ;;  %335 = vperm.xlu2 %4746, %v315_v61  }
  0x56   :  { %148 = vperm.xlu1 %4745, %v74_v17  }
  0x5a   :  { %4435 = vmatmul.msk.f32.gmra.mxu0 %vm181_vm1, %v70_v1 }
  0x5d   :  { %330 = vperm.xlu2 %4746, %v314_v8  }
  0x5e   :  { %143 = vperm.xlu1 %4745, %v73_v16  }
  0x62   :  { %4436 = vmatmul.msk.f32.gmra.mxu0 %vm181_vm1, %v4919_v14 }
  0x65   :  { %4749 = vset.pattern.permute.xlu2 %v4866_v0 }
  0x66   :  { %4748 = vset.pattern.permute.xlu1 %v4867_v24  ;;  %133 = vperm.xlu2 %4749, %v4919_v14  }
  0x67   :  { %325 = vperm.xlu1 %4748, %v313_v48  }
  0x6a   :  { %4437 = vmatmul.msk.f32.gmra.mxu0 %vm181_vm1, %v4923_v15 }
  0x6c   :  { %v109_v38 = vpop.permute.xlu2 %108 }
  0x72   :  { %4438 = vmatmul.msk.f32.gmra.mxu0 %vm181_vm1, %v73_v16 }
  0x74   :  { %v104_v47 = vpop.permute.xlu2 %103 }
  0x7a   :  { %4439 = vmatmul.msk.f32.gmra.mxu0 %vm181_vm1, %v74_v17 }
  0x7c   :  { %v89_v62 = vpop.permute.xlu2 %88 }
  0x82   :  { %4440 = vmatmul.msk.f32.gmra.mxu0 %vm181_vm1, %v75_v18  ;;  %v129_v34 = vpop.permute.xlu0 %128 }
  0x83   :  { %v119_v37 = vpop.permute.xlu1 %118 }
  0x84   :  { %v4983_v0 = vpop.permute.xlu2 %178 }
  0x8a   :  { %4441 = vmatmul.msk.f32.gmra.mxu0 %vm181_vm1, %v76_v19  ;;  %v124_v41 = vpop.permute.xlu0 %123 }
  0x8b   :  { %v114_v42 = vpop.permute.xlu1 %113 }
  0x8f   :  { %v4931_v20 = vpop.f32.mrf.mxu0 }
  0x92   :  { %4442 = vmatmul.msk.f32.gmra.mxu0 %vm181_vm1, %v77_v12  ;;  %v99_v51 = vpop.permute.xlu0 %98 }
  0x93   :  { %v94_v58 = vpop.permute.xlu1 %93 }
  0x97   :  { %v4934_v21 = vpop.f32.mrf.mxu0 }
  0x98   :  { %v247_v3 = vadd.f32 %v4934_v21, %v89_v62 }
  0x9a   :  { %4443 = vmatmul.msk.f32.gmra.mxu0 %vm181_vm1, %v78_v22  ;;  %v84_v2 = vpop.permute.xlu0 %83  ;;  %v304_v7 = vmax.f32 %v247_v3, 0.0 }
  0x9b   :  { %v244_v5 = vadd.f32 %v4931_v20, %v84_v2 }
  0x9d   :  { %v303_v9 = vmax.f32 %v244_v5, 0.0  ;;  %v4981_v10 = vpop.permute.xlu1 %370 }
  0x9f   :  { %v4943_v25 = vpop.f32.mrf.mxu0 }
  0xa0   :  { %v250_v63 = vadd.f32 %v4943_v25, %v94_v58 }
  0xa2   :  { %4444 = vmatmul.msk.f32.gmra.mxu0 %vm181_vm1, %v79_v26  ;;  %v305_v6 = vmax.f32 %v250_v63, 0.0  ;;  %v4993_v24 = vpop.permute.xlu0 %163 }
  0xa6   :  { %v4985_v12 = vpop.permute.xlu1 %173 }
  0xa7   :  { %v252_v27 = vpop.f32.mrf.mxu0 }
  0xa8   :  { %v253_v59 = vadd.f32 %v252_v27, %v99_v51 }
  0xaa   :  { %4445 = vmatmul.msk.f32.gmra.mxu0 %vm181_vm1, %v80_v13  ;;  %v306_v4 = vmax.f32 %v253_v59, 0.0  ;;  %v4987_v13 = vpop.permute.xlu2 %360 }
  0xae   :  { %v4989_v15 = vpop.permute.xlu1 %168 }
  0xaf   :  { %v255_v28 = vpop.f32.mrf.mxu0 }
  0xb0   :  { %v256_v56 = vadd.f32 %v255_v28, %v104_v47 }
  0xb2   :  { %v307_v1 = vmax.f32 %v256_v56, 0.0  ;;  %v4991_v16 = vpop.permute.xlu2 %355 }
  0xb7   :  { %v258_v29 = vpop.f32.mrf.mxu0  ;;  %v351_v19 = vpop.permute.xlu1 %350 }
  0xb8   :  { %v259_v54 = vadd.f32 %v258_v29, %v109_v38  ;;  %v366_v29 = vpop.permute.xlu0 %365 }
  0xba   :  { %v308_v60 = vmax.f32 %v259_v54, 0.0  ;;  %v159_v20 = vpop.permute.xlu2 %158 }
  0xbf   :  { %v261_v31 = vpop.f32.mrf.mxu0 }
  0xc0   :  { %v262_v52 = vadd.f32 %v261_v31, %v114_v42 }
  0xc2   :  { %v309_v57 = vmax.f32 %v262_v52, 0.0  ;;  %v154_v25 = vpop.permute.xlu2 %153 }
  0xc7   :  { %v264_v35 = vpop.f32.mrf.mxu0 }
  0xc8   :  { %v265_v49 = vadd.f32 %v264_v35, %v119_v37  ;;  %v341_v35 = vpop.permute.xlu0 %340 }
  0xca   :  { %v310_v55 = vmax.f32 %v265_v49, 0.0  ;;  %v336_v31 = vpop.permute.xlu2 %335 }
  0xcf   :  { %v267_v39 = vpop.f32.mrf.mxu0 }
  0xd0   :  { %v268_v45 = vadd.f32 %v267_v39, %v124_v41  ;;  %v139_v52 = vpop.permute.xlu0 %138 }
  0xd2   :  { %v311_v53 = vmax.f32 %v268_v45, 0.0 }
  0xd7   :  { %v270_v43 = vpop.f32.mrf.mxu0 }
  0xd8   :  { %v271_v46 = vadd.f32 %v270_v43, %v129_v34 }
  0xda   :  { %v312_v50 = vmax.f32 %v271_v46, 0.0 }
  0xdc   :  { %400 = vmatpush.msra.mxu1 %v312_v50 }
  0xde   :  { %401 = vmatpush.msra.mxu1 %v311_v53 }
  0xdf   :  { %v273_v11 = vpop.f32.mrf.mxu0 }
  0xe0   :  { %402 = vmatpush.msra.mxu1 %v310_v55 }
  0xe2   :  { %403 = vmatpush.msra.mxu1 %v309_v57 }
  0xe4   :  { %404 = vmatpush.msra.mxu1 %v308_v60 }
  0xe6   :  { %405 = vmatpush.msra.mxu1 %v307_v1 }
  0xe7   :  { %v276_v14 = vpop.f32.mrf.mxu0 }
  0xe8   :  { %406 = vmatpush.msra.mxu1 %v306_v4  ;;  %v277_v59 = vadd.f32 %v276_v14, %v139_v52 }
  0xea   :  { %407 = vmatpush.msra.mxu1 %v305_v6 }
  0xec   :  { %408 = vmatpush.msra.mxu1 %v304_v7 }
  0xee   :  { %409 = vmatpush.msra.mxu1 %v303_v9 }
  0xef   :  { %4446 = vmatmul.msk.f32.vlgmr.msra.gmra.mxu1 %vm373_vm2, %v313_v48  ;;  %v279_v18 = vpop.f32.mrf.mxu0 }
  0xf7   :  { %4447 = vmatmul.msk.f32.gmra.mxu1 %vm373_vm2, %v314_v8  ;;  %v282_v22 = vpop.f32.mrf.mxu0 }
  0xff   :  { %4448 = vmatmul.msk.f32.gmra.mxu1 %vm373_vm2, %v315_v61  ;;  %v285_v27 = vpop.f32.mrf.mxu0 }
 0x100   :  { %v286_v41 = vadd.f32 %v285_v27, %v154_v25 }
 0x107   :  { %4449 = vmatmul.msk.f32.gmra.mxu1 %vm373_vm2, %v316_v44 }
 0x10f   :  { %4450 = vmatmul.msk.f32.gmra.mxu1 %vm373_vm2, %v4952_v32  ;;  %v288_v32 = vpop.f32.mrf.mxu0 }
 0x110   :  { %v289_v39 = vadd.f32 %v288_v32, %v159_v20 }
 0x117   :  { %4451 = vmatmul.msk.f32.gmra.mxu1 %vm373_vm2, %v4949_v30  ;;  %v291_v45 = vpop.f32.mrf.mxu0 }
 0x11f   :  { %4452 = vmatmul.msk.f32.gmra.mxu1 %vm373_vm2, %v4959_v36  ;;  %v331_v36 = vpop.permute.xlu2 %330  ;;  %v294_v6 = vpop.f32.mrf.mxu0 }
 0x127   :  { %4453 = vmatmul.msk.f32.gmra.mxu1 %vm373_vm2, %v4955_v33  ;;  %v134_v57 = vpop.permute.xlu2 %133 }
 0x128   :  { %v274_v1 = vadd.f32 %v273_v11, %v134_v57 }
 0x12f   :  { %4454 = vmatmul.msk.f32.gmra.mxu1 %vm373_vm2, %v4962_v40 }
 0x137   :  { %4455 = vmatmul.msk.f32.gmra.mxu1 %vm373_vm2, %v4936_v23  ;;  %v346_v23 = vpop.permute.xlu1 %345 }
 0x13f   :  { %v149_v28 = vpop.permute.xlu1 %148 }
 0x140   :  { %v283_v47 = vadd.f32 %v282_v22, %v149_v28 }
 0x147   :  { %v144_v33 = vpop.permute.xlu1 %143 }
 0x148   :  { %v280_v51 = vadd.f32 %v279_v18, %v144_v33  ;;  %v295_v18 = vadd.f32 %v294_v6, %v4989_v15 }
 0x14f   :  { %v326_v46 = vpop.permute.xlu1 %325 }
 0x16c   :  { %v411_v17 = vpop.f32.mrf.mxu1 }
 0x16d   :  { %v5008_v53 = vadd.f32 %v411_v17, %v326_v46 }
 0x16f   :  { %v7048_v63 = vmax.f32 %v5008_v53, 0.0 }
 0x171   :  { %v451_v7 = vadd.f32 %v7048_v63, %v274_v1 }
 0x173   :  { %v5039_v14 = vmax.f32 %v451_v7, 0.0 }
 0x174   :  { %v414_v21 = vpop.f32.mrf.mxu1 }
 0x175   :  { %v5004_v48 = vadd.f32 %v414_v21, %v331_v36  ;;  %v297_v21 = vpop.f32.mrf.mxu0 }
 0x177   :  { %v7046_v58 = vmax.f32 %v5004_v48, 0.0 }
 0x179   :  { %v452_v4 = vadd.f32 %v7046_v58, %v277_v59 }
 0x17b   :  { %v5036_v9 = vmax.f32 %v452_v4, 0.0 }
 0x17c   :  { %v417_v26 = vpop.f32.mrf.mxu1 }
 0x17d   :  { %v4999_v42 = vadd.f32 %v417_v26, %v336_v31  ;;  %v300_v28 = vpop.f32.mrf.mxu0 }
 0x17f   :  { %v7044_v54 = vmax.f32 %v4999_v42, 0.0 }
 0x181   :  { %v453_v2 = vadd.f32 %v7044_v54, %v280_v51 }
 0x183   :  { %v5033_v8 = vmax.f32 %v453_v2, 0.0 }
 0x184   :  { %v420_v30 = vpop.f32.mrf.mxu1 }
 0x185   :  { %v4997_v38 = vadd.f32 %v420_v30, %v341_v35 }
 0x187   :  { %v7042_v49 = vmax.f32 %v4997_v38, 0.0 }
 0x189   :  { %v454_v60 = vadd.f32 %v7042_v49, %v283_v47 }
 0x18b   :  { %v5028_v5 = vmax.f32 %v454_v60, 0.0 }
 0x18c   :  { %v423_v34 = vpop.f32.mrf.mxu1 }
 0x18d   :  { %v4995_v37 = vadd.f32 %v423_v34, %v346_v23 }
 0x18f   :  { %v7040_v43 = vmax.f32 %v4995_v37, 0.0 }
 0x191   :  { %v455_v55 = vadd.f32 %v7040_v43, %v286_v41 }
 0x193   :  { %v5023_v3 = vmax.f32 %v455_v55, 0.0 }
 0x194   :  { %v426_v40 = vpop.f32.mrf.mxu1 }
 0x195   :  { %v5002_v44 = vadd.f32 %v426_v40, %v351_v19 }
 0x197   :  { %v7038_v50 = vmax.f32 %v5002_v44, 0.0 }
 0x199   :  { %v456_v56 = vadd.f32 %v7038_v50, %v289_v39 }
 0x19b   :  { %v5018_v61 = vmax.f32 %v456_v56, 0.0 }
 0x19c   :  { %v429_v62 = vpop.f32.mrf.mxu1 }
 0x19d   :  { %676 = vmatpush.msra.mxu2 %v5018_v61  ;;  %v5063_v31 = vadd.f32 %v429_v62, %v4991_v16  ;;  %v292_v16 = vadd.f32 %v291_v45, %v4993_v24 }
 0x19f   :  { %677 = vmatpush.msra.mxu2 %v5023_v3  ;;  %v7036_v33 = vmax.f32 %v5063_v31, 0.0 }
 0x1a1   :  { %678 = vmatpush.msra.mxu2 %v5028_v5 }
 0x1a3   :  { %679 = vmatpush.msra.mxu2 %v5033_v8 }
 0x1a4   :  { %v432_v11 = vpop.f32.mrf.mxu1 }
 0x1a5   :  { %v5042_v17 = vadd.f32 %v432_v11, %v4987_v13  ;;  %680 = vmatpush.msra.mxu2 %v5036_v9  ;;  %v298_v13 = vadd.f32 %v297_v21, %v4985_v12  ;;  %v301_v12 = vadd.f32 %v300_v28, %v4983_v0 }
 0x1a7   :  { %v7034_v19 = vmax.f32 %v5042_v17, 0.0  ;;  %681 = vmatpush.msra.mxu2 %v5039_v14 }
 0x1a9   :  { %v458_v20 = vadd.f32 %v7034_v19, %v295_v18 }
 0x1ab   :  { %v5050_v22 = vmax.f32 %v458_v20, 0.0 }
 0x1ac   :  { %v435_v23 = vpop.f32.mrf.mxu1 }
 0x1ad   :  { %v5052_v25 = vadd.f32 %v435_v23, %v366_v29  ;;  %516 = vrot.lane.b32.xlu0 %v5050_v22, %s4868_s0 }
 0x1af   :  { %v7030_v15 = vmax.f32 %v5052_v25, 0.0 }
 0x1b1   :  { %v459_v26 = vadd.f32 %v7030_v15, %v298_v13 }
 0x1b3   :  { %v5060_v27 = vmax.f32 %v459_v26, 0.0 }
 0x1b4   :  { %v438_v30 = vpop.f32.mrf.mxu1 }
 0x1b5   :  { %v5066_v29 = vadd.f32 %v438_v30, %v4981_v10  ;;  %519 = vrot.lane.b32.xlu2 %v5060_v27, %s4868_s0  ;;  %507 = vrot.lane.b32.xlu0 %v5023_v3, %s4868_s0  ;;  %v457_v10 = vadd.f32 %v7036_v33, %v292_v16 }
 0x1b7   :  { %v7029_v32 = vmax.f32 %v5066_v29, 0.0  ;;  %v5090_v0 = vmax.f32 %v457_v10, 0.0 }
 0x1b9   :  { %v460_v34 = vadd.f32 %v7029_v32, %v301_v12 }
 0x1bb   :  { %v5078_v35 = vmax.f32 %v460_v34, 0.0 }
 0x1bd   :  { %522 = vrot.lane.b32.xlu1 %v5078_v35, %s4868_s0  ;;  %735 = vmatpush.msra.mxu3 %v5078_v35 }
 0x1be   :  { %510 = vrot.lane.b32.xlu2 %v5018_v61, %s4868_s0  ;;  %498 = vrot.lane.b32.xlu0 %v5036_v9, %s4868_s0 }
 0x1bf   :  { %736 = vmatpush.msra.mxu3 %v5060_v27 }
 0x1c1   :  { %737 = vmatpush.msra.mxu3 %v5050_v22 }
 0x1c3   :  { %738 = vmatpush.msra.mxu3 %v5090_v0 }
 0x1c5   :  { %513 = vrot.lane.b32.xlu1 %v5090_v0, %s4868_s0 }
 0x1c6   :  { %501 = vrot.lane.b32.xlu2 %v5033_v8, %s4868_s0 }
 0x1cd   :  { %504 = vrot.lane.b32.xlu1 %v5028_v5, %s4868_s0 }
 0x1d5   :  { %495 = vrot.lane.b32.xlu1 %v5039_v14, %s4868_s0 }
 0x20f   :  { %v520_v24 = vpop.permute.xlu2 %519 }
 0x210   :  { %v521_v36 = vsel %vm494_vm3, %v520_v24, %v5060_v27 }
 0x211   :  { %541 = vrot.lane.b32.xlu0 %v521_v36, %s4868_s0 }
 0x218   :  { %v511_v39 = vpop.permute.xlu2 %510 }
 0x219   :  { %v512_v40 = vsel %vm494_vm3, %v511_v39, %v5018_v61 }
 0x21a   :  { %535 = vrot.lane.b32.xlu0 %v512_v40, %s4868_s0 }
 0x21f   :  { %v517_v41 = vpop.permute.xlu0 %516 }
 0x220   :  { %v502_v45 = vpop.permute.xlu2 %501  ;;  %v518_v46 = vsel %vm494_vm3, %v517_v41, %v5050_v22 }
 0x221   :  { %v503_v47 = vsel %vm494_vm3, %v502_v45, %v5033_v8  ;;  %539 = vrot.lane.b32.xlu1 %v518_v46, %s4868_s0  ;;  %v471_v46 = vlaneseq }
 0x222   :  { %529 = vrot.lane.b32.xlu0 %v503_v47, %s4868_s0 }
 0x223   :  { %v5162_v47 = vand.u32 127, %v471_v46 }
 0x225   :  { %vm473_vm5 = vcmp.ge.s32.totalorder %v5162_v47, 1  ;;  %vm1115_vm6 = vcmp.ge.s32.totalorder %v5162_v47, 2  ;;  %vm1756_vm7 = vcmp.ge.s32.totalorder %v5162_v47, 4  ;;  %vm2397_vm8 = vcmp.ge.s32.totalorder %v5162_v47, 8 }
 0x226   :  { %vm3038_vm9 = vcmp.ge.s32.totalorder %v5162_v47, 16  ;;  %vm3679_vm10 = vcmp.ge.s32.totalorder %v5162_v47, 32  ;;  %v3994_v47 = vld [vmem:[#allocation7 + $0x720] sm:$0xff] }
 0x227   :  { %v508_v51 = vpop.permute.xlu0 %507 }
 0x228   :  { %v509_v52 = vsel %vm494_vm3, %v508_v51, %v5023_v3  ;;  %v4870_v51 = vmov 32  }
 0x229   :  { %533 = vrot.lane.b32.xlu1 %v509_v52, %s4868_s0  ;;  %v5164_v52 = vld [vmem:[#allocation7 + $0x98] sm:$0xff]  ;;  %4751 = vset.pattern.permute.xlu2 %v4870_v51 }
 0x22a   :  { %4750 = vset.pattern.permute.xlu1 %v4870_v51  ;;  %4752 = vset.pattern.permute.xlu0 %v4870_v51 }
 0x22f   :  { %v523_v55 = vpop.permute.xlu1 %522 }
 0x230   :  { %v499_v56 = vpop.permute.xlu0 %498  ;;  %v524_v57 = vsel %vm494_vm3, %v523_v55, %v5078_v35  ;;  %v475_v55 = vld [vmem:[#allocation7 + $0x8] sm:$0xff] }
 0x231   :  { %543 = vrot.lane.b32.xlu2 %v524_v57, %s4868_s0  ;;  %v500_v59 = vsel %vm494_vm3, %v499_v56, %v5036_v9  ;;  %4466 = vmatmul.msk.f32.vlgmr.msra.gmra.mxu3 %vm655_vm4, %v475_v55 }
 0x232   :  { %527 = vrot.lane.b32.xlu1 %v500_v59, %s4868_s0 }
 0x237   :  { %v514_v60 = vpop.permute.xlu1 %513 }
 0x238   :  { %v515_v62 = vsel %vm494_vm3, %v514_v60, %v5090_v0  ;;  %v487_v60 = vld [vmem:[#allocation7 + $0x68] sm:$0xff] }
 0x239   :  { %537 = vrot.lane.b32.xlu2 %v515_v62, %s4868_s0  ;;  %v477_v62 = vld [vmem:[#allocation7 + $0x18] sm:$0xff] }
 0x23a   :  { %4467 = vmatmul.msk.f32.gmra.mxu3 %vm655_vm4, %v477_v62 }
 0x23f   :  { %v505_v1 = vpop.permute.xlu1 %504 }
 0x240   :  { %v506_v2 = vsel %vm494_vm3, %v505_v1, %v5028_v5 }
 0x241   :  { %531 = vrot.lane.b32.xlu2 %v506_v2, %s4868_s0 }
 0x247   :  { %v496_v4 = vpop.permute.xlu1 %495 }
 0x248   :  { %v497_v6 = vsel %vm494_vm3, %v496_v4, %v5039_v14 }
 0x249   :  { %525 = vrot.lane.b32.xlu2 %v497_v6, %s4868_s0  ;;  %v483_v6 = vld [vmem:[#allocation7 + $0x48] sm:$0xff] }
 0x283   :  { %v542_v7 = vpop.permute.xlu0 %541 }
 0x284   :  { %v553_v11 = vsel %vm494_vm3, %v542_v7, %v5060_v27  ;;  %v491_v7 = vld [vmem:[#allocation7 + $0x88] sm:$0xff] }
 0x285   :  { %581 = vrot.lane.b32.xlu1 %v553_v11, %s4869_s2  ;;  %v479_v11 = vld [vmem:[#allocation7 + $0x28] sm:$0xff] }
 0x286   :  { %4468 = vmatmul.msk.f32.gmra.mxu3 %vm655_vm4, %v479_v11 }
 0x28b   :  { %v544_v18 = vpop.permute.xlu2 %543 }
 0x28c   :  { %v536_v20 = vpop.permute.xlu0 %535  ;;  %v554_v21 = vsel %vm494_vm3, %v544_v18, %v5078_v35 }
 0x28d   :  { %583 = vrot.lane.b32.xlu0 %v554_v21, %s4869_s2  ;;  %v550_v23 = vsel %vm494_vm3, %v536_v20, %v5018_v61  ;;  %v489_v21 = vld [vmem:[#allocation7 + $0x78] sm:$0xff] }
 0x28e   :  { %575 = vrot.lane.b32.xlu1 %v550_v23, %s4869_s2  ;;  %v485_v23 = vld [vmem:[#allocation7 + $0x58] sm:$0xff] }
 0x293   :  { %v538_v13 = vpop.permute.xlu2 %537  ;;  %v540_v26 = vpop.permute.xlu1 %539 }
 0x294   :  { %v530_v28 = vpop.permute.xlu0 %529  ;;  %v551_v30 = vsel %vm494_vm3, %v538_v13, %v5090_v0  ;;  %v552_v12 = vsel %vm494_vm3, %v540_v26, %v5050_v22  ;;  %v481_v13 = vld [vmem:[#allocation7 + $0x38] sm:$0xff] }
 0x295   :  { %577 = vrot.lane.b32.xlu0 %v551_v30, %s4869_s2  ;;  %v547_v34 = vsel %vm494_vm3, %v530_v28, %v5033_v8  ;;  %579 = vrot.lane.b32.xlu2 %v552_v12, %s4869_s2  ;;  %v474_v28 = vld [vmem:[#allocation7] sm:$0xff]  ;;  %v476_v12 = vld [vmem:[#allocation7 + $0x10] sm:$0xff] }
 0x296   :  { %569 = vrot.lane.b32.xlu1 %v547_v34, %s4869_s2  ;;  %4469 = vmatmul.msk.f32.gmra.mxu3 %vm655_vm4, %v481_v13  ;;  %v478_v34 = vld [vmem:[#allocation7 + $0x20] sm:$0xff] }
 0x29b   :  { %v532_v16 = vpop.permute.xlu2 %531  ;;  %v534_v10 = vpop.permute.xlu1 %533 }
 0x29c   :  { %v548_v24 = vsel %vm494_vm3, %v532_v16, %v5028_v5  ;;  %v549_v36 = vsel %vm494_vm3, %v534_v10, %v5023_v3  ;;  %v480_v16 = vld [vmem:[#allocation7 + $0x30] sm:$0xff]  ;;  %v482_v10 = vld [vmem:[#allocation7 + $0x40] sm:$0xff] }
 0x29d   :  { %571 = vrot.lane.b32.xlu0 %v548_v24, %s4869_s2  ;;  %573 = vrot.lane.b32.xlu2 %v549_v36, %s4869_s2  ;;  %v484_v24 = vld [vmem:[#allocation7 + $0x50] sm:$0xff]  ;;  %v486_v36 = vld [vmem:[#allocation7 + $0x60] sm:$0xff] }
 0x29e   :  { %652 = vperm.xlu1 %4750, %v5164_v52   ;;  %4470 = vmatmul.msk.f32.gmra.mxu3 %vm655_vm4, %v483_v6 }
 0x2a3   :  { %v526_v39 = vpop.permute.xlu2 %525 }
 0x2a4   :  { %v528_v40 = vpop.permute.xlu1 %527  ;;  %v545_v41 = vsel %vm494_vm3, %v526_v39, %v5039_v14  ;;  %v488_v39 = vld [vmem:[#allocation7 + $0x70] sm:$0xff] }
 0x2a5   :  { %565 = vrot.lane.b32.xlu0 %v545_v41, %s4869_s2  ;;  %v546_v45 = vsel %vm494_vm3, %v528_v40, %v5036_v9  ;;  %v490_v40 = vld [vmem:[#allocation7 + $0x80] sm:$0xff]  ;;  %v492_v41 = vld [vmem:[#allocation7 + $0x90] sm:$0xff] }
 0x2a6   :  { %567 = vrot.lane.b32.xlu2 %v546_v45, %s4869_s2  ;;  %637 = vperm.xlu1 %4750, %v487_v60  }
 0x2a7   :  { %4471 = vmatmul.msk.f32.gmra.mxu3 %vm655_vm4, %v485_v23 }
 0x2ad   :  { %642 = vperm.xlu0 %4752, %v489_v21  }
 0x2ae   :  { %627 = vperm.xlu1 %4750, %v483_v6   ;;  %647 = vperm.xlu2 %4751, %v491_v7  }
 0x2af   :  { %4472 = vmatmul.msk.f32.gmra.mxu3 %vm655_vm4, %v487_v60 }
 0x2b4   :  { %v740_v45 = vpop.f32.mrf.mxu3 }
 0x2b5   :  { %617 = vperm.xlu0 %4752, %v479_v11  }
 0x2b6   :  { %612 = vperm.xlu1 %4750, %v477_v62   ;;  %632 = vperm.xlu2 %4751, %v485_v23  }
 0x2b7   :  { %4473 = vmatmul.msk.f32.gmra.mxu3 %vm655_vm4, %v489_v21 }
 0x2bd   :  { %v743_v46 = vpop.f32.mrf.mxu3 }
 0x2be   :  { %622 = vperm.xlu2 %4751, %v481_v13  }
 0x2bf   :  { %4474 = vmatmul.msk.f32.gmra.mxu3 %vm655_vm4, %v491_v7 }
 0x2c6   :  { %607 = vperm.xlu2 %4751, %v475_v55  }
 0x2c7   :  { %4475 = vmatmul.msk.f32.gmra.mxu3 %vm655_vm4, %v5164_v52 }
 0x2ef   :  { %v580_v57 = vpop.permute.xlu2 %579 }
 0x2f7   :  { %v582_v56 = vpop.permute.xlu1 %581  ;;  %v574_v4 = vpop.permute.xlu2 %573 }
 0x2ff   :  { %v584_v59 = vpop.permute.xlu0 %583 }
 0x300   :  { %4456 = vmatpush.msk.msra.mxu2 %vm473_vm5, %v584_v59  ;;  %v576_v1 = vpop.permute.xlu1 %575  ;;  %v568_v26 = vpop.permute.xlu2 %567 }
 0x302   :  { %4457 = vmatpush.msk.msra.mxu2 %vm473_vm5, %v582_v56 }
 0x304   :  { %4458 = vmatpush.msk.msra.mxu2 %vm473_vm5, %v580_v57 }
 0x307   :  { %v578_v2 = vpop.permute.xlu0 %577 }
 0x308   :  { %4459 = vmatpush.msk.msra.mxu2 %vm473_vm5, %v578_v2  ;;  %v570_v20 = vpop.permute.xlu1 %569  ;;  %v648_v60 = vpop.permute.xlu2 %647 }
 0x309   :  { %v746_v55 = vpop.f32.mrf.mxu3 }
 0x30a   :  { %4460 = vmatpush.msk.msra.mxu2 %vm473_vm5, %v576_v1 }
 0x30c   :  { %4461 = vmatpush.msk.msra.mxu2 %vm473_vm5, %v574_v4 }
 0x30f   :  { %v572_v18 = vpop.permute.xlu0 %571 }
 0x310   :  { %4462 = vmatpush.msk.msra.mxu2 %vm473_vm5, %v572_v18  ;;  %v653_v57 = vpop.permute.xlu1 %652  ;;  %v633_v52 = vpop.permute.xlu2 %632 }
 0x312   :  { %4463 = vmatpush.msk.msra.mxu2 %vm473_vm5, %v570_v20 }
 0x314   :  { %4464 = vmatpush.msk.msra.mxu2 %vm473_vm5, %v568_v26 }
 0x317   :  { %v566_v30 = vpop.permute.xlu0 %565 }
 0x318   :  { %4465 = vmatpush.msk.msra.mxu2 %vm473_vm5, %v566_v30  ;;  %v638_v1 = vpop.permute.xlu1 %637  ;;  %v623_v20 = vpop.permute.xlu2 %622 }
 0x319   :  { %692 = vmatmul.f32.vlgmr.msra.gmra.mxu2 %v474_v28  ;;  %v749_v59 = vpop.f32.mrf.mxu3 }
 0x31f   :  { %v643_v6 = vpop.permute.xlu0 %642 }
 0x320   :  { %v628_v7 = vpop.permute.xlu1 %627 }
 0x321   :  { %695 = vmatmul.f32.gmra.mxu2 %v476_v12  ;;  %v752_v2 = vpop.f32.mrf.mxu3 }
 0x327   :  { %v618_v23 = vpop.permute.xlu0 %617 }
 0x328   :  { %v613_v30 = vpop.permute.xlu1 %612 }
 0x329   :  { %698 = vmatmul.f32.gmra.mxu2 %v478_v34 }
 0x32a   :  { %v755_v18 = vpop.f32.mrf.mxu3 }
 0x331   :  { %701 = vmatmul.f32.gmra.mxu2 %v480_v16 }
 0x332   :  { %v758_v12 = vpop.f32.mrf.mxu3 }
 0x339   :  { %704 = vmatmul.f32.gmra.mxu2 %v482_v10 }
 0x341   :  { %707 = vmatmul.f32.gmra.mxu2 %v484_v24  ;;  %v608_v24 = vpop.permute.xlu2 %607 }
 0x349   :  { %710 = vmatmul.f32.gmra.mxu2 %v486_v36 }
 0x351   :  { %713 = vmatmul.f32.gmra.mxu2 %v488_v39 }
 0x359   :  { %716 = vmatmul.f32.gmra.mxu2 %v490_v40 }
 0x361   :  { %719 = vmatmul.f32.gmra.mxu2 %v492_v41 }
 0x39c   :  { %v693_v51 = vpop.f32.mrf.mxu2 }
 0x39d   :  { %v694_v41 = vadd.f32 %v693_v51, %v608_v24 }
 0x3a4   :  { %v696_v56 = vpop.f32.mrf.mxu2 }
 0x3a5   :  { %v697_v36 = vadd.f32 %v696_v56, %v613_v30  ;;  %v761_v56 = vpop.f32.mrf.mxu3 }
 0x3ac   :  { %v699_v62 = vpop.f32.mrf.mxu2 }
 0x3ad   :  { %v700_v34 = vadd.f32 %v699_v62, %v618_v23  ;;  %v741_v62 = vadd.f32 %v740_v45, %v694_v41  ;;  %v764_v45 = vpop.f32.mrf.mxu3 }
 0x3af   :  { %v747_v32 = vadd.f32 %v746_v55, %v700_v34  ;;  %v5213_v51 = vmax.f32 %v741_v62, 0.0 }
 0x3b4   :  { %v702_v4 = vpop.f32.mrf.mxu2 }
 0x3b5   :  { %v703_v26 = vadd.f32 %v702_v4, %v623_v20 }
 0x3b7   :  { %v750_v39 = vadd.f32 %v749_v59, %v703_v26  ;;  %v767_v26 = vpop.f32.mrf.mxu3 }
 0x3b9   :  { %v5204_v4 = vmax.f32 %v750_v39, 0.0 }
 0x3bc   :  { %v705_v11 = vpop.f32.mrf.mxu2 }
 0x3bd   :  { %v706_v21 = vadd.f32 %v705_v11, %v628_v7  ;;  %v744_v11 = vadd.f32 %v743_v46, %v697_v36 }
 0x3bf   :  { %v753_v16 = vadd.f32 %v752_v2, %v706_v21  ;;  %v5207_v2 = vmax.f32 %v747_v32, 0.0  ;;  %v5210_v59 = vmax.f32 %v744_v11, 0.0 }
 0x3c1   :  { %v5201_v15 = vmax.f32 %v753_v16, 0.0 }
 0x3c4   :  { %v708_v13 = vpop.f32.mrf.mxu2 }
 0x3c5   :  { %v709_v28 = vadd.f32 %v708_v13, %v633_v52 }
 0x3c7   :  { %v756_v10 = vadd.f32 %v755_v18, %v709_v28 }
 0x3c9   :  { %v5199_v40 = vmax.f32 %v756_v10, 0.0 }
 0x3cb   :  { %981 = vmatpush.msrb.mxu3 %v5199_v40 }
 0x3cc   :  { %v711_v7 = vpop.f32.mrf.mxu2 }
 0x3cd   :  { %982 = vmatpush.msrb.mxu3 %v5201_v15 }
 0x3cf   :  { %983 = vmatpush.msrb.mxu3 %v5204_v4 }
 0x3d1   :  { %984 = vmatpush.msrb.mxu3 %v5207_v2 }
 0x3d3   :  { %985 = vmatpush.msrb.mxu3 %v5210_v59 }
 0x3d4   :  { %v714_v55 = vpop.f32.mrf.mxu2 }
 0x3d5   :  { %v715_v46 = vadd.f32 %v714_v55, %v643_v6  ;;  %986 = vmatpush.msrb.mxu3 %v5213_v51  ;;  %v712_v6 = vadd.f32 %v711_v7, %v638_v1 }
 0x3d7   :  { %v762_v52 = vadd.f32 %v761_v56, %v715_v46  ;;  %v759_v16 = vadd.f32 %v758_v12, %v712_v6 }
 0x3d9   :  { %v777_v18 = vmax.f32 %v762_v52, 0.0 }
 0x3db   :  { %822 = vrot.lane.b32.xlu2 %v777_v18, %s4868_s0 }
 0x3dc   :  { %v717_v32 = vpop.f32.mrf.mxu2 }
 0x3dd   :  { %v718_v20 = vadd.f32 %v717_v32, %v648_v60  ;;  %v5230_v60 = vmax.f32 %v759_v16, 0.0 }
 0x3df   :  { %v765_v21 = vadd.f32 %v764_v45, %v718_v20 }
 0x3e1   :  { %v778_v23 = vmax.f32 %v765_v21, 0.0 }
 0x3e3   :  { %825 = vrot.lane.b32.xlu1 %v778_v23, %s4868_s0  ;;  %813 = vrot.lane.b32.xlu2 %v5201_v15, %s4868_s0 }
 0x3e4   :  { %v720_v13 = vpop.f32.mrf.mxu2 }
 0x3e5   :  { %v721_v28 = vadd.f32 %v720_v13, %v653_v57 }
 0x3e7   :  { %v768_v30 = vadd.f32 %v767_v26, %v721_v28 }
 0x3e9   :  { %v5221_v34 = vmax.f32 %v768_v30, 0.0 }
 0x3eb   :  { %828 = vrot.lane.b32.xlu0 %v5221_v34, %s4868_s0  ;;  %1040 = vmatpush.msrb.mxu1 %v5221_v34 }
 0x3ec   :  { %816 = vrot.lane.b32.xlu1 %v5199_v40, %s4868_s0  ;;  %804 = vrot.lane.b32.xlu2 %v5210_v59, %s4868_s0 }
 0x3ed   :  { %1041 = vmatpush.msrb.mxu1 %v778_v23 }
 0x3ef   :  { %1042 = vmatpush.msrb.mxu1 %v777_v18 }
 0x3f1   :  { %1043 = vmatpush.msrb.mxu1 %v5230_v60 }
 0x3f3   :  { %819 = vrot.lane.b32.xlu0 %v5230_v60, %s4868_s0 }
 0x3f4   :  { %807 = vrot.lane.b32.xlu1 %v5207_v2, %s4868_s0 }
 0x3fb   :  { %810 = vrot.lane.b32.xlu0 %v5204_v4, %s4868_s0 }
 0x403   :  { %801 = vrot.lane.b32.xlu0 %v5213_v51, %s4868_s0 }
 0x435   :  { %v823_v57 = vpop.permute.xlu2 %822 }
 0x436   :  { %v824_v1 = vsel %vm494_vm3, %v823_v57, %v777_v18 }
 0x437   :  { %845 = vrot.lane.b32.xlu0 %v824_v1, %s4868_s0 }
 0x43d   :  { %v814_v12 = vpop.permute.xlu2 %813 }
 0x43e   :  { %v815_v10 = vsel %vm494_vm3, %v814_v12, %v5201_v15 }
 0x43f   :  { %839 = vrot.lane.b32.xlu0 %v815_v10, %s4868_s0 }
 0x446   :  { %v805_v24 = vpop.permute.xlu2 %804 }
 0x447   :  { %v806_v36 = vsel %vm494_vm3, %v805_v24, %v5210_v59 }
 0x448   :  { %833 = vrot.lane.b32.xlu0 %v806_v36, %s4868_s0  ;;  %v782_v36 = vld [vmem:[#allocation7 + $0xa8] sm:$0xff] }
 0x449   :  { %4486 = vmatmul.msk.f32.vlgmr.msrb.gmra.mxu1 %vm655_vm4, %v782_v36 }
 0x455   :  { %v826_v39 = vpop.permute.xlu1 %825 }
 0x456   :  { %v827_v41 = vsel %vm494_vm3, %v826_v39, %v778_v23  ;;  %v800_v39 = vld [vmem:[#allocation7 + $0x138] sm:$0xff] }
 0x457   :  { %847 = vrot.lane.b32.xlu2 %v827_v41, %s4868_s0  ;;  %v794_v41 = vld [vmem:[#allocation7 + $0x108] sm:$0xff] }
 0x45d   :  { %v829_v7 = vpop.permute.xlu0 %828 }
 0x45e   :  { %v817_v11 = vpop.permute.xlu1 %816  ;;  %v830_v62 = vsel %vm494_vm3, %v829_v7, %v5221_v34  ;;  %v786_v7 = vld [vmem:[#allocation7 + $0xc8] sm:$0xff] }
 0x45f   :  { %849 = vrot.lane.b32.xlu1 %v830_v62, %s4868_s0  ;;  %v818_v56 = vsel %vm494_vm3, %v817_v11, %v5199_v40  ;;  %v788_v62 = vld [vmem:[#allocation7 + $0xd8] sm:$0xff] }
 0x460   :  { %841 = vrot.lane.b32.xlu2 %v818_v56, %s4868_s0 }
 0x465   :  { %v820_v55 = vpop.permute.xlu0 %819 }
 0x466   :  { %v808_v46 = vpop.permute.xlu1 %807  ;;  %v821_v52 = vsel %vm494_vm3, %v820_v55, %v5230_v60  ;;  %v784_v55 = vld [vmem:[#allocation7 + $0xb8] sm:$0xff] }
 0x467   :  { %843 = vrot.lane.b32.xlu1 %v821_v52, %s4868_s0  ;;  %v809_v45 = vsel %vm494_vm3, %v808_v46, %v5207_v2  ;;  %4487 = vmatmul.msk.f32.gmra.mxu1 %vm655_vm4, %v784_v55 }
 0x468   :  { %835 = vrot.lane.b32.xlu2 %v809_v45, %s4868_s0 }
 0x46d   :  { %v811_v32 = vpop.permute.xlu0 %810 }
 0x46e   :  { %v812_v20 = vsel %vm494_vm3, %v811_v32, %v5204_v4  ;;  %v790_v32 = vld [vmem:[#allocation7 + $0xe8] sm:$0xff] }
 0x46f   :  { %837 = vrot.lane.b32.xlu1 %v812_v20, %s4868_s0  ;;  %4488 = vmatmul.msk.f32.gmra.mxu1 %vm655_vm4, %v786_v7 }
 0x475   :  { %v802_v21 = vpop.permute.xlu0 %801 }
 0x476   :  { %v803_v13 = vsel %vm494_vm3, %v802_v21, %v5213_v51 }
 0x477   :  { %831 = vrot.lane.b32.xlu1 %v803_v13, %s4868_s0  ;;  %4489 = vmatmul.msk.f32.gmra.mxu1 %vm655_vm4, %v788_v62 }
 0x47f   :  { %4490 = vmatmul.msk.f32.gmra.mxu1 %vm655_vm4, %v790_v32 }
 0x4a9   :  { %v846_v26 = vpop.permute.xlu0 %845 }
 0x4aa   :  { %v858_v28 = vsel %vm494_vm3, %v846_v26, %v777_v18 }
 0x4ab   :  { %885 = vrot.lane.b32.xlu1 %v858_v28, %s4869_s2 }
 0x4b1   :  { %v848_v6 = vpop.permute.xlu2 %847  ;;  %v840_v30 = vpop.permute.xlu0 %839 }
 0x4b2   :  { %v859_v16 = vsel %vm494_vm3, %v848_v6, %v778_v23  ;;  %v855_v57 = vsel %vm494_vm3, %v840_v30, %v5201_v15  ;;  %v798_v23 = vld [vmem:[#allocation7 + $0x128] sm:$0xff] }
 0x4b3   :  { %887 = vrot.lane.b32.xlu0 %v859_v16, %s4869_s2  ;;  %879 = vrot.lane.b32.xlu1 %v855_v57, %s4869_s2  ;;  %v781_v16 = vld [vmem:[#allocation7 + $0xa0] sm:$0xff] }
 0x4ba   :  { %v842_v1 = vpop.permute.xlu2 %841  ;;  %v834_v12 = vpop.permute.xlu0 %833 }
 0x4bb   :  { %v856_v10 = vsel %vm494_vm3, %v842_v1, %v5199_v40  ;;  %v852_v18 = vsel %vm494_vm3, %v834_v12, %v5210_v59  ;;  %v792_v40 = vld [vmem:[#allocation7 + $0xf8] sm:$0xff]  ;;  %v783_v1 = vld [vmem:[#allocation7 + $0xb0] sm:$0xff]  ;;  %v785_v12 = vld [vmem:[#allocation7 + $0xc0] sm:$0xff] }
 0x4bc   :  { %881 = vrot.lane.b32.xlu0 %v856_v10, %s4869_s2  ;;  %873 = vrot.lane.b32.xlu1 %v852_v18, %s4869_s2  ;;  %v787_v10 = vld [vmem:[#allocation7 + $0xd0] sm:$0xff]  ;;  %v789_v18 = vld [vmem:[#allocation7 + $0xe0] sm:$0xff] }
 0x4bd   :  { %4491 = vmatmul.msk.f32.gmra.mxu1 %vm655_vm4, %v792_v40 }
 0x4c2   :  { %v836_v24 = vpop.permute.xlu2 %835 }
 0x4c3   :  { %v853_v15 = vsel %vm494_vm3, %v836_v24, %v5207_v2  ;;  %v793_v24 = vld [vmem:[#allocation7 + $0x100] sm:$0xff] }
 0x4c4   :  { %875 = vrot.lane.b32.xlu0 %v853_v15, %s4869_s2  ;;  %953 = vperm.xlu1 %4750, %v798_v23   ;;  %v795_v15 = vld [vmem:[#allocation7 + $0x110] sm:$0xff] }
 0x4c5   :  { %4492 = vmatmul.msk.f32.gmra.mxu1 %vm655_vm4, %v794_v41 }
 0x4cc   :  { %958 = vperm.xlu0 %4752, %v800_v39   ;;  %938 = vperm.xlu1 %4750, %v792_v40   ;;  %v1045_v40 = vpop.f32.mrf.mxu1 }
 0x4d1   :  { %v850_v59 = vpop.permute.xlu1 %849 }
 0x4d2   :  { %v860_v11 = vsel %vm494_vm3, %v850_v59, %v5221_v34 }
 0x4d3   :  { %889 = vrot.lane.b32.xlu2 %v860_v11, %s4869_s2 }
 0x4d4   :  { %943 = vperm.xlu0 %4752, %v794_v41   ;;  %923 = vperm.xlu1 %4750, %v786_v7  }
 0x4d9   :  { %v844_v2 = vpop.permute.xlu1 %843 }
 0x4da   :  { %v857_v56 = vsel %vm494_vm3, %v844_v2, %v5230_v60  ;;  %v796_v60 = vld [vmem:[#allocation7 + $0x118] sm:$0xff] }
 0x4db   :  { %883 = vrot.lane.b32.xlu2 %v857_v56, %s4869_s2  ;;  %4493 = vmatmul.msk.f32.gmra.mxu1 %vm655_vm4, %v796_v60 }
 0x4dc   :  { %928 = vperm.xlu0 %4752, %v788_v62  }
 0x4e1   :  { %v838_v46 = vpop.permute.xlu1 %837 }
 0x4e2   :  { %v854_v52 = vsel %vm494_vm3, %v838_v46, %v5204_v4 }
 0x4e3   :  { %877 = vrot.lane.b32.xlu2 %v854_v52, %s4869_s2  ;;  %4494 = vmatmul.msk.f32.gmra.mxu1 %vm655_vm4, %v798_v23  ;;  %v791_v23 = vld [vmem:[#allocation7 + $0xf0] sm:$0xff] }
 0x4e4   :  { %913 = vperm.xlu0 %4752, %v782_v36   ;;  %v797_v36 = vld [vmem:[#allocation7 + $0x120] sm:$0xff]  ;;  %v1048_v59 = vpop.f32.mrf.mxu1 }
 0x4e9   :  { %v832_v34 = vpop.permute.xlu1 %831 }
 0x4ea   :  { %v851_v45 = vsel %vm494_vm3, %v832_v34, %v5213_v51 }
 0x4eb   :  { %871 = vrot.lane.b32.xlu2 %v851_v45, %s4869_s2  ;;  %4495 = vmatmul.msk.f32.gmra.mxu1 %vm655_vm4, %v800_v39  ;;  %v799_v39 = vld [vmem:[#allocation7 + $0x130] sm:$0xff] }
 0x4ec   :  { %v1051_v7 = vpop.f32.mrf.mxu1 }
 0x4f3   :  { %948 = vperm.xlu2 %4751, %v796_v60  }
 0x4f4   :  { %v1054_v62 = vpop.f32.mrf.mxu1 }
 0x4fb   :  { %933 = vperm.xlu2 %4751, %v790_v32  }
 0x4fc   :  { %v1057_v34 = vpop.f32.mrf.mxu1 }
 0x503   :  { %918 = vperm.xlu2 %4751, %v784_v55  }
 0x51d   :  { %v886_v51 = vpop.permute.xlu1 %885 }
 0x525   :  { %v888_v4 = vpop.permute.xlu0 %887  ;;  %v880_v26 = vpop.permute.xlu1 %879 }
 0x52d   :  { %v890_v20 = vpop.permute.xlu2 %889 }
 0x52e   :  { %4476 = vmatpush.msk.msrb.mxu3 %vm473_vm5, %v890_v20  ;;  %v882_v21 = vpop.permute.xlu0 %881  ;;  %v874_v30 = vpop.permute.xlu1 %873 }
 0x530   :  { %4477 = vmatpush.msk.msrb.mxu3 %vm473_vm5, %v888_v4 }
 0x532   :  { %4478 = vmatpush.msk.msrb.mxu3 %vm473_vm5, %v886_v51 }
 0x535   :  { %v884_v13 = vpop.permute.xlu2 %883 }
 0x536   :  { %4479 = vmatpush.msk.msrb.mxu3 %vm473_vm5, %v884_v13  ;;  %v876_v6 = vpop.permute.xlu0 %875  ;;  %v954_v55 = vpop.permute.xlu1 %953 }
 0x538   :  { %4480 = vmatpush.msk.msrb.mxu3 %vm473_vm5, %v882_v21 }
 0x53a   :  { %4481 = vmatpush.msk.msrb.mxu3 %vm473_vm5, %v880_v26  ;;  %v1060_v20 = vpop.f32.mrf.mxu1 }
 0x53d   :  { %v878_v28 = vpop.permute.xlu2 %877 }
 0x53e   :  { %4482 = vmatpush.msk.msrb.mxu3 %vm473_vm5, %v878_v28  ;;  %v5327_v2 = vpop.permute.xlu0 %958  ;;  %v939_v60 = vpop.permute.xlu1 %938 }
 0x540   :  { %4483 = vmatpush.msk.msrb.mxu3 %vm473_vm5, %v876_v6 }
 0x542   :  { %4484 = vmatpush.msk.msrb.mxu3 %vm473_vm5, %v874_v30 }
 0x545   :  { %v872_v57 = vpop.permute.xlu2 %871 }
 0x546   :  { %4485 = vmatpush.msk.msrb.mxu3 %vm473_vm5, %v872_v57  ;;  %v5329_v52 = vpop.permute.xlu0 %943  ;;  %v924_v26 = vpop.permute.xlu1 %923 }
 0x547   :  { %997 = vmatmul.f32.vlgmr.msrb.gmra.mxu3 %v781_v16 }
 0x54d   :  { %v949_v46 = vpop.permute.xlu2 %948 }
 0x54e   :  { %v929_v4 = vpop.permute.xlu0 %928 }
 0x54f   :  { %1000 = vmatmul.f32.gmra.mxu3 %v783_v1 }
 0x555   :  { %v934_v32 = vpop.permute.xlu2 %933 }
 0x557   :  { %1003 = vmatmul.f32.gmra.mxu3 %v785_v12 }
 0x55d   :  { %v919_v30 = vpop.permute.xlu2 %918 }
 0x55f   :  { %1006 = vmatmul.f32.gmra.mxu3 %v787_v10  ;;  %v914_v10 = vpop.permute.xlu0 %913 }
 0x567   :  { %1009 = vmatmul.f32.gmra.mxu3 %v789_v18  ;;  %v1063_v18 = vpop.f32.mrf.mxu1 }
 0x56f   :  { %1012 = vmatmul.f32.gmra.mxu3 %v791_v23 }
 0x577   :  { %1015 = vmatmul.f32.gmra.mxu3 %v793_v24 }
 0x57f   :  { %1018 = vmatmul.f32.gmra.mxu3 %v795_v15 }
 0x587   :  { %1021 = vmatmul.f32.gmra.mxu3 %v797_v36 }
 0x58f   :  { %1024 = vmatmul.f32.gmra.mxu3 %v799_v39 }
 0x5ca   :  { %v998_v41 = vpop.f32.mrf.mxu3 }
 0x5cb   :  { %v999_v23 = vadd.f32 %v998_v41, %v914_v10 }
 0x5d2   :  { %v1001_v11 = vpop.f32.mrf.mxu3 }
 0x5d3   :  { %v1002_v57 = vadd.f32 %v1001_v11, %v919_v30 }
 0x5d5   :  { %v5340_v39 = vadd.f32 %v1048_v59, %v1002_v57 }
 0x5d7   :  { %v7045_v59 = vmax.f32 %v5340_v39, 0.0 }
 0x5da   :  { %v1004_v56 = vpop.f32.mrf.mxu3 }
 0x5db   :  { %v1005_v28 = vadd.f32 %v1004_v56, %v924_v26 }
 0x5dd   :  { %v5335_v24 = vadd.f32 %v1051_v7, %v1005_v28 }
 0x5df   :  { %v7043_v11 = vmax.f32 %v5335_v24, 0.0 }
 0x5e2   :  { %v1007_v45 = vpop.f32.mrf.mxu3 }
 0x5e3   :  { %v1008_v13 = vadd.f32 %v1007_v45, %v929_v4  ;;  %v5344_v45 = vadd.f32 %v1045_v40, %v999_v23  ;;  %v1097_v4 = vadd.f32 %v7043_v11, %v5033_v8 }
 0x5e5   :  { %v5333_v1 = vadd.f32 %v1054_v62, %v1008_v13  ;;  %v7047_v40 = vmax.f32 %v5344_v45, 0.0 }
 0x5e7   :  { %v7041_v56 = vmax.f32 %v5333_v1, 0.0 }
 0x5ea   :  { %v1010_v51 = vpop.f32.mrf.mxu3 }
 0x5eb   :  { %v1011_v21 = vadd.f32 %v1010_v51, %v934_v32  ;;  %v1096_v51 = vadd.f32 %v7045_v59, %v5036_v9 }
 0x5ed   :  { %v5331_v6 = vadd.f32 %v1057_v34, %v1011_v21  ;;  %v5375_v21 = vmax.f32 %v1097_v4, 0.0  ;;  %v5378_v13 = vmax.f32 %v1096_v51, 0.0 }
 0x5ef   :  { %v7039_v15 = vmax.f32 %v5331_v6, 0.0 }
 0x5f1   :  { %v1099_v41 = vadd.f32 %v7039_v15, %v5023_v3 }
 0x5f2   :  { %v1013_v16 = vpop.f32.mrf.mxu3 }
 0x5f3   :  { %v1014_v12 = vadd.f32 %v1013_v16, %v939_v60  ;;  %v1098_v60 = vadd.f32 %v7041_v56, %v5028_v5  ;;  %v5363_v3 = vmax.f32 %v1099_v41, 0.0  ;;  %v1095_v5 = vadd.f32 %v7047_v40, %v5039_v14 }
 0x5f5   :  { %v5338_v36 = vadd.f32 %v1060_v20, %v1014_v12  ;;  %v5369_v20 = vmax.f32 %v1098_v60, 0.0  ;;  %v5381_v28 = vmax.f32 %v1095_v5, 0.0 }
 0x5f7   :  { %v7037_v34 = vmax.f32 %v5338_v36, 0.0 }
 0x5f9   :  { %v1100_v7 = vadd.f32 %v7037_v34, %v5018_v61  ;;  %v1066_v61 = vpop.f32.mrf.mxu1 }
 0x5fa   :  { %v1016_v62 = vpop.f32.mrf.mxu3 }
 0x5fb   :  { %v5357_v32 = vmax.f32 %v1100_v7, 0.0  ;;  %v1017_v41 = vadd.f32 %v1016_v62, %v5329_v52 }
 0x5fd   :  { %1317 = vmatpush.msrb.mxu2 %v5357_v32 }
 0x5ff   :  { %1318 = vmatpush.msrb.mxu2 %v5363_v3 }
 0x601   :  { %1319 = vmatpush.msrb.mxu2 %v5369_v20  ;;  %v1069_v14 = vpop.f32.mrf.mxu1 }
 0x602   :  { %v1019_v8 = vpop.f32.mrf.mxu3 }
 0x603   :  { %v1020_v26 = vadd.f32 %v1019_v8, %v949_v46  ;;  %1320 = vmatpush.msrb.mxu2 %v5375_v21 }
 0x605   :  { %v5383_v9 = vadd.f32 %v1066_v61, %v1020_v26  ;;  %1321 = vmatpush.msrb.mxu2 %v5378_v13 }
 0x607   :  { %v7033_v30 = vmax.f32 %v5383_v9, 0.0  ;;  %1322 = vmatpush.msrb.mxu2 %v5381_v28 }
 0x609   :  { %v1102_v16 = vadd.f32 %v7033_v30, %v5050_v22  ;;  %v1072_v4 = vpop.f32.mrf.mxu1 }
 0x60a   :  { %v1022_v57 = vpop.f32.mrf.mxu3 }
 0x60b   :  { %v5391_v12 = vmax.f32 %v1102_v16, 0.0  ;;  %v1023_v46 = vadd.f32 %v1022_v57, %v954_v55  ;;  %v5405_v55 = vadd.f32 %v1063_v18, %v1017_v41 }
 0x60d   :  { %v5393_v10 = vadd.f32 %v1069_v14, %v1023_v46  ;;  %1158 = vrot.lane.b32.xlu0 %v5391_v12, %s4868_s0 }
 0x60f   :  { %v7032_v23 = vmax.f32 %v5393_v10, 0.0 }
 0x611   :  { %v1103_v7 = vadd.f32 %v7032_v23, %v5060_v27  ;;  %v7035_v27 = vmax.f32 %v5405_v55, 0.0 }
 0x612   :  { %v1025_v60 = vpop.f32.mrf.mxu3 }
 0x613   :  { %v5402_v22 = vmax.f32 %v1103_v7, 0.0  ;;  %v1026_v61 = vadd.f32 %v1025_v60, %v5327_v2  ;;  %v1101_v2 = vadd.f32 %v7035_v27, %v5090_v0 }
 0x615   :  { %v5407_v51 = vadd.f32 %v1072_v4, %v1026_v61  ;;  %1161 = vrot.lane.b32.xlu2 %v5402_v22, %s4868_s0  ;;  %1149 = vrot.lane.b32.xlu0 %v5363_v3, %s4868_s0 }
 0x617   :  { %v7031_v52 = vmax.f32 %v5407_v51, 0.0 }
 0x619   :  { %v1104_v62 = vadd.f32 %v7031_v52, %v5078_v35  ;;  %v5431_v35 = vmax.f32 %v1101_v2, 0.0 }
 0x61b   :  { %v5418_v5 = vmax.f32 %v1104_v62, 0.0  ;;  %7052 = vst [vmem:[#allocation13_spill] sm:$0xff] %v5431_v35 }
 0x61d   :  { %7051 = vst [vmem:[#allocation12_spill] sm:$0xff] %v5418_v5  ;;  %1164 = vrot.lane.b32.xlu1 %v5418_v5, %s4868_s0  ;;  %1376 = vmatpush.msrb.mxu0 %v5418_v5 }
 0x61e   :  { %1152 = vrot.lane.b32.xlu2 %v5357_v32, %s4868_s0  ;;  %1140 = vrot.lane.b32.xlu0 %v5378_v13, %s4868_s0 }
 0x61f   :  { %1377 = vmatpush.msrb.mxu0 %v5402_v22 }
 0x621   :  { %1378 = vmatpush.msrb.mxu0 %v5391_v12 }
 0x623   :  { %1379 = vmatpush.msrb.mxu0 %v5431_v35 }
 0x625   :  { %1155 = vrot.lane.b32.xlu1 %v5431_v35, %s4868_s0 }
 0x626   :  { %1143 = vrot.lane.b32.xlu2 %v5375_v21, %s4868_s0 }
 0x62d   :  { %1146 = vrot.lane.b32.xlu1 %v5369_v20, %s4868_s0 }
 0x635   :  { %1137 = vrot.lane.b32.xlu1 %v5381_v28, %s4868_s0 }
 0x66f   :  { %v1162_v0 = vpop.permute.xlu2 %1161 }
 0x670   :  { %v1163_v18 = vsel %vm494_vm3, %v1162_v0, %v5402_v22 }
 0x671   :  { %1183 = vrot.lane.b32.xlu0 %v1163_v18, %s4868_s0 }
 0x678   :  { %v1153_v8 = vpop.permute.xlu2 %1152 }
 0x679   :  { %v1154_v26 = vsel %vm494_vm3, %v1153_v8, %v5357_v32 }
 0x67a   :  { %1177 = vrot.lane.b32.xlu0 %v1154_v26, %s4868_s0 }
 0x67f   :  { %v1159_v14 = vpop.permute.xlu0 %1158 }
 0x680   :  { %v1144_v16 = vpop.permute.xlu2 %1143  ;;  %v1160_v57 = vsel %vm494_vm3, %v1159_v14, %v5391_v12 }
 0x681   :  { %v1145_v46 = vsel %vm494_vm3, %v1144_v16, %v5375_v21  ;;  %1181 = vrot.lane.b32.xlu1 %v1160_v57, %s4868_s0 }
 0x682   :  { %1171 = vrot.lane.b32.xlu0 %v1145_v46, %s4868_s0 }
 0x687   :  { %v1150_v41 = vpop.permute.xlu0 %1149 }
 0x688   :  { %v1151_v7 = vsel %vm494_vm3, %v1150_v41, %v5363_v3 }
 0x689   :  { %1175 = vrot.lane.b32.xlu1 %v1151_v7, %s4868_s0 }
 0x68f   :  { %v1165_v60 = vpop.permute.xlu1 %1164 }
 0x690   :  { %v1141_v4 = vpop.permute.xlu0 %1140  ;;  %v1166_v61 = vsel %vm494_vm3, %v1165_v60, %v5418_v5 }
 0x691   :  { %1185 = vrot.lane.b32.xlu2 %v1166_v61, %s4868_s0  ;;  %v1142_v62 = vsel %vm494_vm3, %v1141_v4, %v5378_v13  ;;  %v1118_v4 = vld [vmem:[#allocation7 + $0x148] sm:$0xff] }
 0x692   :  { %1169 = vrot.lane.b32.xlu1 %v1142_v62, %s4868_s0  ;;  %4506 = vmatmul.msk.f32.vlgmr.msrb.gmra.mxu0 %vm655_vm4, %v1118_v4 }
 0x697   :  { %v1156_v2 = vpop.permute.xlu1 %1155 }
 0x698   :  { %v1157_v0 = vsel %vm494_vm3, %v1156_v2, %v5431_v35 }
 0x699   :  { %1179 = vrot.lane.b32.xlu2 %v1157_v0, %s4868_s0 }
 0x69f   :  { %v1147_v18 = vpop.permute.xlu1 %1146 }
 0x6a0   :  { %v1148_v8 = vsel %vm494_vm3, %v1147_v18, %v5369_v20 }
 0x6a1   :  { %1173 = vrot.lane.b32.xlu2 %v1148_v8, %s4868_s0 }
 0x6a7   :  { %v1138_v26 = vpop.permute.xlu1 %1137 }
 0x6a8   :  { %v1139_v14 = vsel %vm494_vm3, %v1138_v26, %v5381_v28  ;;  %v1120_v26 = vld [vmem:[#allocation7 + $0x158] sm:$0xff] }
 0x6a9   :  { %1167 = vrot.lane.b32.xlu2 %v1139_v14, %s4868_s0  ;;  %4507 = vmatmul.msk.f32.gmra.mxu0 %vm655_vm4, %v1120_v26 }
 0x6e3   :  { %v1184_v16 = vpop.permute.xlu0 %1183 }
 0x6e4   :  { %v1195_v57 = vsel %vm494_vm3, %v1184_v16, %v5402_v22 }
 0x6e5   :  { %1223 = vrot.lane.b32.xlu1 %v1195_v57, %s4871_s30  ;;  %v1136_v57 = vld [vmem:[#allocation7 + $0x1d8] sm:$0xff] }
 0x6eb   :  { %v1186_v46 = vpop.permute.xlu2 %1185 }
 0x6ec   :  { %v1178_v41 = vpop.permute.xlu0 %1177  ;;  %v1196_v7 = vsel %vm494_vm3, %v1186_v46, %v5418_v5 }
 0x6ed   :  { %1225 = vrot.lane.b32.xlu0 %v1196_v7, %s4871_s30  ;;  %v1192_v60 = vsel %vm494_vm3, %v1178_v41, %v5357_v32  ;;  %v1122_v7 = vld [vmem:[#allocation7 + $0x168] sm:$0xff] }
 0x6ee   :  { %1217 = vrot.lane.b32.xlu1 %v1192_v60, %s4871_s30  ;;  %4508 = vmatmul.msk.f32.gmra.mxu0 %vm655_vm4, %v1122_v7 }
 0x6f3   :  { %v1180_v61 = vpop.permute.xlu2 %1179  ;;  %v1182_v62 = vpop.permute.xlu1 %1181 }
 0x6f4   :  { %v1172_v2 = vpop.permute.xlu0 %1171  ;;  %v1193_v0 = vsel %vm494_vm3, %v1180_v61, %v5431_v35  ;;  %v1194_v18 = vsel %vm494_vm3, %v1182_v62, %v5391_v12  ;;  %v1130_v61 = vld [vmem:[#allocation7 + $0x1a8] sm:$0xff] }
 0x6f5   :  { %1219 = vrot.lane.b32.xlu0 %v1193_v0, %s4871_s30  ;;  %v1189_v8 = vsel %vm494_vm3, %v1172_v2, %v5375_v21  ;;  %1221 = vrot.lane.b32.xlu2 %v1194_v18, %s4871_s30  ;;  %v1124_v18 = vld [vmem:[#allocation7 + $0x178] sm:$0xff] }
 0x6f6   :  { %1211 = vrot.lane.b32.xlu1 %v1189_v8, %s4871_s30  ;;  %4509 = vmatmul.msk.f32.gmra.mxu0 %vm655_vm4, %v1124_v18  ;;  %v1132_v8 = vld [vmem:[#allocation7 + $0x1b8] sm:$0xff] }
 0x6fb   :  { %v1174_v14 = vpop.permute.xlu2 %1173  ;;  %v1176_v16 = vpop.permute.xlu1 %1175 }
 0x6fc   :  { %v1190_v46 = vsel %vm494_vm3, %v1174_v14, %v5369_v20  ;;  %v1191_v41 = vsel %vm494_vm3, %v1176_v16, %v5363_v3  ;;  %v1134_v14 = vld [vmem:[#allocation7 + $0x1c8] sm:$0xff] }
 0x6fd   :  { %1213 = vrot.lane.b32.xlu0 %v1190_v46, %s4871_s30  ;;  %1215 = vrot.lane.b32.xlu2 %v1191_v41, %s4871_s30  ;;  %v1126_v16 = vld [vmem:[#allocation7 + $0x188] sm:$0xff]  ;;  %v1128_v46 = vld [vmem:[#allocation7 + $0x198] sm:$0xff] }
 0x6fe   :  { %1294 = vperm.xlu1 %4750, %v1136_v57   ;;  %4510 = vmatmul.msk.f32.gmra.mxu0 %vm655_vm4, %v1126_v16 }
 0x703   :  { %v1168_v60 = vpop.permute.xlu2 %1167 }
 0x704   :  { %v1170_v62 = vpop.permute.xlu1 %1169  ;;  %v1187_v2 = vsel %vm494_vm3, %v1168_v60, %v5381_v28 }
 0x705   :  { %1207 = vrot.lane.b32.xlu0 %v1187_v2, %s4871_s30  ;;  %v1188_v0 = vsel %vm494_vm3, %v1170_v62, %v5378_v13 }
 0x706   :  { %1279 = vperm.xlu1 %4750, %v1130_v61   ;;  %1209 = vrot.lane.b32.xlu2 %v1188_v0, %s4871_s30  ;;  %v1117_v0 = vld [vmem:[#allocation7 + $0x140] sm:$0xff] }
 0x707   :  { %4511 = vmatmul.msk.f32.gmra.mxu0 %vm655_vm4, %v1128_v46 }
 0x70d   :  { %1284 = vperm.xlu0 %4752, %v1132_v8  }
 0x70e   :  { %1264 = vperm.xlu1 %4750, %v1124_v18   ;;  %1289 = vperm.xlu2 %4751, %v1134_v14  }
 0x70f   :  { %4512 = vmatmul.msk.f32.gmra.mxu0 %vm655_vm4, %v1130_v61 }
 0x715   :  { %1269 = vperm.xlu0 %4752, %v1126_v16   ;;  %v1123_v16 = vld [vmem:[#allocation7 + $0x170] sm:$0xff] }
 0x716   :  { %1249 = vperm.xlu1 %4750, %v1118_v4   ;;  %1274 = vperm.xlu2 %4751, %v1128_v46   ;;  %v1125_v46 = vld [vmem:[#allocation7 + $0x180] sm:$0xff] }
 0x717   :  { %4513 = vmatmul.msk.f32.gmra.mxu0 %vm655_vm4, %v1132_v8  ;;  %v1119_v8 = vld [vmem:[#allocation7 + $0x150] sm:$0xff] }
 0x71d   :  { %1254 = vperm.xlu0 %4752, %v1120_v26  }
 0x71e   :  { %1259 = vperm.xlu2 %4751, %v1122_v7  }
 0x71f   :  { %4514 = vmatmul.msk.f32.gmra.mxu0 %vm655_vm4, %v1134_v14  ;;  %v1121_v14 = vld [vmem:[#allocation7 + $0x160] sm:$0xff] }
 0x727   :  { %4515 = vmatmul.msk.f32.gmra.mxu0 %vm655_vm4, %v1136_v57 }
 0x74f   :  { %v1222_v60 = vpop.permute.xlu2 %1221 }
 0x757   :  { %v1224_v41 = vpop.permute.xlu1 %1223  ;;  %v1216_v57 = vpop.permute.xlu2 %1215 }
 0x75f   :  { %v1226_v62 = vpop.permute.xlu0 %1225 }
 0x760   :  { %4496 = vmatpush.msk.msrb.mxu2 %vm1115_vm6, %v1226_v62  ;;  %v1218_v4 = vpop.permute.xlu1 %1217  ;;  %v1210_v2 = vpop.permute.xlu2 %1209  ;;  %v1131_v62 = vld [vmem:[#allocation7 + $0x1b0] sm:$0xff] }
 0x762   :  { %4497 = vmatpush.msk.msrb.mxu2 %vm1115_vm6, %v1224_v41  ;;  %v1127_v41 = vld [vmem:[#allocation7 + $0x190] sm:$0xff] }
 0x764   :  { %4498 = vmatpush.msk.msrb.mxu2 %vm1115_vm6, %v1222_v60  ;;  %v1129_v60 = vld [vmem:[#allocation7 + $0x1a0] sm:$0xff] }
 0x767   :  { %v1220_v26 = vpop.permute.xlu0 %1219 }
 0x768   :  { %4499 = vmatpush.msk.msrb.mxu2 %vm1115_vm6, %v1220_v26  ;;  %v1212_v61 = vpop.permute.xlu1 %1211  ;;  %v1135_v26 = vld [vmem:[#allocation7 + $0x1d0] sm:$0xff] }
 0x76a   :  { %4500 = vmatpush.msk.msrb.mxu2 %vm1115_vm6, %v1218_v4  ;;  %v1133_v4 = vld [vmem:[#allocation7 + $0x1c0] sm:$0xff] }
 0x76c   :  { %4501 = vmatpush.msk.msrb.mxu2 %vm1115_vm6, %v1216_v57  ;;  %v1381_v57 = vpop.f32.mrf.mxu0 }
 0x76f   :  { %v1214_v7 = vpop.permute.xlu0 %1213 }
 0x770   :  { %4502 = vmatpush.msk.msrb.mxu2 %vm1115_vm6, %v1214_v7 }
 0x772   :  { %4503 = vmatpush.msk.msrb.mxu2 %vm1115_vm6, %v1212_v61 }
 0x774   :  { %4504 = vmatpush.msk.msrb.mxu2 %vm1115_vm6, %v1210_v2  ;;  %v1384_v7 = vpop.f32.mrf.mxu0 }
 0x777   :  { %v1208_v18 = vpop.permute.xlu0 %1207 }
 0x778   :  { %4505 = vmatpush.msk.msrb.mxu2 %vm1115_vm6, %v1208_v18 }
 0x779   :  { %1333 = vmatmul.f32.vlgmr.msrb.gmra.mxu2 %v1117_v0 }
 0x77c   :  { %v1387_v2 = vpop.f32.mrf.mxu0 }
 0x77f   :  { %v1285_v52 = vpop.permute.xlu0 %1284 }
 0x781   :  { %1336 = vmatmul.f32.gmra.mxu2 %v1119_v8  ;;  %v1295_v8 = vpop.permute.xlu1 %1294 }
 0x784   :  { %v1390_v18 = vpop.f32.mrf.mxu0 }
 0x787   :  { %v1270_v19 = vpop.permute.xlu0 %1269 }
 0x789   :  { %1339 = vmatmul.f32.gmra.mxu2 %v1121_v14  ;;  %v1280_v23 = vpop.permute.xlu1 %1279 }
 0x78f   :  { %v1255_v11 = vpop.permute.xlu0 %1254 }
 0x791   :  { %1342 = vmatmul.f32.gmra.mxu2 %v1123_v16  ;;  %v1290_v16 = vpop.permute.xlu2 %1289 }
 0x799   :  { %1345 = vmatmul.f32.gmra.mxu2 %v1125_v46  ;;  %v1393_v46 = vpop.f32.mrf.mxu0 }
 0x7a1   :  { %1348 = vmatmul.f32.gmra.mxu2 %v1127_v41 }
 0x7a9   :  { %1351 = vmatmul.f32.gmra.mxu2 %v1129_v60  ;;  %v1275_v60 = vpop.permute.xlu2 %1274 }
 0x7b1   :  { %1354 = vmatmul.f32.gmra.mxu2 %v1131_v62  ;;  %v1396_v62 = vpop.f32.mrf.mxu0  ;;  %v1260_v50 = vpop.permute.xlu2 %1259 }
 0x7b9   :  { %1357 = vmatmul.f32.gmra.mxu2 %v1133_v4  ;;  %v1265_v4 = vpop.permute.xlu1 %1264  ;;  %v1399_v15 = vpop.f32.mrf.mxu0 }
 0x7c1   :  { %1360 = vmatmul.f32.gmra.mxu2 %v1135_v26  ;;  %v1250_v40 = vpop.permute.xlu1 %1249 }
 0x7fc   :  { %v1334_v61 = vpop.f32.mrf.mxu2 }
 0x7fd   :  { %v1335_v63 = vadd.f32 %v1334_v61, %v1250_v40 }
 0x804   :  { %v1337_v0 = vpop.f32.mrf.mxu2 }
 0x805   :  { %v1338_v54 = vadd.f32 %v1337_v0, %v1255_v11 }
 0x80c   :  { %v1340_v14 = vpop.f32.mrf.mxu2 }
 0x80d   :  { %v1341_v43 = vadd.f32 %v1340_v14, %v1260_v50  ;;  %v1382_v50 = vadd.f32 %v1381_v57, %v1335_v63 }
 0x80f   :  { %v1388_v35 = vadd.f32 %v1387_v2, %v1341_v43  ;;  %v5548_v43 = vmax.f32 %v1382_v50, 0.0 }
 0x814   :  { %v1343_v41 = vpop.f32.mrf.mxu2 }
 0x815   :  { %v1344_v33 = vadd.f32 %v1343_v41, %v1265_v4 }
 0x817   :  { %v1391_v59 = vadd.f32 %v1390_v18, %v1344_v33 }
 0x819   :  { %v5539_v41 = vmax.f32 %v1391_v59, 0.0 }
 0x81c   :  { %v1346_v30 = vpop.f32.mrf.mxu2 }
 0x81d   :  { %v1347_v27 = vadd.f32 %v1346_v30, %v1270_v19  ;;  %v1385_v30 = vadd.f32 %v1384_v7, %v1338_v54 }
 0x81f   :  { %v1394_v56 = vadd.f32 %v1393_v46, %v1347_v27  ;;  %v5545_v33 = vmax.f32 %v1385_v30, 0.0 }
 0x821   :  { %v5536_v5 = vmax.f32 %v1394_v56, 0.0 }
 0x824   :  { %v1349_v26 = vpop.f32.mrf.mxu2 }
 0x825   :  { %v1350_v34 = vadd.f32 %v1349_v26, %v1275_v60 }
 0x827   :  { %v1397_v49 = vadd.f32 %v1396_v62, %v1350_v34  ;;  %v5542_v34 = vmax.f32 %v1388_v35, 0.0 }
 0x829   :  { %v5534_v58 = vmax.f32 %v1397_v49, 0.0  ;;  %v1402_v49 = vpop.f32.mrf.mxu0 }
 0x82b   :  { %1622 = vmatpush.msra.mxu3 %v5534_v58 }
 0x82c   :  { %v1352_v19 = vpop.f32.mrf.mxu2 }
 0x82d   :  { %1623 = vmatpush.msra.mxu3 %v5536_v5  ;;  %v1353_v2 = vadd.f32 %v1352_v19, %v1280_v23 }
 0x82f   :  { %1624 = vmatpush.msra.mxu3 %v5539_v41  ;;  %v1400_v14 = vadd.f32 %v1399_v15, %v1353_v2 }
 0x831   :  { %1625 = vmatpush.msra.mxu3 %v5542_v34  ;;  %v1405_v63 = vpop.f32.mrf.mxu0 }
 0x833   :  { %1626 = vmatpush.msra.mxu3 %v5545_v33 }
 0x834   :  { %v1355_v56 = vpop.f32.mrf.mxu2 }
 0x835   :  { %v1356_v54 = vadd.f32 %v1355_v56, %v1285_v52  ;;  %1627 = vmatpush.msra.mxu3 %v5548_v43 }
 0x837   :  { %v1403_v11 = vadd.f32 %v1402_v49, %v1356_v54 }
 0x839   :  { %v1418_v59 = vmax.f32 %v1403_v11, 0.0  ;;  %v1408_v52 = vpop.f32.mrf.mxu0 }
 0x83b   :  { %1463 = vrot.lane.b32.xlu1 %v1418_v59, %s4868_s0 }
 0x83c   :  { %v1358_v40 = vpop.f32.mrf.mxu2 }
 0x83d   :  { %v1359_v27 = vadd.f32 %v1358_v40, %v1290_v16  ;;  %v1417_v16 = vmax.f32 %v1400_v14, 0.0 }
 0x83f   :  { %v1406_v35 = vadd.f32 %v1405_v63, %v1359_v27 }
 0x841   :  { %v5553_v57 = vmax.f32 %v1406_v35, 0.0 }
 0x843   :  { %1466 = vrot.lane.b32.xlu0 %v5553_v57, %s4868_s0  ;;  %1454 = vrot.lane.b32.xlu1 %v5536_v5, %s4868_s0 }
 0x844   :  { %v1361_v7 = vpop.f32.mrf.mxu2 }
 0x845   :  { %v1362_v61 = vadd.f32 %v1361_v7, %v1295_v8 }
 0x847   :  { %v1409_v0 = vadd.f32 %v1408_v52, %v1362_v61 }
 0x849   :  { %v1420_v18 = vmax.f32 %v1409_v0, 0.0 }
 0x84b   :  { %1469 = vrot.lane.b32.xlu2 %v1420_v18, %s4868_s0  ;;  %1681 = vmatpush.msra.mxu1 %v1420_v18 }
 0x84c   :  { %1457 = vrot.lane.b32.xlu0 %v5534_v58, %s4868_s0  ;;  %1445 = vrot.lane.b32.xlu1 %v5545_v33, %s4868_s0 }
 0x84d   :  { %1682 = vmatpush.msra.mxu1 %v5553_v57 }
 0x84f   :  { %1683 = vmatpush.msra.mxu1 %v1418_v59 }
 0x851   :  { %1684 = vmatpush.msra.mxu1 %v1417_v16 }
 0x853   :  { %1460 = vrot.lane.b32.xlu2 %v1417_v16, %s4868_s0 }
 0x854   :  { %1448 = vrot.lane.b32.xlu0 %v5542_v34, %s4868_s0 }
 0x85b   :  { %1451 = vrot.lane.b32.xlu2 %v5539_v41, %s4868_s0 }
 0x863   :  { %1442 = vrot.lane.b32.xlu2 %v5548_v43, %s4868_s0 }
 0x8a5   :  { %v1470_v15 = vpop.permute.xlu2 %1469 }
 0x8a6   :  { %v1471_v23 = vsel %vm494_vm3, %v1470_v15, %v1420_v18 }
 0x8a7   :  { %1490 = vrot.lane.b32.xlu0 %v1471_v23, %s4868_s0 }
 0x8ad   :  { %v1464_v8 = vpop.permute.xlu1 %1463  ;;  %v1461_v46 = vpop.permute.xlu2 %1460 }
 0x8ae   :  { %v1465_v60 = vsel %vm494_vm3, %v1464_v8, %v1418_v59  ;;  %v1462_v62 = vsel %vm494_vm3, %v1461_v46, %v1417_v16  ;;  %v1439_v46 = vld [vmem:[#allocation7 + $0x268] sm:$0xff] }
 0x8af   :  { %1484 = vrot.lane.b32.xlu0 %v1462_v62, %s4868_s0  ;;  %1486 = vrot.lane.b32.xlu2 %v1465_v60, %s4868_s0  ;;  %v1433_v62 = vld [vmem:[#allocation7 + $0x238] sm:$0xff] }
 0x8b5   :  { %v1467_v4 = vpop.permute.xlu0 %1466  ;;  %v1455_v26 = vpop.permute.xlu1 %1454 }
 0x8b6   :  { %v1468_v19 = vsel %vm494_vm3, %v1467_v4, %v5553_v57  ;;  %v1456_v30 = vsel %vm494_vm3, %v1455_v26, %v5536_v5  ;;  %v1452_v50 = vpop.permute.xlu2 %1451  ;;  %v1427_v26 = vld [vmem:[#allocation7 + $0x208] sm:$0xff] }
 0x8b7   :  { %v1453_v49 = vsel %vm494_vm3, %v1452_v50, %v5539_v41  ;;  %1488 = vrot.lane.b32.xlu1 %v1468_v19, %s4868_s0  ;;  %1480 = vrot.lane.b32.xlu2 %v1456_v30, %s4868_s0 }
 0x8b8   :  { %1478 = vrot.lane.b32.xlu0 %v1453_v49, %s4868_s0  ;;  %v1437_v49 = vld [vmem:[#allocation7 + $0x258] sm:$0xff] }
 0x8be   :  { %v1458_v56 = vpop.permute.xlu0 %1457  ;;  %v1446_v54 = vpop.permute.xlu1 %1445 }
 0x8bf   :  { %v1459_v11 = vsel %vm494_vm3, %v1458_v56, %v5534_v58  ;;  %v1447_v63 = vsel %vm494_vm3, %v1446_v54, %v5545_v33  ;;  %v1443_v40 = vpop.permute.xlu2 %1442  ;;  %v1431_v54 = vld [vmem:[#allocation7 + $0x228] sm:$0xff] }
 0x8c0   :  { %v1444_v27 = vsel %vm494_vm3, %v1443_v40, %v5548_v43  ;;  %1482 = vrot.lane.b32.xlu1 %v1459_v11, %s4868_s0  ;;  %1474 = vrot.lane.b32.xlu2 %v1447_v63, %s4868_s0  ;;  %v1435_v11 = vld [vmem:[#allocation7 + $0x248] sm:$0xff]  ;;  %v1429_v63 = vld [vmem:[#allocation7 + $0x218] sm:$0xff] }
 0x8c1   :  { %1472 = vrot.lane.b32.xlu0 %v1444_v27, %s4868_s0 }
 0x8c6   :  { %v1449_v35 = vpop.permute.xlu0 %1448 }
 0x8c7   :  { %v1450_v7 = vsel %vm494_vm3, %v1449_v35, %v5542_v34 }
 0x8c8   :  { %1476 = vrot.lane.b32.xlu1 %v1450_v7, %s4868_s0 }
 0x909   :  { %v1487_v52 = vpop.permute.xlu2 %1486 }
 0x90a   :  { %v1499_v61 = vsel %vm494_vm3, %v1487_v52, %v1418_v59 }
 0x90b   :  { %1526 = vrot.lane.b32.xlu0 %v1499_v61, %s4871_s30 }
 0x911   :  { %v1481_v2 = vpop.permute.xlu2 %1480 }
 0x912   :  { %v1496_v0 = vsel %vm494_vm3, %v1481_v2, %v5536_v5 }
 0x913   :  { %1520 = vrot.lane.b32.xlu0 %v1496_v0, %s4871_s30 }
 0x919   :  { %v1491_v14 = vpop.permute.xlu0 %1490 }
 0x91a   :  { %v1501_v15 = vsel %vm494_vm3, %v1491_v14, %v1420_v18  ;;  %v1475_v23 = vpop.permute.xlu2 %1474  ;;  %v1422_v14 = vld [vmem:[#allocation7 + $0x1e0] sm:$0xff] }
 0x91b   :  { %v1493_v8 = vsel %vm494_vm3, %v1475_v23, %v5545_v33  ;;  %1530 = vrot.lane.b32.xlu1 %v1501_v15, %s4871_s30  ;;  %v1424_v23 = vld [vmem:[#allocation7 + $0x1f0] sm:$0xff] }
 0x91c   :  { %1514 = vrot.lane.b32.xlu0 %v1493_v8, %s4871_s30  ;;  %v1426_v8 = vld [vmem:[#allocation7 + $0x200] sm:$0xff] }
 0x921   :  { %v1485_v59 = vpop.permute.xlu0 %1484 }
 0x922   :  { %v1498_v60 = vsel %vm494_vm3, %v1485_v59, %v1417_v16  ;;  %v1428_v59 = vld [vmem:[#allocation7 + $0x210] sm:$0xff] }
 0x923   :  { %1524 = vrot.lane.b32.xlu1 %v1498_v60, %s4871_s30  ;;  %v1432_v60 = vld [vmem:[#allocation7 + $0x230] sm:$0xff] }
 0x924   :  { %1594 = vperm.xlu0 %4752, %v1439_v46  }
 0x929   :  { %v1489_v5 = vpop.permute.xlu1 %1488 }
 0x92a   :  { %v1479_v4 = vpop.permute.xlu0 %1478  ;;  %v1500_v18 = vsel %vm494_vm3, %v1489_v5, %v5553_v57  ;;  %v1423_v57 = vld [vmem:[#allocation7 + $0x1e8] sm:$0xff]  ;;  %v1434_v5 = vld [vmem:[#allocation7 + $0x240] sm:$0xff] }
 0x92b   :  { %v1495_v33 = vsel %vm494_vm3, %v1479_v4, %v5539_v41  ;;  %1528 = vrot.lane.b32.xlu2 %v1500_v18, %s4871_s30  ;;  %4526 = vmatmul.msk.f32.vlgmr.msra.gmra.mxu1 %vm655_vm4, %v1423_v57  ;;  %v1438_v4 = vld [vmem:[#allocation7 + $0x260] sm:$0xff]  ;;  %v1440_v18 = vld [vmem:[#allocation7 + $0x270] sm:$0xff] }
 0x92c   :  { %1518 = vrot.lane.b32.xlu1 %v1495_v33, %s4871_s30  ;;  %1579 = vperm.xlu0 %4752, %v1433_v62  }
 0x932   :  { %v1483_v19 = vpop.permute.xlu1 %1482 }
 0x933   :  { %v1497_v16 = vsel %vm494_vm3, %v1483_v19, %v5534_v58  ;;  %v1473_v30 = vpop.permute.xlu0 %1472  ;;  %v1425_v58 = vld [vmem:[#allocation7 + $0x1f8] sm:$0xff] }
 0x934   :  { %v1492_v50 = vsel %vm494_vm3, %v1473_v30, %v5548_v43  ;;  %1522 = vrot.lane.b32.xlu2 %v1497_v16, %s4871_s30  ;;  %1564 = vperm.xlu0 %4752, %v1427_v26   ;;  %v1441_v43 = vld [vmem:[#allocation7 + $0x278] sm:$0xff] }
 0x935   :  { %1512 = vrot.lane.b32.xlu1 %v1492_v50, %s4871_s30  ;;  %4527 = vmatmul.msk.f32.gmra.mxu1 %vm655_vm4, %v1425_v58 }
 0x93a   :  { %v1477_v41 = vpop.permute.xlu1 %1476 }
 0x93b   :  { %v1494_v56 = vsel %vm494_vm3, %v1477_v41, %v5542_v34 }
 0x93c   :  { %1516 = vrot.lane.b32.xlu2 %v1494_v56, %s4871_s30 }
 0x93d   :  { %1589 = vperm.xlu1 %4750, %v1437_v49   ;;  %4528 = vmatmul.msk.f32.gmra.mxu1 %vm655_vm4, %v1427_v26 }
 0x944   :  { %1599 = vperm.xlu2 %4751, %v1441_v43  }
 0x945   :  { %1574 = vperm.xlu1 %4750, %v1431_v54   ;;  %4529 = vmatmul.msk.f32.gmra.mxu1 %vm655_vm4, %v1429_v63 }
 0x94c   :  { %1584 = vperm.xlu2 %4751, %v1435_v11  }
 0x94d   :  { %1559 = vperm.xlu1 %4750, %v1425_v58   ;;  %4530 = vmatmul.msk.f32.gmra.mxu1 %vm655_vm4, %v1431_v54 }
 0x954   :  { %1569 = vperm.xlu2 %4751, %v1429_v63   ;;  %v7054_v63 = vmax.f32 %v5344_v45, 0.0 }
 0x955   :  { %4531 = vmatmul.msk.f32.gmra.mxu1 %vm655_vm4, %v1433_v62  ;;  %v1436_v62 = vld [vmem:[#allocation7 + $0x250] sm:$0xff] }
 0x95c   :  { %1554 = vperm.xlu2 %4751, %v1423_v57  }
 0x95d   :  { %4532 = vmatmul.msk.f32.gmra.mxu1 %vm655_vm4, %v1435_v11  ;;  %v7053_v11 = vmax.f32 %v5008_v53, 0.0 }
 0x965   :  { %4533 = vmatmul.msk.f32.gmra.mxu1 %vm655_vm4, %v1437_v49 }
 0x96d   :  { %4534 = vmatmul.msk.f32.gmra.mxu1 %vm655_vm4, %v1439_v46  ;;  %v1430_v46 = vld [vmem:[#allocation7 + $0x220] sm:$0xff] }
 0x975   :  { %4535 = vmatmul.msk.f32.gmra.mxu1 %vm655_vm4, %v1441_v43 }
 0x97d   :  { %v1527_v27 = vpop.permute.xlu0 %1526 }
 0x985   :  { %v1529_v34 = vpop.permute.xlu2 %1528  ;;  %v1521_v52 = vpop.permute.xlu0 %1520 }
 0x98d   :  { %v1531_v40 = vpop.permute.xlu1 %1530 }
 0x98e   :  { %4516 = vmatpush.msk.msra.mxu3 %vm1115_vm6, %v1531_v40  ;;  %v1523_v7 = vpop.permute.xlu2 %1522  ;;  %v1515_v0 = vpop.permute.xlu0 %1514 }
 0x990   :  { %4517 = vmatpush.msk.msra.mxu3 %vm1115_vm6, %v1529_v34  ;;  %v1085_v34 = vadd.f32 %v7054_v63, %v7053_v11 }
 0x992   :  { %4518 = vmatpush.msk.msra.mxu3 %vm1115_vm6, %v1527_v27 }
 0x995   :  { %v1525_v35 = vpop.permute.xlu1 %1524 }
 0x996   :  { %4519 = vmatpush.msk.msra.mxu3 %vm1115_vm6, %v1525_v35  ;;  %v1517_v2 = vpop.permute.xlu2 %1516  ;;  %v5660_v57 = vpop.permute.xlu0 %1594 }
 0x998   :  { %4520 = vmatpush.msk.msra.mxu3 %vm1115_vm6, %v1523_v7 }
 0x99a   :  { %4521 = vmatpush.msk.msra.mxu3 %vm1115_vm6, %v1521_v52 }
 0x99e   :  { %v1519_v61 = vpop.permute.xlu1 %1518  ;;  %v5656_v33 = vpop.permute.xlu2 %1599 }
 0x99f   :  { %4522 = vmatpush.msk.msra.mxu3 %vm1115_vm6, %v1519_v61  ;;  %v1580_v27 = vpop.permute.xlu0 %1579 }
 0x9a1   :  { %4523 = vmatpush.msk.msra.mxu3 %vm1115_vm6, %v1517_v2 }
 0x9a3   :  { %4524 = vmatpush.msk.msra.mxu3 %vm1115_vm6, %v1515_v0 }
 0x9a6   :  { %v1585_v26 = vpop.permute.xlu2 %1584 }
 0x9a7   :  { %v1513_v15 = vpop.permute.xlu1 %1512  ;;  %v1565_v53 = vpop.permute.xlu0 %1564 }
 0x9a8   :  { %4525 = vmatpush.msk.msra.mxu3 %vm1115_vm6, %v1513_v15  ;;  %v1686_v19 = vpop.f32.mrf.mxu1  ;;  %v7056_v15 = vmax.f32 %v5340_v39, 0.0 }
 0x9a9   :  { %1638 = vmatmul.f32.vlgmr.msra.gmra.mxu3 %v1422_v14  ;;  %v7055_v14 = vmax.f32 %v5004_v48, 0.0 }
 0x9ae   :  { %v1570_v30 = vpop.permute.xlu2 %1569 }
 0x9af   :  { %v5658_v16 = vpop.permute.xlu1 %1589 }
 0x9b1   :  { %1641 = vmatmul.f32.gmra.mxu3 %v1424_v23  ;;  %v1086_v23 = vadd.f32 %v7056_v15, %v7055_v14  ;;  %v7063_v15 = vmax.f32 %v5002_v44, 0.0 }
 0x9b2   :  { %v1689_v50 = vpop.f32.mrf.mxu1 }
 0x9b6   :  { %v1555_v49 = vpop.permute.xlu2 %1554 }
 0x9b7   :  { %v1575_v41 = vpop.permute.xlu1 %1574 }
 0x9b9   :  { %1644 = vmatmul.f32.gmra.mxu3 %v1426_v8 }
 0x9ba   :  { %v1692_v43 = vpop.f32.mrf.mxu1 }
 0x9bf   :  { %v1560_v7 = vpop.permute.xlu1 %1559 }
 0x9c1   :  { %1647 = vmatmul.f32.gmra.mxu3 %v1428_v59 }
 0x9c2   :  { %v1695_v0 = vpop.f32.mrf.mxu1 }
 0x9c9   :  { %1650 = vmatmul.f32.gmra.mxu3 %v1430_v46 }
 0x9d1   :  { %1653 = vmatmul.f32.gmra.mxu3 %v1432_v60 }
 0x9d9   :  { %1656 = vmatmul.f32.gmra.mxu3 %v1434_v5  ;;  %v7057_v5 = vmax.f32 %v4999_v42, 0.0 }
 0x9e1   :  { %1659 = vmatmul.f32.gmra.mxu3 %v1436_v62  ;;  %v7058_v62 = vmax.f32 %v5335_v24, 0.0 }
 0x9e9   :  { %1662 = vmatmul.f32.gmra.mxu3 %v1438_v4  ;;  %v1087_v4 = vadd.f32 %v7058_v62, %v7057_v5 }
 0x9f1   :  { %1665 = vmatmul.f32.gmra.mxu3 %v1440_v18 }
 0xa2c   :  { %v1639_v56 = vpop.f32.mrf.mxu3 }
 0xa2d   :  { %v1640_v58 = vadd.f32 %v1639_v56, %v1555_v49  ;;  %v7059_v56 = vmax.f32 %v4997_v38, 0.0 }
 0xa2f   :  { %v1687_v54 = vadd.f32 %v1686_v19, %v1640_v58  ;;  %v1698_v19 = vpop.f32.mrf.mxu1  ;;  %v7060_v58 = vmax.f32 %v5333_v1, 0.0 }
 0xa31   :  { %v1716_v40 = vmax.f32 %v1687_v54, 0.0  ;;  %v1088_v54 = vadd.f32 %v7060_v58, %v7059_v56 }
 0xa33   :  { %v5666_v35 = vadd.f32 %v1716_v40, %v1085_v34 }
 0xa34   :  { %v1642_v52 = vpop.f32.mrf.mxu3 }
 0xa35   :  { %v1643_v61 = vadd.f32 %v1642_v52, %v1560_v7  ;;  %v7061_v7 = vmax.f32 %v4995_v37, 0.0  ;;  %v7062_v52 = vmax.f32 %v5331_v6, 0.0 }
 0xa37   :  { %v1690_v2 = vadd.f32 %v1689_v50, %v1643_v61  ;;  %v1701_v42 = vpop.f32.mrf.mxu1  ;;  %v1089_v61 = vadd.f32 %v7062_v52, %v7061_v7 }
 0xa39   :  { %v1717_v8 = vmax.f32 %v1690_v2, 0.0 }
 0xa3b   :  { %v5672_v59 = vadd.f32 %v1717_v8, %v1086_v23  ;;  %v7064_v23 = vmax.f32 %v5338_v36, 0.0 }
 0xa3c   :  { %v1645_v45 = vpop.f32.mrf.mxu3 }
 0xa3d   :  { %v1646_v46 = vadd.f32 %v1645_v45, %v1565_v53  ;;  %v1090_v53 = vadd.f32 %v7064_v23, %v7063_v15  ;;  %v7073_v23 = vld [vmem:[#allocation12_spill] sm:$0xff] }
 0xa3f   :  { %v1693_v60 = vadd.f32 %v1692_v43, %v1646_v46  ;;  %v1704_v14 = vpop.f32.mrf.mxu1 }
 0xa41   :  { %v1718_v18 = vmax.f32 %v1693_v60, 0.0 }
 0xa43   :  { %v5678_v50 = vadd.f32 %v1718_v18, %v1087_v4  ;;  %v1738_v62 = vadd.f32 %v1718_v18, %v5375_v21  ;;  %v1736_v21 = vadd.f32 %v1716_v40, %v5381_v28  ;;  %v7067_v28 = vmax.f32 %v5042_v17, 0.0 }
 0xa44   :  { %v1648_v48 = vpop.f32.mrf.mxu3  ;;  %v7068_v40 = vmax.f32 %v5383_v9, 0.0  ;;  %v7069_v17 = vmax.f32 %v5052_v25, 0.0  ;;  %v7070_v9 = vmax.f32 %v5393_v10, 0.0  ;;  %v7071_v25 = vmax.f32 %v5066_v29, 0.0 }
 0xa45   :  { %v1649_v49 = vadd.f32 %v1648_v48, %v1570_v30  ;;  %v7072_v10 = vmax.f32 %v5407_v51, 0.0 }
 0xa46   :  { %v1092_v56 = vadd.f32 %v7068_v40, %v7067_v28  ;;  %v1093_v7 = vadd.f32 %v7070_v9, %v7069_v17 }
 0xa47   :  { %v1696_v39 = vadd.f32 %v1695_v0, %v1649_v49  ;;  %v1707_v36 = vpop.f32.mrf.mxu1 }
 0xa49   :  { %v1719_v11 = vmax.f32 %v1696_v39, 0.0 }
 0xa4b   :  { %v5684_v63 = vadd.f32 %v1719_v11, %v1088_v54  ;;  %v1739_v60 = vadd.f32 %v1719_v11, %v5369_v20 }
 0xa4c   :  { %v1651_v43 = vpop.f32.mrf.mxu3 }
 0xa4d   :  { %v1652_v34 = vadd.f32 %v1651_v43, %v1575_v41  ;;  %v5712_v49 = vmax.f32 %v1739_v60, 0.0 }
 0xa4f   :  { %v1699_v24 = vadd.f32 %v1698_v19, %v1652_v34  ;;  %v7066_v19 = vmax.f32 %v5405_v55, 0.0  ;;  %v1710_v54 = vpop.f32.mrf.mxu1 }
 0xa51   :  { %v1720_v2 = vmax.f32 %v1699_v24, 0.0 }
 0xa53   :  { %v5690_v30 = vadd.f32 %v1720_v2, %v1089_v61  ;;  %v1740_v41 = vadd.f32 %v1720_v2, %v5363_v3  ;;  %v7065_v3 = vmax.f32 %v5063_v31, 0.0 }
 0xa54   :  { %v1654_v0 = vpop.f32.mrf.mxu3 }
 0xa55   :  { %v1655_v38 = vadd.f32 %v1654_v0, %v1580_v27  ;;  %v5704_v4 = vmax.f32 %v1740_v41, 0.0  ;;  %v1091_v48 = vadd.f32 %v7066_v19, %v7065_v3 }
 0xa57   :  { %v1702_v1 = vadd.f32 %v1701_v42, %v1655_v38  ;;  %v1713_v0 = vpop.f32.mrf.mxu1 }
 0xa59   :  { %v1721_v45 = vmax.f32 %v1702_v1, 0.0  ;;  %v1094_v1 = vadd.f32 %v7072_v10, %v7071_v25  ;;  %v1769_v25 = vld [vmem:[#allocation7 + $0x2d8] sm:$0xff] }
 0xa5b   :  { %v5697_v46 = vadd.f32 %v1721_v45, %v1090_v53  ;;  %v1741_v37 = vadd.f32 %v1721_v45, %v5357_v32  ;;  %v1737_v32 = vadd.f32 %v1717_v8, %v5378_v13  ;;  %v5725_v13 = vmax.f32 %v1736_v21, 0.0 }
 0xa5c   :  { %v1657_v6 = vpop.f32.mrf.mxu3 }
 0xa5d   :  { %v5701_v5 = vmax.f32 %v1741_v37, 0.0  ;;  %v1658_v27 = vadd.f32 %v1657_v6, %v1585_v26  ;;  %v5716_v26 = vmax.f32 %v1738_v62, 0.0  ;;  %v5721_v31 = vmax.f32 %v1737_v32, 0.0 }
 0xa5f   :  { %v1705_v44 = vadd.f32 %v1704_v14, %v1658_v27  ;;  %1958 = vmatpush.msra.mxu2 %v5701_v5 }
 0xa61   :  { %v1722_v20 = vmax.f32 %v1705_v44, 0.0  ;;  %1959 = vmatpush.msra.mxu2 %v5704_v4 }
 0xa63   :  { %v5718_v18 = vadd.f32 %v1722_v20, %v1091_v48  ;;  %1960 = vmatpush.msra.mxu2 %v5712_v49 }
 0xa64   :  { %v1660_v39 = vpop.f32.mrf.mxu3 }
 0xa65   :  { %v1661_v55 = vadd.f32 %v1660_v39, %v5658_v16  ;;  %1961 = vmatpush.msra.mxu2 %v5716_v26 }
 0xa67   :  { %v1708_v8 = vadd.f32 %v1707_v36, %v1661_v55  ;;  %1962 = vmatpush.msra.mxu2 %v5721_v31 }
 0xa69   :  { %v1723_v58 = vmax.f32 %v1708_v8, 0.0  ;;  %1963 = vmatpush.msra.mxu2 %v5725_v13 }
 0xa6b   :  { %v5733_v11 = vadd.f32 %v1723_v58, %v1092_v56  ;;  %v1743_v16 = vadd.f32 %v1723_v58, %v5391_v12 }
 0xa6c   :  { %v1663_v43 = vpop.f32.mrf.mxu3 }
 0xa6d   :  { %v5736_v42 = vmax.f32 %v1743_v16, 0.0  ;;  %v1664_v34 = vadd.f32 %v1663_v43, %v5660_v57 }
 0xa6f   :  { %v1711_v24 = vadd.f32 %v1710_v54, %v1664_v34  ;;  %1799 = vrot.lane.b32.xlu2 %v5736_v42, %s4868_s0 }
 0xa71   :  { %v1724_v52 = vmax.f32 %v1711_v24, 0.0 }
 0xa73   :  { %v5745_v61 = vadd.f32 %v1724_v52, %v1093_v7  ;;  %v1744_v2 = vadd.f32 %v1724_v52, %v5402_v22 }
 0xa74   :  { %v1666_v12 = vpop.f32.mrf.mxu3 }
 0xa75   :  { %v5748_v38 = vmax.f32 %v1744_v2, 0.0  ;;  %v1667_v57 = vadd.f32 %v1666_v12, %v5656_v33  ;;  %v7074_v33 = vld [vmem:[#allocation13_spill] sm:$0xff] }
 0xa76   :  { %v1742_v41 = vadd.f32 %v1722_v20, %v7074_v33  ;;  %v1775_v2 = vld [vmem:[#allocation7 + $0x308] sm:$0xff]  ;;  %v1765_v33 = vld [vmem:[#allocation7 + $0x2b8] sm:$0xff] }
 0xa77   :  { %v1714_v14 = vadd.f32 %v1713_v0, %v1667_v57  ;;  %1802 = vrot.lane.b32.xlu1 %v5748_v38, %s4868_s0  ;;  %1790 = vrot.lane.b32.xlu2 %v5704_v4, %s4868_s0  ;;  %v1759_v57 = vld [vmem:[#allocation7 + $0x288] sm:$0xff] }
 0xa78   :  { %v5773_v29 = vmax.f32 %v1742_v41, 0.0 }
 0xa79   :  { %v1725_v15 = vmax.f32 %v1714_v14, 0.0  ;;  %v1777_v14 = vld [vmem:[#allocation7 + $0x318] sm:$0xff] }
 0xa7b   :  { %v5759_v22 = vadd.f32 %v1725_v15, %v1094_v1  ;;  %v1745_v53 = vadd.f32 %v1725_v15, %v7073_v23  ;;  %v1771_v1 = vld [vmem:[#allocation7 + $0x2e8] sm:$0xff] }
 0xa7c   :  { %v1763_v15 = vld [vmem:[#allocation7 + $0x2a8] sm:$0xff] }
 0xa7d   :  { %v5762_v45 = vmax.f32 %v1745_v53, 0.0 }
 0xa7f   :  { %1805 = vrot.lane.b32.xlu0 %v5762_v45, %s4868_s0  ;;  %2017 = vmatpush.msra.mxu0 %v5762_v45 }
 0xa80   :  { %1793 = vrot.lane.b32.xlu1 %v5701_v5, %s4868_s0  ;;  %1781 = vrot.lane.b32.xlu2 %v5721_v31, %s4868_s0 }
 0xa81   :  { %2018 = vmatpush.msra.mxu0 %v5748_v38 }
 0xa83   :  { %2019 = vmatpush.msra.mxu0 %v5736_v42 }
 0xa85   :  { %2020 = vmatpush.msra.mxu0 %v5773_v29 }
 0xa86   :  { %4546 = vmatmul.msk.f32.vlgmr.msra.gmra.mxu0 %vm655_vm4, %v1759_v57 }
 0xa87   :  { %1796 = vrot.lane.b32.xlu0 %v5773_v29, %s4868_s0 }
 0xa88   :  { %1784 = vrot.lane.b32.xlu1 %v5716_v26, %s4868_s0 }
 0xa8f   :  { %1787 = vrot.lane.b32.xlu0 %v5712_v49, %s4868_s0 }
 0xa97   :  { %1778 = vrot.lane.b32.xlu0 %v5725_v13, %s4868_s0 }
 0xac9   :  { %v1800_v51 = vpop.permute.xlu2 %1799 }
 0xaca   :  { %v1801_v37 = vsel %vm494_vm3, %v1800_v51, %v5736_v42  ;;  %v1761_v51 = vld [vmem:[#allocation7 + $0x298] sm:$0xff] }
 0xacb   :  { %1822 = vrot.lane.b32.xlu0 %v1801_v37, %s4868_s0  ;;  %4547 = vmatmul.msk.f32.gmra.mxu0 %vm655_vm4, %v1761_v51 }
 0xad1   :  { %v1791_v6 = vpop.permute.xlu2 %1790 }
 0xad2   :  { %v1792_v60 = vsel %vm494_vm3, %v1791_v6, %v5704_v4 }
 0xad3   :  { %1816 = vrot.lane.b32.xlu0 %v1792_v60, %s4868_s0  ;;  %4548 = vmatmul.msk.f32.gmra.mxu0 %vm655_vm4, %v1763_v15 }
 0xada   :  { %v1782_v27 = vpop.permute.xlu2 %1781 }
 0xadb   :  { %v1783_v62 = vsel %vm494_vm3, %v1782_v27, %v5721_v31  ;;  %4549 = vmatmul.msk.f32.gmra.mxu0 %vm655_vm4, %v1765_v33 }
 0xadc   :  { %1810 = vrot.lane.b32.xlu0 %v1783_v62, %s4868_s0  ;;  %v1773_v62 = vld [vmem:[#allocation7 + $0x2f8] sm:$0xff] }
 0xae9   :  { %v1803_v44 = vpop.permute.xlu1 %1802 }
 0xaea   :  { %v1804_v36 = vsel %vm494_vm3, %v1803_v44, %v5748_v38  ;;  %v1767_v44 = vld [vmem:[#allocation7 + $0x2c8] sm:$0xff] }
 0xaeb   :  { %1824 = vrot.lane.b32.xlu2 %v1804_v36, %s4868_s0  ;;  %4550 = vmatmul.msk.f32.gmra.mxu0 %vm655_vm4, %v1767_v44 }
 0xaf1   :  { %v1806_v3 = vpop.permute.xlu0 %1805 }
 0xaf2   :  { %v1807_v19 = vsel %vm494_vm3, %v1806_v3, %v5762_v45  ;;  %v1794_v48 = vpop.permute.xlu1 %1793 }
 0xaf3   :  { %v1795_v32 = vsel %vm494_vm3, %v1794_v48, %v5701_v5  ;;  %1826 = vrot.lane.b32.xlu1 %v1807_v19, %s4868_s0  ;;  %4551 = vmatmul.msk.f32.gmra.mxu0 %vm655_vm4, %v1769_v25 }
 0xaf4   :  { %1818 = vrot.lane.b32.xlu2 %v1795_v32, %s4868_s0 }
 0xaf9   :  { %v1797_v20 = vpop.permute.xlu0 %1796 }
 0xafa   :  { %v1798_v21 = vsel %vm494_vm3, %v1797_v20, %v5773_v29  ;;  %v1785_v39 = vpop.permute.xlu1 %1784 }
 0xafb   :  { %v1786_v55 = vsel %vm494_vm3, %v1785_v39, %v5716_v26  ;;  %1820 = vrot.lane.b32.xlu1 %v1798_v21, %s4868_s0  ;;  %4552 = vmatmul.msk.f32.gmra.mxu0 %vm655_vm4, %v1771_v1 }
 0xafc   :  { %1812 = vrot.lane.b32.xlu2 %v1786_v55, %s4868_s0 }
 0xb01   :  { %v1788_v8 = vpop.permute.xlu0 %1787 }
 0xb02   :  { %v1789_v28 = vsel %vm494_vm3, %v1788_v8, %v5712_v49  ;;  %v1758_v8 = vld [vmem:[#allocation7 + $0x280] sm:$0xff] }
 0xb03   :  { %1814 = vrot.lane.b32.xlu1 %v1789_v28, %s4868_s0  ;;  %4553 = vmatmul.msk.f32.gmra.mxu0 %vm655_vm4, %v1773_v62 }
 0xb09   :  { %v1779_v40 = vpop.permute.xlu0 %1778 }
 0xb0a   :  { %v1780_v56 = vsel %vm494_vm3, %v1779_v40, %v5725_v13  ;;  %v1760_v40 = vld [vmem:[#allocation7 + $0x290] sm:$0xff] }
 0xb0b   :  { %1808 = vrot.lane.b32.xlu1 %v1780_v56, %s4868_s0  ;;  %4554 = vmatmul.msk.f32.gmra.mxu0 %vm655_vm4, %v1775_v2  ;;  %v1762_v56 = vld [vmem:[#allocation7 + $0x2a0] sm:$0xff] }
 0xb13   :  { %4555 = vmatmul.msk.f32.gmra.mxu0 %vm655_vm4, %v1777_v14 }
 0xb3d   :  { %v1823_v58 = vpop.permute.xlu0 %1822 }
 0xb3e   :  { %v1835_v54 = vsel %vm494_vm3, %v1823_v58, %v5736_v42  ;;  %v1764_v58 = vld [vmem:[#allocation7 + $0x2b0] sm:$0xff] }
 0xb3f   :  { %1862 = vrot.lane.b32.xlu1 %v1835_v54, %s4872_s4  ;;  %v1766_v54 = vld [vmem:[#allocation7 + $0x2c0] sm:$0xff] }
 0xb45   :  { %v1825_v16 = vpop.permute.xlu2 %1824  ;;  %v1817_v43 = vpop.permute.xlu0 %1816 }
 0xb46   :  { %v1836_v34 = vsel %vm494_vm3, %v1825_v16, %v5748_v38  ;;  %v1832_v24 = vsel %vm494_vm3, %v1817_v43, %v5704_v4  ;;  %v1768_v16 = vld [vmem:[#allocation7 + $0x2d0] sm:$0xff]  ;;  %v1770_v43 = vld [vmem:[#allocation7 + $0x2e0] sm:$0xff] }
 0xb47   :  { %1864 = vrot.lane.b32.xlu0 %v1836_v34, %s4872_s4  ;;  %1856 = vrot.lane.b32.xlu1 %v1832_v24, %s4872_s4  ;;  %v1772_v34 = vld [vmem:[#allocation7 + $0x2f0] sm:$0xff]  ;;  %v1774_v24 = vld [vmem:[#allocation7 + $0x300] sm:$0xff] }
 0xb4e   :  { %v1819_v17 = vpop.permute.xlu2 %1818  ;;  %v1811_v9 = vpop.permute.xlu0 %1810 }
 0xb4f   :  { %v1833_v7 = vsel %vm494_vm3, %v1819_v17, %v5701_v5  ;;  %v1829_v52 = vsel %vm494_vm3, %v1811_v9, %v5721_v31  ;;  %v1776_v17 = vld [vmem:[#allocation7 + $0x310] sm:$0xff]  ;;  %v2022_v9 = vpop.f32.mrf.mxu0 }
 0xb50   :  { %1858 = vrot.lane.b32.xlu0 %v1833_v7, %s4872_s4  ;;  %1850 = vrot.lane.b32.xlu1 %v1829_v52, %s4872_s4 }
 0xb56   :  { %v1813_v12 = vpop.permute.xlu2 %1812 }
 0xb57   :  { %v1830_v0 = vsel %vm494_vm3, %v1813_v12, %v5716_v26  ;;  %v2025_v7 = vpop.f32.mrf.mxu0 }
 0xb58   :  { %1852 = vrot.lane.b32.xlu0 %v1830_v0, %s4872_s4  ;;  %1930 = vperm.xlu1 %4750, %v1775_v2  }
 0xb5f   :  { %v2028_v2 = vpop.f32.mrf.mxu0 }
 0xb60   :  { %1935 = vperm.xlu0 %4752, %v1777_v14   ;;  %1915 = vperm.xlu1 %4750, %v1769_v25  }
 0xb65   :  { %v1827_v10 = vpop.permute.xlu1 %1826 }
 0xb66   :  { %v1837_v23 = vsel %vm494_vm3, %v1827_v10, %v5762_v45 }
 0xb67   :  { %1866 = vrot.lane.b32.xlu2 %v1837_v23, %s4872_s4  ;;  %v2031_v0 = vpop.f32.mrf.mxu0 }
 0xb68   :  { %1920 = vperm.xlu0 %4752, %v1771_v1   ;;  %1900 = vperm.xlu1 %4750, %v1763_v15  }
 0xb6d   :  { %v1821_v53 = vpop.permute.xlu1 %1820 }
 0xb6e   :  { %v1834_v41 = vsel %vm494_vm3, %v1821_v53, %v5773_v29 }
 0xb6f   :  { %1860 = vrot.lane.b32.xlu2 %v1834_v41, %s4872_s4  ;;  %v2034_v10 = vpop.f32.mrf.mxu0 }
 0xb70   :  { %1905 = vperm.xlu0 %4752, %v1765_v33  }
 0xb75   :  { %v1815_v37 = vpop.permute.xlu1 %1814 }
 0xb76   :  { %v1831_v6 = vsel %vm494_vm3, %v1815_v37, %v5712_v49 }
 0xb77   :  { %1854 = vrot.lane.b32.xlu2 %v1831_v6, %s4872_s4  ;;  %v2037_v41 = vpop.f32.mrf.mxu0 }
 0xb78   :  { %1890 = vperm.xlu0 %4752, %v1759_v57  }
 0xb7d   :  { %v1809_v60 = vpop.permute.xlu1 %1808 }
 0xb7e   :  { %v1828_v27 = vsel %vm494_vm3, %v1809_v60, %v5725_v13 }
 0xb7f   :  { %1848 = vrot.lane.b32.xlu2 %v1828_v27, %s4872_s4 }
 0xb87   :  { %1925 = vperm.xlu2 %4751, %v1773_v62  }
 0xb8f   :  { %1910 = vperm.xlu2 %4751, %v1767_v44  }
 0xb97   :  { %1895 = vperm.xlu2 %4751, %v1761_v51  }
 0xbb1   :  { %v1863_v3 = vpop.permute.xlu1 %1862 }
 0xbb9   :  { %v1865_v36 = vpop.permute.xlu0 %1864  ;;  %v1857_v20 = vpop.permute.xlu1 %1856 }
 0xbc1   :  { %v1867_v19 = vpop.permute.xlu2 %1866 }
 0xbc2   :  { %4536 = vmatpush.msk.msra.mxu2 %vm1756_vm7, %v1867_v19  ;;  %v1859_v48 = vpop.permute.xlu0 %1858  ;;  %v1851_v55 = vpop.permute.xlu1 %1850 }
 0xbc4   :  { %4537 = vmatpush.msk.msra.mxu2 %vm1756_vm7, %v1865_v36  ;;  %v2040_v36 = vpop.f32.mrf.mxu0 }
 0xbc6   :  { %4538 = vmatpush.msk.msra.mxu2 %vm1756_vm7, %v1863_v3 }
 0xbc9   :  { %v1861_v32 = vpop.permute.xlu2 %1860 }
 0xbca   :  { %4539 = vmatpush.msk.msra.mxu2 %vm1756_vm7, %v1861_v32  ;;  %v1853_v39 = vpop.permute.xlu0 %1852  ;;  %v1931_v25 = vpop.permute.xlu1 %1930 }
 0xbcc   :  { %4540 = vmatpush.msk.msra.mxu2 %vm1756_vm7, %v1859_v48 }
 0xbce   :  { %4541 = vmatpush.msk.msra.mxu2 %vm1756_vm7, %v1857_v20 }
 0xbd1   :  { %v1855_v21 = vpop.permute.xlu2 %1854 }
 0xbd2   :  { %4542 = vmatpush.msk.msra.mxu2 %vm1756_vm7, %v1855_v21  ;;  %v1936_v57 = vpop.permute.xlu0 %1935  ;;  %v1916_v53 = vpop.permute.xlu1 %1915 }
 0xbd4   :  { %4543 = vmatpush.msk.msra.mxu2 %vm1756_vm7, %v1853_v39 }
 0xbd6   :  { %4544 = vmatpush.msk.msra.mxu2 %vm1756_vm7, %v1851_v55 }
 0xbd9   :  { %v1849_v28 = vpop.permute.xlu2 %1848 }
 0xbda   :  { %4545 = vmatpush.msk.msra.mxu2 %vm1756_vm7, %v1849_v28  ;;  %v1921_v23 = vpop.permute.xlu0 %1920  ;;  %v1901_v44 = vpop.permute.xlu1 %1900 }
 0xbdb   :  { %1974 = vmatmul.f32.vlgmr.msra.gmra.mxu2 %v1758_v8 }
 0xbe1   :  { %v1926_v1 = vpop.permute.xlu2 %1925 }
 0xbe2   :  { %v1906_v37 = vpop.permute.xlu0 %1905 }
 0xbe3   :  { %1977 = vmatmul.f32.gmra.mxu2 %v1760_v40 }
 0xbe9   :  { %v1911_v51 = vpop.permute.xlu2 %1910 }
 0xbea   :  { %v1891_v55 = vpop.permute.xlu0 %1890 }
 0xbeb   :  { %1980 = vmatmul.f32.gmra.mxu2 %v1762_v56 }
 0xbf1   :  { %v1896_v32 = vpop.permute.xlu2 %1895 }
 0xbf3   :  { %1983 = vmatmul.f32.gmra.mxu2 %v1764_v58 }
 0xbfb   :  { %1986 = vmatmul.f32.gmra.mxu2 %v1766_v54 }
 0xc03   :  { %1989 = vmatmul.f32.gmra.mxu2 %v1768_v16 }
 0xc0b   :  { %1992 = vmatmul.f32.gmra.mxu2 %v1770_v43 }
 0xc13   :  { %1995 = vmatmul.f32.gmra.mxu2 %v1772_v34  ;;  %v2043_v34 = vpop.f32.mrf.mxu0 }
 0xc1b   :  { %1998 = vmatmul.f32.gmra.mxu2 %v1774_v24 }
 0xc23   :  { %2001 = vmatmul.f32.gmra.mxu2 %v1776_v17 }
 0xc5e   :  { %v1975_v52 = vpop.f32.mrf.mxu2 }
 0xc5f   :  { %v1976_v8 = vadd.f32 %v1975_v52, %v1891_v55 }
 0xc61   :  { %v2023_v16 = vadd.f32 %v2022_v9, %v1976_v8  ;;  %v2046_v9 = vpop.f32.mrf.mxu0 }
 0xc63   :  { %v5890_v17 = vmax.f32 %v2023_v16, 0.0 }
 0xc66   :  { %v1978_v12 = vpop.f32.mrf.mxu2 }
 0xc67   :  { %v1979_v20 = vadd.f32 %v1978_v12, %v1896_v32 }
 0xc69   :  { %v2026_v58 = vadd.f32 %v2025_v7, %v1979_v20 }
 0xc6b   :  { %v5887_v24 = vmax.f32 %v2026_v58, 0.0 }
 0xc6e   :  { %v1981_v14 = vpop.f32.mrf.mxu2 }
 0xc6f   :  { %v1982_v3 = vadd.f32 %v1981_v14, %v1901_v44 }
 0xc71   :  { %v2029_v28 = vadd.f32 %v2028_v2, %v1982_v3 }
 0xc73   :  { %v5884_v43 = vmax.f32 %v2029_v28, 0.0 }
 0xc76   :  { %v1984_v15 = vpop.f32.mrf.mxu2 }
 0xc77   :  { %v1985_v27 = vadd.f32 %v1984_v15, %v1906_v37 }
 0xc79   :  { %v2032_v21 = vadd.f32 %v2031_v0, %v1985_v27 }
 0xc7b   :  { %v5881_v54 = vmax.f32 %v2032_v21, 0.0 }
 0xc7e   :  { %v1987_v33 = vpop.f32.mrf.mxu2 }
 0xc7f   :  { %v1988_v6 = vadd.f32 %v1987_v33, %v1911_v51 }
 0xc81   :  { %v2035_v19 = vadd.f32 %v2034_v10, %v1988_v6 }
 0xc83   :  { %v5878_v40 = vmax.f32 %v2035_v19, 0.0 }
 0xc86   :  { %v1990_v60 = vpop.f32.mrf.mxu2 }
 0xc87   :  { %v1991_v62 = vadd.f32 %v1990_v60, %v1916_v53 }
 0xc89   :  { %v2038_v48 = vadd.f32 %v2037_v41, %v1991_v62 }
 0xc8b   :  { %v5876_v39 = vmax.f32 %v2038_v48, 0.0 }
 0xc8d   :  { %2263 = vmatpush.msrb.mxu3 %v5876_v39 }
 0xc8e   :  { %v1993_v56 = vpop.f32.mrf.mxu2 }
 0xc8f   :  { %2264 = vmatpush.msrb.mxu3 %v5878_v40  ;;  %v1994_v41 = vadd.f32 %v1993_v56, %v1921_v23 }
 0xc91   :  { %2265 = vmatpush.msrb.mxu3 %v5881_v54  ;;  %v2041_v6 = vadd.f32 %v2040_v36, %v1994_v41 }
 0xc93   :  { %2266 = vmatpush.msrb.mxu3 %v5884_v43 }
 0xc95   :  { %2267 = vmatpush.msrb.mxu3 %v5887_v24 }
 0xc96   :  { %v1996_v52 = vpop.f32.mrf.mxu2 }
 0xc97   :  { %v1997_v7 = vadd.f32 %v1996_v52, %v1926_v1  ;;  %2268 = vmatpush.msrb.mxu3 %v5890_v17  ;;  %v2049_v1 = vpop.f32.mrf.mxu0 }
 0xc99   :  { %v2044_v2 = vadd.f32 %v2043_v34, %v1997_v7 }
 0xc9b   :  { %v5894_v12 = vmax.f32 %v2044_v2, 0.0 }
 0xc9d   :  { %2104 = vrot.lane.b32.xlu0 %v5894_v12, %s4868_s0 }
 0xc9e   :  { %v1999_v0 = vpop.f32.mrf.mxu2 }
 0xc9f   :  { %v2000_v14 = vadd.f32 %v1999_v0, %v1931_v25  ;;  %v2058_v25 = vmax.f32 %v2041_v6, 0.0 }
 0xca1   :  { %v2047_v10 = vadd.f32 %v2046_v9, %v2000_v14 }
 0xca3   :  { %v2060_v15 = vmax.f32 %v2047_v10, 0.0  ;;  %v2064_v10 = vld [vmem:[#allocation7 + $0x328] sm:$0xff] }
 0xca5   :  { %2107 = vrot.lane.b32.xlu2 %v2060_v15, %s4868_s0  ;;  %2095 = vrot.lane.b32.xlu0 %v5878_v40, %s4868_s0 }
 0xca6   :  { %v2002_v53 = vpop.f32.mrf.mxu2 }
 0xca7   :  { %v2003_v33 = vadd.f32 %v2002_v53, %v1936_v57 }
 0xca9   :  { %v2050_v51 = vadd.f32 %v2049_v1, %v2003_v33 }
 0xcab   :  { %v2061_v37 = vmax.f32 %v2050_v51, 0.0 }
 0xcad   :  { %2110 = vrot.lane.b32.xlu1 %v2061_v37, %s4868_s0  ;;  %2322 = vmatpush.msrb.mxu1 %v2061_v37 }
 0xcae   :  { %2098 = vrot.lane.b32.xlu2 %v5876_v39, %s4868_s0  ;;  %2086 = vrot.lane.b32.xlu0 %v5887_v24, %s4868_s0 }
 0xcaf   :  { %2323 = vmatpush.msrb.mxu1 %v2060_v15 }
 0xcb1   :  { %2324 = vmatpush.msrb.mxu1 %v5894_v12 }
 0xcb3   :  { %2325 = vmatpush.msrb.mxu1 %v2058_v25 }
 0xcb4   :  { %4566 = vmatmul.msk.f32.vlgmr.msrb.gmra.mxu1 %vm655_vm4, %v2064_v10 }
 0xcb5   :  { %2101 = vrot.lane.b32.xlu1 %v2058_v25, %s4868_s0 }
 0xcb6   :  { %2089 = vrot.lane.b32.xlu2 %v5884_v43, %s4868_s0 }
 0xcbd   :  { %2092 = vrot.lane.b32.xlu1 %v5881_v54, %s4868_s0 }
 0xcc5   :  { %2083 = vrot.lane.b32.xlu1 %v5890_v17, %s4868_s0 }
 0xcff   :  { %v2108_v57 = vpop.permute.xlu2 %2107 }
 0xd00   :  { %v2109_v23 = vsel %vm494_vm3, %v2108_v57, %v2060_v15  ;;  %v2082_v57 = vld [vmem:[#allocation7 + $0x3b8] sm:$0xff] }
 0xd01   :  { %2129 = vrot.lane.b32.xlu0 %v2109_v23, %s4868_s0 }
 0xd08   :  { %v2099_v60 = vpop.permute.xlu2 %2098 }
 0xd09   :  { %v2100_v27 = vsel %vm494_vm3, %v2099_v60, %v5876_v39  ;;  %v2076_v60 = vld [vmem:[#allocation7 + $0x388] sm:$0xff] }
 0xd0a   :  { %2123 = vrot.lane.b32.xlu0 %v2100_v27, %s4868_s0 }
 0xd0f   :  { %v2105_v62 = vpop.permute.xlu0 %2104 }
 0xd10   :  { %v2106_v44 = vsel %vm494_vm3, %v2105_v62, %v5894_v12  ;;  %v2090_v36 = vpop.permute.xlu2 %2089 }
 0xd11   :  { %v2091_v3 = vsel %vm494_vm3, %v2090_v36, %v5884_v43  ;;  %2127 = vrot.lane.b32.xlu1 %v2106_v44, %s4868_s0  ;;  %v2078_v44 = vld [vmem:[#allocation7 + $0x398] sm:$0xff]  ;;  %v2080_v36 = vld [vmem:[#allocation7 + $0x3a8] sm:$0xff] }
 0xd12   :  { %2117 = vrot.lane.b32.xlu0 %v2091_v3, %s4868_s0  ;;  %v2072_v3 = vld [vmem:[#allocation7 + $0x368] sm:$0xff] }
 0xd17   :  { %v2096_v19 = vpop.permute.xlu0 %2095 }
 0xd18   :  { %v2097_v48 = vsel %vm494_vm3, %v2096_v19, %v5878_v40 }
 0xd19   :  { %2121 = vrot.lane.b32.xlu1 %v2097_v48, %s4868_s0 }
 0xd1f   :  { %v2111_v32 = vpop.permute.xlu1 %2110 }
 0xd20   :  { %v2112_v20 = vsel %vm494_vm3, %v2111_v32, %v2061_v37  ;;  %v2087_v21 = vpop.permute.xlu0 %2086 }
 0xd21   :  { %v2088_v55 = vsel %vm494_vm3, %v2087_v21, %v5887_v24  ;;  %2131 = vrot.lane.b32.xlu2 %v2112_v20, %s4868_s0 }
 0xd22   :  { %2115 = vrot.lane.b32.xlu1 %v2088_v55, %s4868_s0 }
 0xd27   :  { %v2102_v8 = vpop.permute.xlu1 %2101 }
 0xd28   :  { %v2103_v28 = vsel %vm494_vm3, %v2102_v8, %v2058_v25 }
 0xd29   :  { %2125 = vrot.lane.b32.xlu2 %v2103_v28, %s4868_s0 }
 0xd2f   :  { %v2093_v56 = vpop.permute.xlu1 %2092 }
 0xd30   :  { %v2094_v58 = vsel %vm494_vm3, %v2093_v56, %v5881_v54  ;;  %v2063_v56 = vld [vmem:[#allocation7 + $0x320] sm:$0xff] }
 0xd31   :  { %2119 = vrot.lane.b32.xlu2 %v2094_v58, %s4868_s0 }
 0xd37   :  { %v2084_v16 = vpop.permute.xlu1 %2083 }
 0xd38   :  { %v2085_v34 = vsel %vm494_vm3, %v2084_v16, %v5890_v17  ;;  %v2065_v16 = vld [vmem:[#allocation7 + $0x330] sm:$0xff] }
 0xd39   :  { %2113 = vrot.lane.b32.xlu2 %v2085_v34, %s4868_s0  ;;  %v2067_v34 = vld [vmem:[#allocation7 + $0x340] sm:$0xff] }
 0xd73   :  { %v2130_v52 = vpop.permute.xlu0 %2129 }
 0xd74   :  { %v2141_v7 = vsel %vm494_vm3, %v2130_v52, %v2060_v15  ;;  %v2069_v52 = vld [vmem:[#allocation7 + $0x350] sm:$0xff] }
 0xd75   :  { %2169 = vrot.lane.b32.xlu1 %v2141_v7, %s4872_s4  ;;  %v2071_v7 = vld [vmem:[#allocation7 + $0x360] sm:$0xff] }
 0xd7b   :  { %v2132_v2 = vpop.permute.xlu2 %2131 }
 0xd7c   :  { %v2142_v9 = vsel %vm494_vm3, %v2132_v2, %v2061_v37  ;;  %v2124_v0 = vpop.permute.xlu0 %2123  ;;  %v2073_v2 = vld [vmem:[#allocation7 + $0x370] sm:$0xff] }
 0xd7d   :  { %v2138_v14 = vsel %vm494_vm3, %v2124_v0, %v5876_v39  ;;  %2171 = vrot.lane.b32.xlu0 %v2142_v9, %s4872_s4  ;;  %v2066_v39 = vld [vmem:[#allocation7 + $0x338] sm:$0xff]  ;;  %v2075_v9 = vld [vmem:[#allocation7 + $0x380] sm:$0xff]  ;;  %v2077_v0 = vld [vmem:[#allocation7 + $0x390] sm:$0xff] }
 0xd7e   :  { %2163 = vrot.lane.b32.xlu1 %v2138_v14, %s4872_s4  ;;  %4567 = vmatmul.msk.f32.gmra.mxu1 %vm655_vm4, %v2066_v39  ;;  %v2079_v14 = vld [vmem:[#allocation7 + $0x3a0] sm:$0xff] }
 0xd83   :  { %v2126_v53 = vpop.permute.xlu2 %2125  ;;  %v2128_v1 = vpop.permute.xlu1 %2127 }
 0xd84   :  { %v2139_v15 = vsel %vm494_vm3, %v2126_v53, %v2058_v25  ;;  %v2118_v33 = vpop.permute.xlu0 %2117  ;;  %v2140_v41 = vsel %vm494_vm3, %v2128_v1, %v5894_v12 }
 0xd85   :  { %v2135_v51 = vsel %vm494_vm3, %v2118_v33, %v5884_v43  ;;  %2165 = vrot.lane.b32.xlu0 %v2139_v15, %s4872_s4  ;;  %2167 = vrot.lane.b32.xlu2 %v2140_v41, %s4872_s4  ;;  %v2068_v43 = vld [vmem:[#allocation7 + $0x348] sm:$0xff]  ;;  %v2327_v15 = vpop.f32.mrf.mxu1 }
 0xd86   :  { %2157 = vrot.lane.b32.xlu1 %v2135_v51, %s4872_s4  ;;  %4568 = vmatmul.msk.f32.gmra.mxu1 %vm655_vm4, %v2068_v43 }
 0xd8b   :  { %v2120_v37 = vpop.permute.xlu2 %2119  ;;  %v2122_v6 = vpop.permute.xlu1 %2121 }
 0xd8c   :  { %v2136_v25 = vsel %vm494_vm3, %v2120_v37, %v5881_v54  ;;  %v2137_v12 = vsel %vm494_vm3, %v2122_v6, %v5878_v40  ;;  %v2070_v40 = vld [vmem:[#allocation7 + $0x358] sm:$0xff] }
 0xd8d   :  { %2159 = vrot.lane.b32.xlu0 %v2136_v25, %s4872_s4  ;;  %2161 = vrot.lane.b32.xlu2 %v2137_v12, %s4872_s4 }
 0xd8e   :  { %2240 = vperm.xlu1 %4750, %v2082_v57   ;;  %4569 = vmatmul.msk.f32.gmra.mxu1 %vm655_vm4, %v2070_v40 }
 0xd93   :  { %v2114_v23 = vpop.permute.xlu2 %2113 }
 0xd94   :  { %v2133_v27 = vsel %vm494_vm3, %v2114_v23, %v5890_v17  ;;  %v2116_v62 = vpop.permute.xlu1 %2115  ;;  %v2074_v17 = vld [vmem:[#allocation7 + $0x378] sm:$0xff] }
 0xd95   :  { %v2134_v54 = vsel %vm494_vm3, %v2116_v62, %v5887_v24  ;;  %2153 = vrot.lane.b32.xlu0 %v2133_v27, %s4872_s4 }
 0xd96   :  { %2225 = vperm.xlu1 %4750, %v2076_v60   ;;  %2155 = vrot.lane.b32.xlu2 %v2134_v54, %s4872_s4 }
 0xd97   :  { %4570 = vmatmul.msk.f32.gmra.mxu1 %vm655_vm4, %v2072_v3 }
 0xd9d   :  { %2230 = vperm.xlu0 %4752, %v2078_v44  }
 0xd9e   :  { %2210 = vperm.xlu1 %4750, %v2070_v40   ;;  %2235 = vperm.xlu2 %4751, %v2080_v36  }
 0xd9f   :  { %4571 = vmatmul.msk.f32.gmra.mxu1 %vm655_vm4, %v2074_v17 }
 0xda5   :  { %2215 = vperm.xlu0 %4752, %v2072_v3  }
 0xda6   :  { %2195 = vperm.xlu1 %4750, %v2064_v10   ;;  %2220 = vperm.xlu2 %4751, %v2074_v17   ;;  %v2081_v10 = vld [vmem:[#allocation7 + $0x3b0] sm:$0xff] }
 0xda7   :  { %4572 = vmatmul.msk.f32.gmra.mxu1 %vm655_vm4, %v2076_v60 }
 0xdad   :  { %2200 = vperm.xlu0 %4752, %v2066_v39  }
 0xdae   :  { %2205 = vperm.xlu2 %4751, %v2068_v43  }
 0xdaf   :  { %4573 = vmatmul.msk.f32.gmra.mxu1 %vm655_vm4, %v2078_v44 }
 0xdb7   :  { %4574 = vmatmul.msk.f32.gmra.mxu1 %vm655_vm4, %v2080_v36 }
 0xdbf   :  { %4575 = vmatmul.msk.f32.gmra.mxu1 %vm655_vm4, %v2082_v57 }
 0xddf   :  { %v2168_v19 = vpop.permute.xlu2 %2167 }
 0xde7   :  { %v2170_v24 = vpop.permute.xlu1 %2169  ;;  %v2162_v21 = vpop.permute.xlu2 %2161 }
 0xdef   :  { %v2172_v48 = vpop.permute.xlu0 %2171 }
 0xdf0   :  { %4556 = vmatpush.msk.msrb.mxu3 %vm1756_vm7, %v2172_v48  ;;  %v2164_v32 = vpop.permute.xlu1 %2163  ;;  %v2156_v28 = vpop.permute.xlu2 %2155 }
 0xdf2   :  { %4557 = vmatpush.msk.msrb.mxu3 %vm1756_vm7, %v2170_v24 }
 0xdf4   :  { %4558 = vmatpush.msk.msrb.mxu3 %vm1756_vm7, %v2168_v19 }
 0xdf7   :  { %v2166_v20 = vpop.permute.xlu0 %2165 }
 0xdf8   :  { %4559 = vmatpush.msk.msrb.mxu3 %vm1756_vm7, %v2166_v20  ;;  %v2158_v8 = vpop.permute.xlu1 %2157  ;;  %v6002_v39 = vpop.permute.xlu2 %2235 }
 0xdfa   :  { %4560 = vmatpush.msk.msrb.mxu3 %vm1756_vm7, %v2164_v32 }
 0xdfb   :  { %v2330_v51 = vpop.f32.mrf.mxu1 }
 0xdfc   :  { %4561 = vmatpush.msk.msrb.mxu3 %vm1756_vm7, %v2162_v21 }
 0xdff   :  { %v2160_v55 = vpop.permute.xlu0 %2159 }
 0xe00   :  { %4562 = vmatpush.msk.msrb.mxu3 %vm1756_vm7, %v2160_v55  ;;  %v5998_v53 = vpop.permute.xlu1 %2240  ;;  %v2221_v60 = vpop.permute.xlu2 %2220 }
 0xe02   :  { %4563 = vmatpush.msk.msrb.mxu3 %vm1756_vm7, %v2158_v8 }
 0xe03   :  { %v2333_v12 = vpop.f32.mrf.mxu1 }
 0xe04   :  { %4564 = vmatpush.msk.msrb.mxu3 %vm1756_vm7, %v2156_v28 }
 0xe07   :  { %v2154_v58 = vpop.permute.xlu0 %2153 }
 0xe08   :  { %4565 = vmatpush.msk.msrb.mxu3 %vm1756_vm7, %v2154_v58  ;;  %v2226_v1 = vpop.permute.xlu1 %2225  ;;  %v2206_v24 = vpop.permute.xlu2 %2205 }
 0xe09   :  { %2279 = vmatmul.f32.vlgmr.msrb.gmra.mxu3 %v2063_v56 }
 0xe0b   :  { %v2336_v36 = vpop.f32.mrf.mxu1 }
 0xe0f   :  { %v6000_v33 = vpop.permute.xlu0 %2230 }
 0xe10   :  { %v2211_v41 = vpop.permute.xlu1 %2210 }
 0xe11   :  { %2282 = vmatmul.f32.gmra.mxu3 %v2065_v16 }
 0xe14   :  { %v2339_v21 = vpop.f32.mrf.mxu1 }
 0xe17   :  { %v2216_v37 = vpop.permute.xlu0 %2215 }
 0xe18   :  { %v2196_v6 = vpop.permute.xlu1 %2195 }
 0xe19   :  { %2285 = vmatmul.f32.gmra.mxu3 %v2067_v34 }
 0xe1c   :  { %v2342_v34 = vpop.f32.mrf.mxu1 }
 0xe1f   :  { %v2201_v62 = vpop.permute.xlu0 %2200 }
 0xe21   :  { %2288 = vmatmul.f32.gmra.mxu3 %v2069_v52 }
 0xe29   :  { %2291 = vmatmul.f32.gmra.mxu3 %v2071_v7 }
 0xe31   :  { %2294 = vmatmul.f32.gmra.mxu3 %v2073_v2 }
 0xe39   :  { %2297 = vmatmul.f32.gmra.mxu3 %v2075_v9 }
 0xe41   :  { %2300 = vmatmul.f32.gmra.mxu3 %v2077_v0 }
 0xe49   :  { %2303 = vmatmul.f32.gmra.mxu3 %v2079_v14  ;;  %v2345_v14 = vpop.f32.mrf.mxu1 }
 0xe51   :  { %2306 = vmatmul.f32.gmra.mxu3 %v2081_v10 }
 0xe8c   :  { %v2280_v57 = vpop.f32.mrf.mxu3 }
 0xe8d   :  { %v2281_v25 = vadd.f32 %v2280_v57, %v2196_v6 }
 0xe8f   :  { %v2328_v43 = vadd.f32 %v2327_v15, %v2281_v25 }
 0xe91   :  { %v2357_v23 = vmax.f32 %v2328_v43, 0.0  ;;  %v2348_v43 = vpop.f32.mrf.mxu1 }
 0xe93   :  { %v6005_v27 = vadd.f32 %v2357_v23, %v5666_v35 }
 0xe94   :  { %v2283_v54 = vpop.f32.mrf.mxu3 }
 0xe95   :  { %v2284_v40 = vadd.f32 %v2283_v54, %v2201_v62 }
 0xe97   :  { %v2331_v44 = vadd.f32 %v2330_v51, %v2284_v40 }
 0xe99   :  { %v2358_v3 = vmax.f32 %v2331_v44, 0.0 }
 0xe9b   :  { %v6008_v17 = vadd.f32 %v2358_v3, %v5672_v59 }
 0xe9c   :  { %v2286_v19 = vpop.f32.mrf.mxu3 }
 0xe9d   :  { %v2287_v48 = vadd.f32 %v2286_v19, %v2206_v24 }
 0xe9f   :  { %v2334_v32 = vadd.f32 %v2333_v12, %v2287_v48 }
 0xea1   :  { %v2359_v20 = vmax.f32 %v2334_v32, 0.0 }
 0xea3   :  { %v6011_v55 = vadd.f32 %v2359_v20, %v5678_v50 }
 0xea4   :  { %v2289_v35 = vpop.f32.mrf.mxu3 }
 0xea5   :  { %v2290_v8 = vadd.f32 %v2289_v35, %v2211_v41 }
 0xea7   :  { %v2337_v28 = vadd.f32 %v2336_v36, %v2290_v8 }
 0xea9   :  { %v2360_v56 = vmax.f32 %v2337_v28, 0.0 }
 0xeab   :  { %v6014_v58 = vadd.f32 %v2360_v56, %v5684_v63 }
 0xeac   :  { %v2292_v16 = vpop.f32.mrf.mxu3 }
 0xead   :  { %v2293_v59 = vadd.f32 %v2292_v16, %v2216_v37  ;;  %v2380_v37 = vadd.f32 %v2360_v56, %v5712_v49 }
 0xeaf   :  { %v2340_v52 = vadd.f32 %v2339_v21, %v2293_v59 }
 0xeb1   :  { %v2361_v7 = vmax.f32 %v2340_v52, 0.0 }
 0xeb3   :  { %v6017_v2 = vadd.f32 %v2361_v7, %v5690_v30  ;;  %v2381_v15 = vadd.f32 %v2361_v7, %v5704_v4  ;;  %v2379_v30 = vadd.f32 %v2359_v20, %v5716_v26  ;;  %v2378_v4 = vadd.f32 %v2358_v3, %v5721_v31 }
 0xeb4   :  { %v2295_v9 = vpop.f32.mrf.mxu3 }
 0xeb5   :  { %v2296_v0 = vadd.f32 %v2295_v9, %v2221_v60  ;;  %v6028_v25 = vmax.f32 %v2381_v15, 0.0  ;;  %v6036_v49 = vmax.f32 %v2379_v30, 0.0  ;;  %v6042_v62 = vmax.f32 %v2378_v4, 0.0 }
 0xeb7   :  { %v2343_v50 = vadd.f32 %v2342_v34, %v2296_v0 }
 0xeb9   :  { %v2362_v10 = vmax.f32 %v2343_v50, 0.0 }
 0xebb   :  { %v6021_v41 = vadd.f32 %v2362_v10, %v5697_v46  ;;  %v2382_v63 = vadd.f32 %v2362_v10, %v5701_v5  ;;  %v6032_v46 = vmax.f32 %v2380_v37, 0.0  ;;  %v2377_v5 = vadd.f32 %v2357_v23, %v5725_v13  ;;  %v2351_v23 = vpop.f32.mrf.mxu1 }
 0xebc   :  { %v2298_v51 = vpop.f32.mrf.mxu3 }
 0xebd   :  { %v6025_v6 = vmax.f32 %v2382_v63, 0.0  ;;  %v2299_v57 = vadd.f32 %v2298_v51, %v2226_v1  ;;  %v6046_v31 = vmax.f32 %v2377_v5, 0.0 }
 0xebf   :  { %v2346_v12 = vadd.f32 %v2345_v14, %v2299_v57  ;;  %2599 = vmatpush.msrb.mxu2 %v6025_v6 }
 0xec1   :  { %v2363_v60 = vmax.f32 %v2346_v12, 0.0  ;;  %2600 = vmatpush.msrb.mxu2 %v6028_v25 }
 0xec3   :  { %v6039_v1 = vadd.f32 %v2363_v60, %v5718_v18  ;;  %2601 = vmatpush.msrb.mxu2 %v6032_v46  ;;  %v2383_v28 = vadd.f32 %v2363_v60, %v5773_v29 }
 0xec4   :  { %v2301_v26 = vpop.f32.mrf.mxu3 }
 0xec5   :  { %v2302_v54 = vadd.f32 %v2301_v26, %v6000_v33  ;;  %2602 = vmatpush.msrb.mxu2 %v6036_v49 }
 0xec7   :  { %v2349_v40 = vadd.f32 %v2348_v43, %v2302_v54  ;;  %2603 = vmatpush.msrb.mxu2 %v6042_v62 }
 0xec9   :  { %v2364_v13 = vmax.f32 %v2349_v40, 0.0  ;;  %2604 = vmatpush.msrb.mxu2 %v6046_v31 }
 0xecb   :  { %v6051_v18 = vadd.f32 %v2364_v13, %v5733_v11  ;;  %v2384_v44 = vadd.f32 %v2364_v13, %v5736_v42  ;;  %v2354_v11 = vpop.f32.mrf.mxu1 }
 0xecc   :  { %v2304_v36 = vpop.f32.mrf.mxu3 }
 0xecd   :  { %v6054_v3 = vmax.f32 %v2384_v44, 0.0  ;;  %v2305_v33 = vadd.f32 %v2304_v36, %v6002_v39 }
 0xecf   :  { %v2352_v24 = vadd.f32 %v2351_v23, %v2305_v33  ;;  %2440 = vrot.lane.b32.xlu1 %v6054_v3, %s4868_s0  ;;  %v2416_v23 = vld [vmem:[#allocation7 + $0x448] sm:$0xff]  ;;  %v2410_v33 = vld [vmem:[#allocation7 + $0x418] sm:$0xff] }
 0xed1   :  { %v2365_v19 = vmax.f32 %v2352_v24, 0.0 }
 0xed3   :  { %v6060_v48 = vadd.f32 %v2365_v19, %v5745_v61  ;;  %v2385_v32 = vadd.f32 %v2365_v19, %v5748_v38 }
 0xed4   :  { %v2307_v20 = vpop.f32.mrf.mxu3 }
 0xed5   :  { %v6063_v21 = vmax.f32 %v2385_v32, 0.0  ;;  %v2308_v42 = vadd.f32 %v2307_v20, %v5998_v53  ;;  %v2404_v20 = vld [vmem:[#allocation7 + $0x3e8] sm:$0xff] }
 0xed7   :  { %v2355_v35 = vadd.f32 %v2354_v11, %v2308_v42  ;;  %2443 = vrot.lane.b32.xlu0 %v6063_v21, %s4868_s0  ;;  %2431 = vrot.lane.b32.xlu1 %v6028_v25, %s4868_s0 }
 0xed9   :  { %v2366_v39 = vmax.f32 %v2355_v35, 0.0 }
 0xedb   :  { %v6071_v8 = vadd.f32 %v2366_v39, %v5759_v22  ;;  %v2386_v61 = vadd.f32 %v2366_v39, %v5762_v45  ;;  %v6085_v22 = vmax.f32 %v2383_v28, 0.0 }
 0xedd   :  { %v6074_v38 = vmax.f32 %v2386_v61, 0.0  ;;  %v2400_v61 = vld [vmem:[#allocation7 + $0x3c8] sm:$0xff] }
 0xedf   :  { %2446 = vrot.lane.b32.xlu2 %v6074_v38, %s4868_s0  ;;  %2658 = vmatpush.msrb.mxu0 %v6074_v38 }
 0xee0   :  { %2434 = vrot.lane.b32.xlu0 %v6025_v6, %s4868_s0  ;;  %2422 = vrot.lane.b32.xlu1 %v6042_v62, %s4868_s0 }
 0xee1   :  { %2659 = vmatpush.msrb.mxu0 %v6063_v21 }
 0xee3   :  { %2660 = vmatpush.msrb.mxu0 %v6054_v3 }
 0xee5   :  { %2661 = vmatpush.msrb.mxu0 %v6085_v22 }
 0xee6   :  { %4586 = vmatmul.msk.f32.vlgmr.msrb.gmra.mxu0 %vm655_vm4, %v2400_v61 }
 0xee7   :  { %2437 = vrot.lane.b32.xlu2 %v6085_v22, %s4868_s0 }
 0xee8   :  { %2425 = vrot.lane.b32.xlu0 %v6036_v49, %s4868_s0 }
 0xeef   :  { %2428 = vrot.lane.b32.xlu2 %v6032_v46, %s4868_s0 }
 0xef7   :  { %2419 = vrot.lane.b32.xlu2 %v6046_v31, %s4868_s0 }
 0xf39   :  { %v2447_v45 = vpop.permute.xlu2 %2446 }
 0xf3a   :  { %v2448_v29 = vsel %vm494_vm3, %v2447_v45, %v6074_v38  ;;  %v2414_v45 = vld [vmem:[#allocation7 + $0x438] sm:$0xff] }
 0xf3b   :  { %2467 = vrot.lane.b32.xlu0 %v2448_v29, %s4868_s0 }
 0xf41   :  { %v2441_v53 = vpop.permute.xlu1 %2440  ;;  %v2438_v56 = vpop.permute.xlu2 %2437 }
 0xf42   :  { %v2442_v16 = vsel %vm494_vm3, %v2441_v53, %v6054_v3  ;;  %v2439_v34 = vsel %vm494_vm3, %v2438_v56, %v6085_v22  ;;  %v2402_v53 = vld [vmem:[#allocation7 + $0x3d8] sm:$0xff] }
 0xf43   :  { %2461 = vrot.lane.b32.xlu0 %v2439_v34, %s4868_s0  ;;  %2463 = vrot.lane.b32.xlu2 %v2442_v16, %s4868_s0  ;;  %v2418_v56 = vld [vmem:[#allocation7 + $0x458] sm:$0xff]  ;;  %v2408_v16 = vld [vmem:[#allocation7 + $0x408] sm:$0xff] }
 0xf44   :  { %4587 = vmatmul.msk.f32.gmra.mxu0 %vm655_vm4, %v2402_v53  ;;  %v2412_v34 = vld [vmem:[#allocation7 + $0x428] sm:$0xff] }
 0xf49   :  { %v2444_v59 = vpop.permute.xlu0 %2443  ;;  %v2432_v52 = vpop.permute.xlu1 %2431 }
 0xf4a   :  { %v2445_v7 = vsel %vm494_vm3, %v2444_v59, %v6063_v21  ;;  %v2433_v9 = vsel %vm494_vm3, %v2432_v52, %v6028_v25  ;;  %v2429_v0 = vpop.permute.xlu2 %2428  ;;  %v2406_v59 = vld [vmem:[#allocation7 + $0x3f8] sm:$0xff] }
 0xf4b   :  { %v2430_v14 = vsel %vm494_vm3, %v2429_v0, %v6032_v46  ;;  %2465 = vrot.lane.b32.xlu1 %v2445_v7, %s4868_s0  ;;  %2457 = vrot.lane.b32.xlu2 %v2433_v9, %s4868_s0 }
 0xf4c   :  { %2455 = vrot.lane.b32.xlu0 %v2430_v14, %s4868_s0  ;;  %4588 = vmatmul.msk.f32.gmra.mxu0 %vm655_vm4, %v2404_v20 }
 0xf52   :  { %v2435_v50 = vpop.permute.xlu0 %2434  ;;  %v2423_v10 = vpop.permute.xlu1 %2422 }
 0xf53   :  { %v2436_v15 = vsel %vm494_vm3, %v2435_v50, %v6025_v6  ;;  %v2424_v63 = vsel %vm494_vm3, %v2423_v10, %v6042_v62  ;;  %v2420_v51 = vpop.permute.xlu2 %2419 }
 0xf54   :  { %v2421_v37 = vsel %vm494_vm3, %v2420_v51, %v6046_v31  ;;  %2459 = vrot.lane.b32.xlu1 %v2436_v15, %s4868_s0  ;;  %2451 = vrot.lane.b32.xlu2 %v2424_v63, %s4868_s0  ;;  %v2399_v51 = vld [vmem:[#allocation7 + $0x3c0] sm:$0xff] }
 0xf55   :  { %2449 = vrot.lane.b32.xlu0 %v2421_v37, %s4868_s0  ;;  %4589 = vmatmul.msk.f32.gmra.mxu0 %vm655_vm4, %v2406_v59 }
 0xf5a   :  { %v2426_v57 = vpop.permute.xlu0 %2425 }
 0xf5b   :  { %v2427_v30 = vsel %vm494_vm3, %v2426_v57, %v6036_v49  ;;  %v2401_v57 = vld [vmem:[#allocation7 + $0x3d0] sm:$0xff] }
 0xf5c   :  { %2453 = vrot.lane.b32.xlu1 %v2427_v30, %s4868_s0  ;;  %v2403_v30 = vld [vmem:[#allocation7 + $0x3e0] sm:$0xff] }
 0xf5d   :  { %4590 = vmatmul.msk.f32.gmra.mxu0 %vm655_vm4, %v2408_v16 }
 0xf65   :  { %4591 = vmatmul.msk.f32.gmra.mxu0 %vm655_vm4, %v2410_v33 }
 0xf6d   :  { %4592 = vmatmul.msk.f32.gmra.mxu0 %vm655_vm4, %v2412_v34 }
 0xf75   :  { %4593 = vmatmul.msk.f32.gmra.mxu0 %vm655_vm4, %v2414_v45 }
 0xf7d   :  { %4594 = vmatmul.msk.f32.gmra.mxu0 %vm655_vm4, %v2416_v23 }
 0xf85   :  { %4595 = vmatmul.msk.f32.gmra.mxu0 %vm655_vm4, %v2418_v56 }
 0xf9d   :  { %v2464_v12 = vpop.permute.xlu2 %2463 }
 0xf9e   :  { %v2476_v43 = vsel %vm494_vm3, %v2464_v12, %v6054_v3  ;;  %v2405_v12 = vld [vmem:[#allocation7 + $0x3f0] sm:$0xff] }
 0xf9f   :  { %2503 = vrot.lane.b32.xlu0 %v2476_v43, %s4873_s5  ;;  %v2407_v43 = vld [vmem:[#allocation7 + $0x400] sm:$0xff] }
 0xfa5   :  { %v2458_v4 = vpop.permute.xlu2 %2457 }
 0xfa6   :  { %v2473_v60 = vsel %vm494_vm3, %v2458_v4, %v6028_v25  ;;  %v2409_v4 = vld [vmem:[#allocation7 + $0x410] sm:$0xff] }
 0xfa7   :  { %2497 = vrot.lane.b32.xlu0 %v2473_v60, %s4873_s5  ;;  %v2411_v60 = vld [vmem:[#allocation7 + $0x420] sm:$0xff] }
 0xfad   :  { %v2468_v5 = vpop.permute.xlu0 %2467 }
 0xfae   :  { %v2478_v26 = vsel %vm494_vm3, %v2468_v5, %v6074_v38  ;;  %v2452_v54 = vpop.permute.xlu2 %2451  ;;  %v2413_v5 = vld [vmem:[#allocation7 + $0x430] sm:$0xff] }
 0xfaf   :  { %v2470_v40 = vsel %vm494_vm3, %v2452_v54, %v6042_v62  ;;  %2507 = vrot.lane.b32.xlu1 %v2478_v26, %s4873_s5  ;;  %v2415_v26 = vld [vmem:[#allocation7 + $0x440] sm:$0xff]  ;;  %v2417_v54 = vld [vmem:[#allocation7 + $0x450] sm:$0xff] }
 0xfb0   :  { %2491 = vrot.lane.b32.xlu0 %v2470_v40, %s4873_s5  ;;  %v2663_v40 = vpop.f32.mrf.mxu0 }
 0xfb5   :  { %v2462_v13 = vpop.permute.xlu0 %2461 }
 0xfb6   :  { %v2475_v44 = vsel %vm494_vm3, %v2462_v13, %v6085_v22 }
 0xfb7   :  { %2501 = vrot.lane.b32.xlu1 %v2475_v44, %s4873_s5 }
 0xfb8   :  { %2571 = vperm.xlu0 %4752, %v2416_v23  }
 0xfbd   :  { %v2466_v36 = vpop.permute.xlu1 %2465 }
 0xfbe   :  { %v2456_v24 = vpop.permute.xlu0 %2455  ;;  %v2477_v19 = vsel %vm494_vm3, %v2466_v36, %v6063_v21 }
 0xfbf   :  { %v2472_v32 = vsel %vm494_vm3, %v2456_v24, %v6032_v46  ;;  %2505 = vrot.lane.b32.xlu2 %v2477_v19, %s4873_s5 }
 0xfc0   :  { %2495 = vrot.lane.b32.xlu1 %v2472_v32, %s4873_s5  ;;  %2556 = vperm.xlu0 %4752, %v2410_v33  }
 0xfc1   :  { %v2666_v13 = vpop.f32.mrf.mxu0 }
 0xfc6   :  { %v2460_v11 = vpop.permute.xlu1 %2459 }
 0xfc7   :  { %v2474_v42 = vsel %vm494_vm3, %v2460_v11, %v6025_v6  ;;  %v2450_v35 = vpop.permute.xlu0 %2449 }
 0xfc8   :  { %v2469_v39 = vsel %vm494_vm3, %v2450_v35, %v6046_v31  ;;  %2499 = vrot.lane.b32.xlu2 %v2474_v42, %s4873_s5  ;;  %2541 = vperm.xlu0 %4752, %v2404_v20  }
 0xfc9   :  { %2489 = vrot.lane.b32.xlu1 %v2469_v39, %s4873_s5  ;;  %v2669_v44 = vpop.f32.mrf.mxu0 }
 0xfce   :  { %v2454_v28 = vpop.permute.xlu1 %2453 }
 0xfcf   :  { %v2471_v29 = vsel %vm494_vm3, %v2454_v28, %v6036_v49 }
 0xfd0   :  { %2493 = vrot.lane.b32.xlu2 %v2471_v29, %s4873_s5 }
 0xfd1   :  { %2566 = vperm.xlu1 %4750, %v2414_v45  }
 0xfd2   :  { %v2672_v33 = vpop.f32.mrf.mxu0 }
 0xfd8   :  { %2576 = vperm.xlu2 %4751, %v2418_v56  }
 0xfd9   :  { %2551 = vperm.xlu1 %4750, %v2408_v16  }
 0xfda   :  { %v2675_v20 = vpop.f32.mrf.mxu0 }
 0xfe0   :  { %2561 = vperm.xlu2 %4751, %v2412_v34  }
 0xfe1   :  { %2536 = vperm.xlu1 %4750, %v2402_v53  }
 0xfe2   :  { %v2678_v28 = vpop.f32.mrf.mxu0 }
 0xfe8   :  { %2546 = vperm.xlu2 %4751, %v2406_v59  }
 0xff0   :  { %2531 = vperm.xlu2 %4751, %v2400_v61  }
0x1011   :  { %v2504_v9 = vpop.permute.xlu0 %2503 }
0x1019   :  { %v2506_v52 = vpop.permute.xlu2 %2505  ;;  %v2498_v50 = vpop.permute.xlu0 %2497 }
0x1021   :  { %v2508_v7 = vpop.permute.xlu1 %2507 }
0x1022   :  { %4576 = vmatpush.msk.msrb.mxu2 %vm2397_vm8, %v2508_v7  ;;  %v2500_v14 = vpop.permute.xlu2 %2499  ;;  %v2492_v63 = vpop.permute.xlu0 %2491 }
0x1024   :  { %4577 = vmatpush.msk.msrb.mxu2 %vm2397_vm8, %v2506_v52  ;;  %v2681_v52 = vpop.f32.mrf.mxu0 }
0x1026   :  { %4578 = vmatpush.msk.msrb.mxu2 %vm2397_vm8, %v2504_v9 }
0x1029   :  { %v2502_v0 = vpop.permute.xlu1 %2501 }
0x102a   :  { %4579 = vmatpush.msk.msrb.mxu2 %vm2397_vm8, %v2502_v0  ;;  %v2494_v15 = vpop.permute.xlu2 %2493  ;;  %v2572_v32 = vpop.permute.xlu0 %2571 }
0x102c   :  { %4580 = vmatpush.msk.msrb.mxu2 %vm2397_vm8, %v2500_v14 }
0x102e   :  { %4581 = vmatpush.msk.msrb.mxu2 %vm2397_vm8, %v2498_v50 }
0x1032   :  { %v2496_v10 = vpop.permute.xlu1 %2495  ;;  %v2577_v24 = vpop.permute.xlu2 %2576 }
0x1033   :  { %4582 = vmatpush.msk.msrb.mxu2 %vm2397_vm8, %v2496_v10  ;;  %v2557_v39 = vpop.permute.xlu0 %2556 }
0x1035   :  { %4583 = vmatpush.msk.msrb.mxu2 %vm2397_vm8, %v2494_v15 }
0x1037   :  { %4584 = vmatpush.msk.msrb.mxu2 %vm2397_vm8, %v2492_v63 }
0x103a   :  { %v2562_v35 = vpop.permute.xlu2 %2561 }
0x103b   :  { %v2490_v37 = vpop.permute.xlu1 %2489  ;;  %v2542_v59 = vpop.permute.xlu0 %2541 }
0x103c   :  { %4585 = vmatpush.msk.msrb.mxu2 %vm2397_vm8, %v2490_v37 }
0x103d   :  { %2615 = vmatmul.f32.vlgmr.msrb.gmra.mxu2 %v2399_v51 }
0x1042   :  { %v2547_v29 = vpop.permute.xlu2 %2546 }
0x1043   :  { %v2567_v11 = vpop.permute.xlu1 %2566 }
0x1045   :  { %2618 = vmatmul.f32.gmra.mxu2 %v2401_v57 }
0x104a   :  { %v2532_v63 = vpop.permute.xlu2 %2531 }
0x104b   :  { %v2552_v45 = vpop.permute.xlu1 %2551 }
0x104d   :  { %2621 = vmatmul.f32.gmra.mxu2 %v2403_v30 }
0x1053   :  { %v2537_v14 = vpop.permute.xlu1 %2536 }
0x1055   :  { %2624 = vmatmul.f32.gmra.mxu2 %v2405_v12 }
0x105d   :  { %2627 = vmatmul.f32.gmra.mxu2 %v2407_v43 }
0x1065   :  { %2630 = vmatmul.f32.gmra.mxu2 %v2409_v4 }
0x106d   :  { %2633 = vmatmul.f32.gmra.mxu2 %v2411_v60 }
0x1075   :  { %2636 = vmatmul.f32.gmra.mxu2 %v2413_v5  ;;  %v2684_v5 = vpop.f32.mrf.mxu0 }
0x107d   :  { %2639 = vmatmul.f32.gmra.mxu2 %v2415_v26 }
0x1085   :  { %2642 = vmatmul.f32.gmra.mxu2 %v2417_v54 }
0x10c0   :  { %v2616_v23 = vpop.f32.mrf.mxu2 }
0x10c1   :  { %v2617_v51 = vadd.f32 %v2616_v23, %v2532_v63 }
0x10c3   :  { %v2664_v4 = vadd.f32 %v2663_v40, %v2617_v51  ;;  %v2687_v40 = vpop.f32.mrf.mxu0 }
0x10c5   :  { %v6202_v54 = vmax.f32 %v2664_v4, 0.0 }
0x10c8   :  { %v2619_v36 = vpop.f32.mrf.mxu2 }
0x10c9   :  { %v2620_v50 = vadd.f32 %v2619_v36, %v2537_v14 }
0x10cb   :  { %v2667_v12 = vadd.f32 %v2666_v13, %v2620_v50 }
0x10cd   :  { %v6199_v26 = vmax.f32 %v2667_v12, 0.0 }
0x10d0   :  { %v2622_v19 = vpop.f32.mrf.mxu2 }
0x10d1   :  { %v2623_v7 = vadd.f32 %v2622_v19, %v2542_v59 }
0x10d3   :  { %v2670_v37 = vadd.f32 %v2669_v44, %v2623_v7 }
0x10d5   :  { %v6196_v60 = vmax.f32 %v2670_v37, 0.0 }
0x10d8   :  { %v2625_v42 = vpop.f32.mrf.mxu2 }
0x10d9   :  { %v2626_v16 = vadd.f32 %v2625_v42, %v2547_v29 }
0x10db   :  { %v2673_v10 = vadd.f32 %v2672_v33, %v2626_v16 }
0x10dd   :  { %v6193_v43 = vmax.f32 %v2673_v10, 0.0 }
0x10e0   :  { %v2628_v61 = vpop.f32.mrf.mxu2 }
0x10e1   :  { %v2629_v53 = vadd.f32 %v2628_v61, %v2552_v45  ;;  %v2690_v61 = vpop.f32.mrf.mxu0 }
0x10e3   :  { %v2676_v9 = vadd.f32 %v2675_v20, %v2629_v53 }
0x10e5   :  { %v6190_v57 = vmax.f32 %v2676_v9, 0.0 }
0x10e8   :  { %v2631_v56 = vpop.f32.mrf.mxu2 }
0x10e9   :  { %v2632_v34 = vadd.f32 %v2631_v56, %v2557_v39 }
0x10eb   :  { %v2679_v0 = vadd.f32 %v2678_v28, %v2632_v34 }
0x10ed   :  { %v6188_v15 = vmax.f32 %v2679_v0, 0.0 }
0x10ef   :  { %2904 = vmatpush.msra.mxu3 %v6188_v15 }
0x10f0   :  { %v2634_v30 = vpop.f32.mrf.mxu2 }
0x10f1   :  { %2905 = vmatpush.msra.mxu3 %v6190_v57 }
0x10f3   :  { %2906 = vmatpush.msra.mxu3 %v6193_v43 }
0x10f5   :  { %2907 = vmatpush.msra.mxu3 %v6196_v60 }
0x10f7   :  { %2908 = vmatpush.msra.mxu3 %v6199_v26 }
0x10f8   :  { %v2637_v23 = vpop.f32.mrf.mxu2 }
0x10f9   :  { %v2638_v13 = vadd.f32 %v2637_v23, %v2567_v11  ;;  %2909 = vmatpush.msra.mxu3 %v6202_v54  ;;  %v2635_v11 = vadd.f32 %v2634_v30, %v2562_v35 }
0x10fb   :  { %v2685_v44 = vadd.f32 %v2684_v5, %v2638_v13  ;;  %v2682_v53 = vadd.f32 %v2681_v52, %v2635_v11  ;;  %v2705_v11 = vld [vmem:[#allocation7 + $0x468] sm:$0xff] }
0x10fd   :  { %v2700_v36 = vmax.f32 %v2685_v44, 0.0 }
0x10ff   :  { %2745 = vrot.lane.b32.xlu2 %v2700_v36, %s4868_s0 }
0x1100   :  { %v2640_v33 = vpop.f32.mrf.mxu2 }
0x1101   :  { %v2641_v19 = vadd.f32 %v2640_v33, %v2572_v32  ;;  %v6219_v32 = vmax.f32 %v2682_v53, 0.0  ;;  %v2717_v53 = vld [vmem:[#allocation7 + $0x4c8] sm:$0xff] }
0x1103   :  { %v2688_v20 = vadd.f32 %v2687_v40, %v2641_v19 }
0x1105   :  { %v2701_v42 = vmax.f32 %v2688_v20, 0.0 }
0x1107   :  { %2748 = vrot.lane.b32.xlu1 %v2701_v42, %s4868_s0  ;;  %2736 = vrot.lane.b32.xlu2 %v6190_v57, %s4868_s0 }
0x1108   :  { %v2643_v39 = vpop.f32.mrf.mxu2 }
0x1109   :  { %v2644_v28 = vadd.f32 %v2643_v39, %v2577_v24 }
0x110b   :  { %v2691_v45 = vadd.f32 %v2690_v61, %v2644_v28 }
0x110d   :  { %v6210_v29 = vmax.f32 %v2691_v45, 0.0  ;;  %v2723_v45 = vld [vmem:[#allocation7 + $0x4f8] sm:$0xff] }
0x110f   :  { %2751 = vrot.lane.b32.xlu0 %v6210_v29, %s4868_s0  ;;  %2963 = vmatpush.msra.mxu1 %v6210_v29 }
0x1110   :  { %2739 = vrot.lane.b32.xlu1 %v6188_v15, %s4868_s0  ;;  %2727 = vrot.lane.b32.xlu2 %v6199_v26, %s4868_s0 }
0x1111   :  { %2964 = vmatpush.msra.mxu1 %v2701_v42 }
0x1113   :  { %2965 = vmatpush.msra.mxu1 %v2700_v36 }
0x1115   :  { %2966 = vmatpush.msra.mxu1 %v6219_v32 }
0x1116   :  { %4606 = vmatmul.msk.f32.vlgmr.msra.gmra.mxu1 %vm655_vm4, %v2705_v11 }
0x1117   :  { %2742 = vrot.lane.b32.xlu0 %v6219_v32, %s4868_s0 }
0x1118   :  { %2730 = vrot.lane.b32.xlu1 %v6196_v60, %s4868_s0 }
0x111f   :  { %2733 = vrot.lane.b32.xlu0 %v6193_v43, %s4868_s0 }
0x1127   :  { %2724 = vrot.lane.b32.xlu0 %v6202_v54, %s4868_s0 }
0x1159   :  { %v2746_v24 = vpop.permute.xlu2 %2745 }
0x115a   :  { %v2747_v35 = vsel %vm494_vm3, %v2746_v24, %v2700_v36  ;;  %v2709_v24 = vld [vmem:[#allocation7 + $0x488] sm:$0xff] }
0x115b   :  { %2768 = vrot.lane.b32.xlu0 %v2747_v35, %s4868_s0 }
0x1161   :  { %v2737_v56 = vpop.permute.xlu2 %2736 }
0x1162   :  { %v2738_v16 = vsel %vm494_vm3, %v2737_v56, %v6190_v57  ;;  %v2711_v56 = vld [vmem:[#allocation7 + $0x498] sm:$0xff] }
0x1163   :  { %2762 = vrot.lane.b32.xlu0 %v2738_v16, %s4868_s0 }
0x116a   :  { %v2728_v34 = vpop.permute.xlu2 %2727 }
0x116b   :  { %v2729_v59 = vsel %vm494_vm3, %v2728_v34, %v6199_v26  ;;  %v2707_v34 = vld [vmem:[#allocation7 + $0x478] sm:$0xff] }
0x116c   :  { %2756 = vrot.lane.b32.xlu0 %v2729_v59, %s4868_s0  ;;  %4607 = vmatmul.msk.f32.gmra.mxu1 %vm655_vm4, %v2707_v34 }
0x1174   :  { %4608 = vmatmul.msk.f32.gmra.mxu1 %vm655_vm4, %v2709_v24 }
0x1179   :  { %v2749_v52 = vpop.permute.xlu1 %2748 }
0x117a   :  { %v2750_v7 = vsel %vm494_vm3, %v2749_v52, %v2701_v42 }
0x117b   :  { %2770 = vrot.lane.b32.xlu2 %v2750_v7, %s4868_s0 }
0x117c   :  { %4609 = vmatmul.msk.f32.gmra.mxu1 %vm655_vm4, %v2711_v56 }
0x1181   :  { %v2752_v9 = vpop.permute.xlu0 %2751 }
0x1182   :  { %v2753_v0 = vsel %vm494_vm3, %v2752_v9, %v6210_v29  ;;  %v2740_v14 = vpop.permute.xlu1 %2739  ;;  %v2713_v9 = vld [vmem:[#allocation7 + $0x4a8] sm:$0xff] }
0x1183   :  { %v2741_v50 = vsel %vm494_vm3, %v2740_v14, %v6188_v15  ;;  %2772 = vrot.lane.b32.xlu1 %v2753_v0, %s4868_s0 }
0x1184   :  { %2764 = vrot.lane.b32.xlu2 %v2741_v50, %s4868_s0  ;;  %4610 = vmatmul.msk.f32.gmra.mxu1 %vm655_vm4, %v2713_v9 }
0x1189   :  { %v2743_v10 = vpop.permute.xlu0 %2742 }
0x118a   :  { %v2744_v63 = vsel %vm494_vm3, %v2743_v10, %v6219_v32  ;;  %v2731_v51 = vpop.permute.xlu1 %2730 }
0x118b   :  { %v2732_v37 = vsel %vm494_vm3, %v2731_v51, %v6196_v60  ;;  %2766 = vrot.lane.b32.xlu1 %v2744_v63, %s4868_s0 }
0x118c   :  { %2758 = vrot.lane.b32.xlu2 %v2732_v37, %s4868_s0 }
0x1191   :  { %v2734_v30 = vpop.permute.xlu0 %2733 }
0x1192   :  { %v2735_v12 = vsel %vm494_vm3, %v2734_v30, %v6193_v43  ;;  %v2704_v30 = vld [vmem:[#allocation7 + $0x460] sm:$0xff] }
0x1193   :  { %2760 = vrot.lane.b32.xlu1 %v2735_v12, %s4868_s0 }
0x1199   :  { %v2725_v4 = vpop.permute.xlu0 %2724 }
0x119a   :  { %v2726_v5 = vsel %vm494_vm3, %v2725_v4, %v6202_v54  ;;  %v2706_v4 = vld [vmem:[#allocation7 + $0x470] sm:$0xff] }
0x119b   :  { %2754 = vrot.lane.b32.xlu1 %v2726_v5, %s4868_s0  ;;  %v2708_v5 = vld [vmem:[#allocation7 + $0x480] sm:$0xff] }
0x11cd   :  { %v2769_v23 = vpop.permute.xlu0 %2768 }
0x11ce   :  { %v2781_v13 = vsel %vm494_vm3, %v2769_v23, %v2700_v36  ;;  %v2710_v23 = vld [vmem:[#allocation7 + $0x490] sm:$0xff] }
0x11cf   :  { %2808 = vrot.lane.b32.xlu1 %v2781_v13, %s4873_s5  ;;  %v2712_v13 = vld [vmem:[#allocation7 + $0x4a0] sm:$0xff] }
0x11d5   :  { %v2771_v44 = vpop.permute.xlu2 %2770  ;;  %v2763_v40 = vpop.permute.xlu0 %2762 }
0x11d6   :  { %v2782_v33 = vsel %vm494_vm3, %v2771_v44, %v2701_v42  ;;  %v2778_v19 = vsel %vm494_vm3, %v2763_v40, %v6190_v57  ;;  %v2721_v42 = vld [vmem:[#allocation7 + $0x4e8] sm:$0xff]  ;;  %v2714_v44 = vld [vmem:[#allocation7 + $0x4b0] sm:$0xff]  ;;  %v2716_v40 = vld [vmem:[#allocation7 + $0x4c0] sm:$0xff] }
0x11d7   :  { %2810 = vrot.lane.b32.xlu0 %v2782_v33, %s4873_s5  ;;  %2802 = vrot.lane.b32.xlu1 %v2778_v19, %s4873_s5  ;;  %v2718_v33 = vld [vmem:[#allocation7 + $0x4d0] sm:$0xff]  ;;  %v2720_v19 = vld [vmem:[#allocation7 + $0x4e0] sm:$0xff] }
0x11de   :  { %v2765_v20 = vpop.permute.xlu2 %2764  ;;  %v2757_v39 = vpop.permute.xlu0 %2756 }
0x11df   :  { %v2779_v61 = vsel %vm494_vm3, %v2765_v20, %v6188_v15  ;;  %v2775_v36 = vsel %vm494_vm3, %v2757_v39, %v6199_v26  ;;  %v2715_v15 = vld [vmem:[#allocation7 + $0x4b8] sm:$0xff]  ;;  %v2722_v20 = vld [vmem:[#allocation7 + $0x4f0] sm:$0xff] }
0x11e0   :  { %2804 = vrot.lane.b32.xlu0 %v2779_v61, %s4873_s5  ;;  %2796 = vrot.lane.b32.xlu1 %v2775_v36, %s4873_s5  ;;  %v2968_v36 = vpop.f32.mrf.mxu1 }
0x11e1   :  { %4611 = vmatmul.msk.f32.gmra.mxu1 %vm655_vm4, %v2715_v15 }
0x11e6   :  { %v2759_v28 = vpop.permute.xlu2 %2758 }
0x11e7   :  { %v2776_v57 = vsel %vm494_vm3, %v2759_v28, %v6196_v60 }
0x11e8   :  { %2798 = vrot.lane.b32.xlu0 %v2776_v57, %s4873_s5  ;;  %2876 = vperm.xlu1 %4750, %v2721_v42  }
0x11e9   :  { %4612 = vmatmul.msk.f32.gmra.mxu1 %vm655_vm4, %v2717_v53  ;;  %v2971_v57 = vpop.f32.mrf.mxu1 }
0x11f0   :  { %2881 = vperm.xlu0 %4752, %v2723_v45   ;;  %2861 = vperm.xlu1 %4750, %v2715_v15  }
0x11f5   :  { %v2773_v26 = vpop.permute.xlu1 %2772 }
0x11f6   :  { %v2783_v35 = vsel %vm494_vm3, %v2773_v26, %v6210_v29 }
0x11f7   :  { %2812 = vrot.lane.b32.xlu2 %v2783_v35, %s4873_s5 }
0x11f8   :  { %2866 = vperm.xlu0 %4752, %v2717_v53   ;;  %2846 = vperm.xlu1 %4750, %v2709_v24   ;;  %v2974_v24 = vpop.f32.mrf.mxu1 }
0x11fd   :  { %v2767_v60 = vpop.permute.xlu1 %2766 }
0x11fe   :  { %v2780_v16 = vsel %vm494_vm3, %v2767_v60, %v6219_v32  ;;  %v2719_v32 = vld [vmem:[#allocation7 + $0x4d8] sm:$0xff] }
0x11ff   :  { %2806 = vrot.lane.b32.xlu2 %v2780_v16, %s4873_s5  ;;  %4613 = vmatmul.msk.f32.gmra.mxu1 %vm655_vm4, %v2719_v32 }
0x1200   :  { %2851 = vperm.xlu0 %4752, %v2711_v56  }
0x1205   :  { %v2761_v59 = vpop.permute.xlu1 %2760 }
0x1206   :  { %v2777_v52 = vsel %vm494_vm3, %v2761_v59, %v6193_v43 }
0x1207   :  { %2800 = vrot.lane.b32.xlu2 %v2777_v52, %s4873_s5  ;;  %4614 = vmatmul.msk.f32.gmra.mxu1 %vm655_vm4, %v2721_v42 }
0x1208   :  { %2836 = vperm.xlu0 %4752, %v2705_v11  }
0x120d   :  { %v2755_v29 = vpop.permute.xlu1 %2754 }
0x120e   :  { %v2774_v7 = vsel %vm494_vm3, %v2755_v29, %v6202_v54 }
0x120f   :  { %2794 = vrot.lane.b32.xlu2 %v2774_v7, %s4873_s5  ;;  %4615 = vmatmul.msk.f32.gmra.mxu1 %vm655_vm4, %v2723_v45  ;;  %v2977_v7 = vpop.f32.mrf.mxu1 }
0x1217   :  { %2871 = vperm.xlu2 %4751, %v2719_v32  }
0x121f   :  { %2856 = vperm.xlu2 %4751, %v2713_v9  }
0x1227   :  { %2841 = vperm.xlu2 %4751, %v2707_v34  }
0x1241   :  { %v2809_v54 = vpop.permute.xlu1 %2808 }
0x1249   :  { %v2811_v43 = vpop.permute.xlu0 %2810  ;;  %v2803_v10 = vpop.permute.xlu1 %2802 }
0x1251   :  { %v2813_v0 = vpop.permute.xlu2 %2812 }
0x1252   :  { %4596 = vmatpush.msk.msra.mxu3 %vm2397_vm8, %v2813_v0  ;;  %v2805_v14 = vpop.permute.xlu0 %2804  ;;  %v2797_v37 = vpop.permute.xlu1 %2796 }
0x1254   :  { %4597 = vmatpush.msk.msra.mxu3 %vm2397_vm8, %v2811_v43 }
0x1256   :  { %4598 = vmatpush.msk.msra.mxu3 %vm2397_vm8, %v2809_v54 }
0x1259   :  { %v2807_v50 = vpop.permute.xlu2 %2806 }
0x125a   :  { %4599 = vmatpush.msk.msra.mxu3 %vm2397_vm8, %v2807_v50  ;;  %v2799_v51 = vpop.permute.xlu0 %2798  ;;  %v6320_v11 = vpop.permute.xlu1 %2876 }
0x125c   :  { %4600 = vmatpush.msk.msra.mxu3 %vm2397_vm8, %v2805_v14 }
0x125e   :  { %4601 = vmatpush.msk.msra.mxu3 %vm2397_vm8, %v2803_v10  ;;  %v2980_v10 = vpop.f32.mrf.mxu1 }
0x1261   :  { %v2801_v63 = vpop.permute.xlu2 %2800 }
0x1262   :  { %4602 = vmatpush.msk.msra.mxu3 %vm2397_vm8, %v2801_v63  ;;  %v6316_v39 = vpop.permute.xlu0 %2881  ;;  %v2862_v56 = vpop.permute.xlu1 %2861 }
0x1264   :  { %4603 = vmatpush.msk.msra.mxu3 %vm2397_vm8, %v2799_v51 }
0x1266   :  { %4604 = vmatpush.msk.msra.mxu3 %vm2397_vm8, %v2797_v37 }
0x1269   :  { %v2795_v12 = vpop.permute.xlu2 %2794 }
0x126a   :  { %4605 = vmatpush.msk.msra.mxu3 %vm2397_vm8, %v2795_v12  ;;  %v2867_v61 = vpop.permute.xlu0 %2866  ;;  %v2847_v43 = vpop.permute.xlu1 %2846 }
0x126b   :  { %2920 = vmatmul.f32.vlgmr.msra.gmra.mxu3 %v2704_v30 }
0x1271   :  { %v6318_v42 = vpop.permute.xlu2 %2871 }
0x1272   :  { %v2852_v28 = vpop.permute.xlu0 %2851 }
0x1273   :  { %2923 = vmatmul.f32.gmra.mxu3 %v2706_v4 }
0x1279   :  { %v2857_v45 = vpop.permute.xlu2 %2856 }
0x127a   :  { %v2837_v15 = vpop.permute.xlu0 %2836 }
0x127b   :  { %2926 = vmatmul.f32.gmra.mxu3 %v2708_v5  ;;  %v2983_v5 = vpop.f32.mrf.mxu1 }
0x1281   :  { %v2842_v34 = vpop.permute.xlu2 %2841 }
0x1283   :  { %2929 = vmatmul.f32.gmra.mxu3 %v2710_v23 }
0x128b   :  { %2932 = vmatmul.f32.gmra.mxu3 %v2712_v13 }
0x1293   :  { %2935 = vmatmul.f32.gmra.mxu3 %v2714_v44 }
0x129b   :  { %2938 = vmatmul.f32.gmra.mxu3 %v2716_v40 }
0x12a3   :  { %2941 = vmatmul.f32.gmra.mxu3 %v2718_v33 }
0x12ab   :  { %2944 = vmatmul.f32.gmra.mxu3 %v2720_v19  ;;  %v2986_v19 = vpop.f32.mrf.mxu1 }
0x12b3   :  { %2947 = vmatmul.f32.gmra.mxu3 %v2722_v20 }
0x12ee   :  { %v2921_v26 = vpop.f32.mrf.mxu3 }
0x12ef   :  { %v2922_v53 = vadd.f32 %v2921_v26, %v2837_v15 }
0x12f1   :  { %v2969_v35 = vadd.f32 %v2968_v36, %v2922_v53 }
0x12f3   :  { %v2998_v60 = vmax.f32 %v2969_v35, 0.0  ;;  %v2989_v35 = vpop.f32.mrf.mxu1 }
0x12f5   :  { %v6323_v16 = vadd.f32 %v2998_v60, %v6005_v27 }
0x12f6   :  { %v2924_v59 = vpop.f32.mrf.mxu3 }
0x12f7   :  { %v2925_v52 = vadd.f32 %v2924_v59, %v2842_v34 }
0x12f9   :  { %v2972_v29 = vadd.f32 %v2971_v57, %v2925_v52 }
0x12fb   :  { %v2999_v32 = vmax.f32 %v2972_v29, 0.0 }
0x12fd   :  { %v6326_v9 = vadd.f32 %v2999_v32, %v6008_v17 }
0x12fe   :  { %v2927_v54 = vpop.f32.mrf.mxu3 }
0x12ff   :  { %v2928_v0 = vadd.f32 %v2927_v54, %v2847_v43 }
0x1301   :  { %v2975_v14 = vadd.f32 %v2974_v24, %v2928_v0 }
0x1303   :  { %v3000_v50 = vmax.f32 %v2975_v14, 0.0 }
0x1305   :  { %v6329_v63 = vadd.f32 %v3000_v50, %v6011_v55 }
0x1306   :  { %v2930_v27 = vpop.f32.mrf.mxu3 }
0x1307   :  { %v2931_v51 = vadd.f32 %v2930_v27, %v2852_v28 }
0x1309   :  { %v2978_v37 = vadd.f32 %v2977_v7, %v2931_v51 }
0x130b   :  { %v3001_v30 = vmax.f32 %v2978_v37, 0.0 }
0x130d   :  { %v6332_v12 = vadd.f32 %v3001_v30, %v6014_v58 }
0x130e   :  { %v2933_v4 = vpop.f32.mrf.mxu3 }
0x130f   :  { %v2934_v17 = vadd.f32 %v2933_v4, %v2857_v45  ;;  %v3021_v45 = vadd.f32 %v3001_v30, %v6032_v46 }
0x1311   :  { %v2981_v23 = vadd.f32 %v2980_v10, %v2934_v17 }
0x1313   :  { %v3002_v13 = vmax.f32 %v2981_v23, 0.0 }
0x1315   :  { %v6335_v44 = vadd.f32 %v3002_v13, %v6017_v2  ;;  %v3022_v36 = vadd.f32 %v3002_v13, %v6028_v25  ;;  %v3020_v2 = vadd.f32 %v3000_v50, %v6036_v49  ;;  %v3019_v25 = vadd.f32 %v2999_v32, %v6042_v62 }
0x1316   :  { %v2936_v40 = vpop.f32.mrf.mxu3 }
0x1317   :  { %v2937_v33 = vadd.f32 %v2936_v40, %v2862_v56  ;;  %v6346_v53 = vmax.f32 %v3022_v36, 0.0  ;;  %v6354_v46 = vmax.f32 %v3020_v2, 0.0  ;;  %v6360_v34 = vmax.f32 %v3019_v25, 0.0 }
0x1319   :  { %v2984_v55 = vadd.f32 %v2983_v5, %v2937_v33 }
0x131b   :  { %v3003_v20 = vmax.f32 %v2984_v55, 0.0 }
0x131d   :  { %v6339_v28 = vadd.f32 %v3003_v20, %v6021_v41  ;;  %v3023_v58 = vadd.f32 %v3003_v20, %v6025_v6  ;;  %v6350_v41 = vmax.f32 %v3021_v45, 0.0  ;;  %v3018_v6 = vadd.f32 %v2998_v60, %v6046_v31  ;;  %v2992_v60 = vpop.f32.mrf.mxu1 }
0x131e   :  { %v2939_v57 = vpop.f32.mrf.mxu3 }
0x131f   :  { %v6343_v15 = vmax.f32 %v3023_v58, 0.0  ;;  %v2940_v26 = vadd.f32 %v2939_v57, %v2867_v61  ;;  %v6364_v62 = vmax.f32 %v3018_v6, 0.0 }
0x1321   :  { %v2987_v24 = vadd.f32 %v2986_v19, %v2940_v26  ;;  %3240 = vmatpush.msra.mxu2 %v6343_v15 }
0x1323   :  { %v3004_v56 = vmax.f32 %v2987_v24, 0.0  ;;  %3241 = vmatpush.msra.mxu2 %v6346_v53 }
0x1325   :  { %v6357_v61 = vadd.f32 %v3004_v56, %v6039_v1  ;;  %3242 = vmatpush.msra.mxu2 %v6350_v41  ;;  %v3024_v37 = vadd.f32 %v3004_v56, %v6085_v22 }
0x1326   :  { %v2942_v49 = vpop.f32.mrf.mxu3 }
0x1327   :  { %v2943_v59 = vadd.f32 %v2942_v49, %v6318_v42  ;;  %3243 = vmatpush.msra.mxu2 %v6354_v46 }
0x1329   :  { %v2990_v52 = vadd.f32 %v2989_v35, %v2943_v59  ;;  %3244 = vmatpush.msra.mxu2 %v6360_v34  ;;  %v3041_v59 = vld [vmem:[#allocation7 + $0x508] sm:$0xff] }
0x132b   :  { %v3005_v31 = vmax.f32 %v2990_v52, 0.0  ;;  %3245 = vmatpush.msra.mxu2 %v6364_v62 }
0x132d   :  { %v6369_v1 = vadd.f32 %v3005_v31, %v6051_v18  ;;  %v3025_v29 = vadd.f32 %v3005_v31, %v6054_v3  ;;  %v2995_v18 = vpop.f32.mrf.mxu1 }
0x132e   :  { %v2945_v7 = vpop.f32.mrf.mxu3 }
0x132f   :  { %v6372_v32 = vmax.f32 %v3025_v29, 0.0  ;;  %v2946_v42 = vadd.f32 %v2945_v7, %v6320_v11 }
0x1331   :  { %v2993_v43 = vadd.f32 %v2992_v60, %v2946_v42  ;;  %3081 = vrot.lane.b32.xlu0 %v6372_v32, %s4868_s0 }
0x1333   :  { %v3006_v54 = vmax.f32 %v2993_v43, 0.0  ;;  %v3043_v43 = vld [vmem:[#allocation7 + $0x518] sm:$0xff] }
0x1335   :  { %v6378_v0 = vadd.f32 %v3006_v54, %v6060_v48  ;;  %v3026_v14 = vadd.f32 %v3006_v54, %v6063_v21 }
0x1336   :  { %v2948_v50 = vpop.f32.mrf.mxu3 }
0x1337   :  { %v6381_v10 = vmax.f32 %v3026_v14, 0.0  ;;  %v2949_v3 = vadd.f32 %v2948_v50, %v6316_v39  ;;  %v3059_v50 = vld [vmem:[#allocation7 + $0x598] sm:$0xff] }
0x1339   :  { %v2996_v27 = vadd.f32 %v2995_v18, %v2949_v3  ;;  %3084 = vrot.lane.b32.xlu2 %v6381_v10, %s4868_s0  ;;  %3072 = vrot.lane.b32.xlu0 %v6346_v53, %s4868_s0 }
0x133b   :  { %v3007_v11 = vmax.f32 %v2996_v27, 0.0  ;;  %v3045_v27 = vld [vmem:[#allocation7 + $0x528] sm:$0xff] }
0x133d   :  { %v6389_v51 = vadd.f32 %v3007_v11, %v6071_v8  ;;  %v3027_v48 = vadd.f32 %v3007_v11, %v6074_v38  ;;  %v6403_v8 = vmax.f32 %v3024_v37, 0.0 }
0x133f   :  { %v6392_v21 = vmax.f32 %v3027_v48, 0.0  ;;  %v3053_v48 = vld [vmem:[#allocation7 + $0x568] sm:$0xff] }
0x1341   :  { %3087 = vrot.lane.b32.xlu1 %v6392_v21, %s4868_s0  ;;  %3299 = vmatpush.msra.mxu0 %v6392_v21 }
0x1342   :  { %3075 = vrot.lane.b32.xlu2 %v6343_v15, %s4868_s0  ;;  %3063 = vrot.lane.b32.xlu0 %v6360_v34, %s4868_s0 }
0x1343   :  { %3300 = vmatpush.msra.mxu0 %v6381_v10 }
0x1345   :  { %3301 = vmatpush.msra.mxu0 %v6372_v32 }
0x1347   :  { %3302 = vmatpush.msra.mxu0 %v6403_v8 }
0x1348   :  { %4626 = vmatmul.msk.f32.vlgmr.msra.gmra.mxu0 %vm655_vm4, %v3041_v59 }
0x1349   :  { %3078 = vrot.lane.b32.xlu1 %v6403_v8, %s4868_s0 }
0x134a   :  { %3066 = vrot.lane.b32.xlu2 %v6354_v46, %s4868_s0 }
0x1350   :  { %4627 = vmatmul.msk.f32.gmra.mxu0 %vm655_vm4, %v3043_v43 }
0x1351   :  { %3069 = vrot.lane.b32.xlu1 %v6350_v41, %s4868_s0 }
0x1358   :  { %4628 = vmatmul.msk.f32.gmra.mxu0 %vm655_vm4, %v3045_v27 }
0x1359   :  { %3060 = vrot.lane.b32.xlu1 %v6364_v62, %s4868_s0 }
0x1393   :  { %v3085_v38 = vpop.permute.xlu2 %3084 }
0x1394   :  { %v3086_v22 = vsel %vm494_vm3, %v3085_v38, %v6381_v10 }
0x1395   :  { %3106 = vrot.lane.b32.xlu0 %v3086_v22, %s4868_s0 }
0x139c   :  { %v3076_v39 = vpop.permute.xlu2 %3075 }
0x139d   :  { %v3077_v30 = vsel %vm494_vm3, %v3076_v39, %v6343_v15  ;;  %v3047_v39 = vld [vmem:[#allocation7 + $0x538] sm:$0xff] }
0x139e   :  { %3100 = vrot.lane.b32.xlu0 %v3077_v30, %s4868_s0  ;;  %4629 = vmatmul.msk.f32.gmra.mxu0 %vm655_vm4, %v3047_v39  ;;  %v3055_v30 = vld [vmem:[#allocation7 + $0x578] sm:$0xff] }
0x13a3   :  { %v3082_v4 = vpop.permute.xlu0 %3081 }
0x13a4   :  { %v3083_v5 = vsel %vm494_vm3, %v3082_v4, %v6372_v32  ;;  %v3067_v17 = vpop.permute.xlu2 %3066  ;;  %v3057_v4 = vld [vmem:[#allocation7 + $0x588] sm:$0xff] }
0x13a5   :  { %v3068_v23 = vsel %vm494_vm3, %v3067_v17, %v6354_v46  ;;  %3104 = vrot.lane.b32.xlu1 %v3083_v5, %s4868_s0  ;;  %v3049_v5 = vld [vmem:[#allocation7 + $0x548] sm:$0xff]  ;;  %v3051_v17 = vld [vmem:[#allocation7 + $0x558] sm:$0xff] }
0x13a6   :  { %3094 = vrot.lane.b32.xlu0 %v3068_v23, %s4868_s0  ;;  %4630 = vmatmul.msk.f32.gmra.mxu0 %vm655_vm4, %v3049_v5 }
0x13ab   :  { %v3073_v13 = vpop.permute.xlu0 %3072 }
0x13ac   :  { %v3074_v40 = vsel %vm494_vm3, %v3073_v13, %v6346_v53 }
0x13ad   :  { %3098 = vrot.lane.b32.xlu1 %v3074_v40, %s4868_s0 }
0x13ae   :  { %4631 = vmatmul.msk.f32.gmra.mxu0 %vm655_vm4, %v3051_v17 }
0x13b3   :  { %v3088_v33 = vpop.permute.xlu1 %3087 }
0x13b4   :  { %v3089_v19 = vsel %vm494_vm3, %v3088_v33, %v6392_v21  ;;  %v3064_v55 = vpop.permute.xlu0 %3063 }
0x13b5   :  { %v3065_v20 = vsel %vm494_vm3, %v3064_v55, %v6360_v34  ;;  %3108 = vrot.lane.b32.xlu2 %v3089_v19, %s4868_s0 }
0x13b6   :  { %3092 = vrot.lane.b32.xlu1 %v3065_v20, %s4868_s0  ;;  %4632 = vmatmul.msk.f32.gmra.mxu0 %vm655_vm4, %v3053_v48 }
0x13bb   :  { %v3079_v36 = vpop.permute.xlu1 %3078 }
0x13bc   :  { %v3080_v58 = vsel %vm494_vm3, %v3079_v36, %v6403_v8 }
0x13bd   :  { %3102 = vrot.lane.b32.xlu2 %v3080_v58, %s4868_s0 }
0x13be   :  { %4633 = vmatmul.msk.f32.gmra.mxu0 %vm655_vm4, %v3055_v30 }
0x13c3   :  { %v3070_v57 = vpop.permute.xlu1 %3069 }
0x13c4   :  { %v3071_v45 = vsel %vm494_vm3, %v3070_v57, %v6350_v41  ;;  %v3040_v57 = vld [vmem:[#allocation7 + $0x500] sm:$0xff] }
0x13c5   :  { %3096 = vrot.lane.b32.xlu2 %v3071_v45, %s4868_s0 }
0x13c6   :  { %4634 = vmatmul.msk.f32.gmra.mxu0 %vm655_vm4, %v3057_v4 }
0x13cb   :  { %v3061_v26 = vpop.permute.xlu1 %3060 }
0x13cc   :  { %v3062_v2 = vsel %vm494_vm3, %v3061_v26, %v6364_v62  ;;  %v3042_v26 = vld [vmem:[#allocation7 + $0x510] sm:$0xff] }
0x13cd   :  { %3090 = vrot.lane.b32.xlu2 %v3062_v2, %s4868_s0  ;;  %v3044_v2 = vld [vmem:[#allocation7 + $0x520] sm:$0xff] }
0x13ce   :  { %4635 = vmatmul.msk.f32.gmra.mxu0 %vm655_vm4, %v3059_v50 }
0x1407   :  { %v3107_v24 = vpop.permute.xlu0 %3106 }
0x1408   :  { %v3118_v35 = vsel %vm494_vm3, %v3107_v24, %v6381_v10  ;;  %v3046_v24 = vld [vmem:[#allocation7 + $0x530] sm:$0xff] }
0x1409   :  { %3146 = vrot.lane.b32.xlu1 %v3118_v35, %s4874_s6  ;;  %v3048_v35 = vld [vmem:[#allocation7 + $0x540] sm:$0xff] }
0x140f   :  { %v3109_v25 = vpop.permute.xlu2 %3108 }
0x1410   :  { %v3119_v56 = vsel %vm494_vm3, %v3109_v25, %v6392_v21  ;;  %v3101_v6 = vpop.permute.xlu0 %3100  ;;  %v3050_v25 = vld [vmem:[#allocation7 + $0x550] sm:$0xff] }
0x1411   :  { %v3115_v49 = vsel %vm494_vm3, %v3101_v6, %v6343_v15  ;;  %3148 = vrot.lane.b32.xlu0 %v3119_v56, %s4874_s6  ;;  %v3052_v56 = vld [vmem:[#allocation7 + $0x560] sm:$0xff]  ;;  %v3054_v6 = vld [vmem:[#allocation7 + $0x570] sm:$0xff] }
0x1412   :  { %3140 = vrot.lane.b32.xlu1 %v3115_v49, %s4874_s6  ;;  %v3056_v49 = vld [vmem:[#allocation7 + $0x580] sm:$0xff] }
0x1417   :  { %v3103_v52 = vpop.permute.xlu2 %3102  ;;  %v3105_v31 = vpop.permute.xlu1 %3104 }
0x1418   :  { %v3116_v60 = vsel %vm494_vm3, %v3103_v52, %v6403_v8  ;;  %v3095_v29 = vpop.permute.xlu0 %3094  ;;  %v3117_v7 = vsel %vm494_vm3, %v3105_v31, %v6372_v32  ;;  %v3304_v52 = vpop.f32.mrf.mxu0 }
0x1419   :  { %v3112_v42 = vsel %vm494_vm3, %v3095_v29, %v6354_v46  ;;  %3142 = vrot.lane.b32.xlu0 %v3116_v60, %s4874_s6  ;;  %3144 = vrot.lane.b32.xlu2 %v3117_v7, %s4874_s6 }
0x141a   :  { %3134 = vrot.lane.b32.xlu1 %v3112_v42, %s4874_s6 }
0x141f   :  { %v3097_v54 = vpop.permute.xlu2 %3096  ;;  %v3099_v14 = vpop.permute.xlu1 %3098 }
0x1420   :  { %v3113_v18 = vsel %vm494_vm3, %v3097_v54, %v6350_v41  ;;  %v3114_v3 = vsel %vm494_vm3, %v3099_v14, %v6346_v53  ;;  %v3307_v31 = vpop.f32.mrf.mxu0 }
0x1421   :  { %3136 = vrot.lane.b32.xlu0 %v3113_v18, %s4874_s6  ;;  %3138 = vrot.lane.b32.xlu2 %v3114_v3, %s4874_s6 }
0x1422   :  { %3217 = vperm.xlu1 %4750, %v3059_v50  }
0x1427   :  { %v3091_v11 = vpop.permute.xlu2 %3090 }
0x1428   :  { %v3110_v37 = vsel %vm494_vm3, %v3091_v11, %v6364_v62  ;;  %v3093_v38 = vpop.permute.xlu1 %3092  ;;  %v3310_v29 = vpop.f32.mrf.mxu0 }
0x1429   :  { %v3111_v22 = vsel %vm494_vm3, %v3093_v38, %v6360_v34  ;;  %3130 = vrot.lane.b32.xlu0 %v3110_v37, %s4874_s6 }
0x142a   :  { %3202 = vperm.xlu1 %4750, %v3053_v48   ;;  %3132 = vrot.lane.b32.xlu2 %v3111_v22, %s4874_s6 }
0x1430   :  { %v3313_v42 = vpop.f32.mrf.mxu0 }
0x1431   :  { %3207 = vperm.xlu0 %4752, %v3055_v30  }
0x1432   :  { %3187 = vperm.xlu1 %4750, %v3047_v39   ;;  %3212 = vperm.xlu2 %4751, %v3057_v4  }
0x1438   :  { %v3316_v50 = vpop.f32.mrf.mxu0 }
0x1439   :  { %3192 = vperm.xlu0 %4752, %v3049_v5  }
0x143a   :  { %3172 = vperm.xlu1 %4750, %v3041_v59   ;;  %3197 = vperm.xlu2 %4751, %v3051_v17   ;;  %v3058_v59 = vld [vmem:[#allocation7 + $0x590] sm:$0xff] }
0x1440   :  { %v3319_v37 = vpop.f32.mrf.mxu0 }
0x1441   :  { %3177 = vperm.xlu0 %4752, %v3043_v43  }
0x1442   :  { %3182 = vperm.xlu2 %4751, %v3045_v27  }
0x1473   :  { %v3145_v13 = vpop.permute.xlu2 %3144 }
0x147b   :  { %v3147_v23 = vpop.permute.xlu1 %3146  ;;  %v3139_v55 = vpop.permute.xlu2 %3138 }
0x1483   :  { %v3149_v40 = vpop.permute.xlu0 %3148 }
0x1484   :  { %4616 = vmatpush.msk.msra.mxu2 %vm3038_vm9, %v3149_v40  ;;  %v3141_v33 = vpop.permute.xlu1 %3140  ;;  %v3133_v58 = vpop.permute.xlu2 %3132 }
0x1486   :  { %4617 = vmatpush.msk.msra.mxu2 %vm3038_vm9, %v3147_v23  ;;  %v3322_v23 = vpop.f32.mrf.mxu0 }
0x1488   :  { %4618 = vmatpush.msk.msra.mxu2 %vm3038_vm9, %v3145_v13 }
0x148b   :  { %v3143_v19 = vpop.permute.xlu0 %3142 }
0x148c   :  { %4619 = vmatpush.msk.msra.mxu2 %vm3038_vm9, %v3143_v19  ;;  %v3135_v36 = vpop.permute.xlu1 %3134  ;;  %v3213_v14 = vpop.permute.xlu2 %3212 }
0x148e   :  { %4620 = vmatpush.msk.msra.mxu2 %vm3038_vm9, %v3141_v33 }
0x1490   :  { %4621 = vmatpush.msk.msra.mxu2 %vm3038_vm9, %v3139_v55 }
0x1493   :  { %v3137_v20 = vpop.permute.xlu0 %3136 }
0x1494   :  { %4622 = vmatpush.msk.msra.mxu2 %vm3038_vm9, %v3137_v20  ;;  %v3218_v43 = vpop.permute.xlu1 %3217  ;;  %v3198_v11 = vpop.permute.xlu2 %3197 }
0x1496   :  { %4623 = vmatpush.msk.msra.mxu2 %vm3038_vm9, %v3135_v36 }
0x1498   :  { %4624 = vmatpush.msk.msra.mxu2 %vm3038_vm9, %v3133_v58 }
0x149b   :  { %v3131_v45 = vpop.permute.xlu0 %3130 }
0x149c   :  { %4625 = vmatpush.msk.msra.mxu2 %vm3038_vm9, %v3131_v45  ;;  %v3203_v27 = vpop.permute.xlu1 %3202  ;;  %v3183_v17 = vpop.permute.xlu2 %3182 }
0x149d   :  { %3256 = vmatmul.f32.vlgmr.msra.gmra.mxu2 %v3040_v57 }
0x14a3   :  { %v3208_v18 = vpop.permute.xlu0 %3207 }
0x14a4   :  { %v3188_v22 = vpop.permute.xlu1 %3187 }
0x14a5   :  { %3259 = vmatmul.f32.gmra.mxu2 %v3042_v26 }
0x14ab   :  { %v3193_v38 = vpop.permute.xlu0 %3192 }
0x14ac   :  { %v3173_v58 = vpop.permute.xlu1 %3172 }
0x14ad   :  { %3262 = vmatmul.f32.gmra.mxu2 %v3044_v2 }
0x14b3   :  { %v3178_v19 = vpop.permute.xlu0 %3177 }
0x14b5   :  { %3265 = vmatmul.f32.gmra.mxu2 %v3046_v24 }
0x14bd   :  { %3268 = vmatmul.f32.gmra.mxu2 %v3048_v35 }
0x14c5   :  { %3271 = vmatmul.f32.gmra.mxu2 %v3050_v25 }
0x14cd   :  { %3274 = vmatmul.f32.gmra.mxu2 %v3052_v56 }
0x14d5   :  { %3277 = vmatmul.f32.gmra.mxu2 %v3054_v6  ;;  %v3325_v6 = vpop.f32.mrf.mxu0 }
0x14dd   :  { %3280 = vmatmul.f32.gmra.mxu2 %v3056_v49 }
0x14e5   :  { %3283 = vmatmul.f32.gmra.mxu2 %v3058_v59 }
0x1520   :  { %v3257_v60 = vpop.f32.mrf.mxu2 }
0x1521   :  { %v3258_v57 = vadd.f32 %v3257_v60, %v3173_v58 }
0x1523   :  { %v3305_v25 = vadd.f32 %v3304_v52, %v3258_v57  ;;  %v3328_v52 = vpop.f32.mrf.mxu0 }
0x1525   :  { %v6520_v59 = vmax.f32 %v3305_v25, 0.0 }
0x1528   :  { %v3260_v7 = vpop.f32.mrf.mxu2 }
0x1529   :  { %v3261_v55 = vadd.f32 %v3260_v7, %v3178_v19 }
0x152b   :  { %v3308_v24 = vadd.f32 %v3307_v31, %v3261_v55 }
0x152d   :  { %v6517_v49 = vmax.f32 %v3308_v24, 0.0 }
0x1530   :  { %v3263_v54 = vpop.f32.mrf.mxu2 }
0x1531   :  { %v3264_v13 = vadd.f32 %v3263_v54, %v3183_v17 }
0x1533   :  { %v3311_v45 = vadd.f32 %v3310_v29, %v3264_v13 }
0x1535   :  { %v6514_v56 = vmax.f32 %v3311_v45, 0.0 }
0x1538   :  { %v3266_v3 = vpop.f32.mrf.mxu2 }
0x1539   :  { %v3267_v4 = vadd.f32 %v3266_v3, %v3188_v22 }
0x153b   :  { %v3314_v20 = vadd.f32 %v3313_v42, %v3267_v4 }
0x153d   :  { %v6511_v35 = vmax.f32 %v3314_v20, 0.0 }
0x1540   :  { %v3269_v48 = vpop.f32.mrf.mxu2 }
0x1541   :  { %v3270_v39 = vadd.f32 %v3269_v48, %v3193_v38 }
0x1543   :  { %v3317_v40 = vadd.f32 %v3316_v50, %v3270_v39 }
0x1545   :  { %v6508_v26 = vmax.f32 %v3317_v40, 0.0 }
0x1548   :  { %v3272_v30 = vpop.f32.mrf.mxu2 }
0x1549   :  { %v3273_v5 = vadd.f32 %v3272_v30, %v3198_v11 }
0x154b   :  { %v3320_v33 = vadd.f32 %v3319_v37, %v3273_v5 }
0x154d   :  { %v6506_v36 = vmax.f32 %v3320_v33, 0.0 }
0x154f   :  { %3545 = vmatpush.msrb.mxu3 %v6506_v36 }
0x1550   :  { %v3275_v2 = vpop.f32.mrf.mxu2 }
0x1551   :  { %3546 = vmatpush.msrb.mxu3 %v6508_v26  ;;  %v3276_v37 = vadd.f32 %v3275_v2, %v3203_v27 }
0x1553   :  { %3547 = vmatpush.msrb.mxu3 %v6511_v35  ;;  %v3323_v39 = vadd.f32 %v3322_v23, %v3276_v37  ;;  %v3356_v37 = vld [vmem:[#allocation7 + $0x5f8] sm:$0xff] }
0x1555   :  { %3548 = vmatpush.msrb.mxu3 %v6514_v56 }
0x1557   :  { %3549 = vmatpush.msrb.mxu3 %v6517_v49 }
0x1558   :  { %v3278_v60 = vpop.f32.mrf.mxu2 }
0x1559   :  { %v3279_v31 = vadd.f32 %v3278_v60, %v3208_v18  ;;  %3550 = vmatpush.msrb.mxu3 %v6520_v59  ;;  %v3331_v18 = vpop.f32.mrf.mxu0 }
0x155b   :  { %v3326_v29 = vadd.f32 %v3325_v6, %v3279_v31 }
0x155d   :  { %v3341_v7 = vmax.f32 %v3326_v29, 0.0 }
0x155f   :  { %3386 = vrot.lane.b32.xlu1 %v3341_v7, %s4868_s0 }
0x1560   :  { %v3281_v42 = vpop.f32.mrf.mxu2 }
0x1561   :  { %v3282_v54 = vadd.f32 %v3281_v42, %v3213_v14  ;;  %v3340_v14 = vmax.f32 %v3323_v39, 0.0  ;;  %v3350_v39 = vld [vmem:[#allocation7 + $0x5c8] sm:$0xff] }
0x1563   :  { %v3329_v50 = vadd.f32 %v3328_v52, %v3282_v54 }
0x1565   :  { %v6525_v3 = vmax.f32 %v3329_v50, 0.0 }
0x1567   :  { %3389 = vrot.lane.b32.xlu0 %v6525_v3, %s4868_s0  ;;  %3377 = vrot.lane.b32.xlu1 %v6508_v26, %s4868_s0 }
0x1568   :  { %v3284_v11 = vpop.f32.mrf.mxu2 }
0x1569   :  { %v3285_v48 = vadd.f32 %v3284_v11, %v3218_v43 }
0x156b   :  { %v3332_v38 = vadd.f32 %v3331_v18, %v3285_v48  ;;  %v3362_v18 = vld [vmem:[#allocation7 + $0x628] sm:$0xff] }
0x156d   :  { %v3343_v22 = vmax.f32 %v3332_v38, 0.0 }
0x156f   :  { %3392 = vrot.lane.b32.xlu2 %v3343_v22, %s4868_s0  ;;  %3604 = vmatpush.msrb.mxu1 %v3343_v22 }
0x1570   :  { %3380 = vrot.lane.b32.xlu0 %v6506_v36, %s4868_s0  ;;  %3368 = vrot.lane.b32.xlu1 %v6517_v49, %s4868_s0 }
0x1571   :  { %3605 = vmatpush.msrb.mxu1 %v6525_v3 }
0x1573   :  { %3606 = vmatpush.msrb.mxu1 %v3341_v7 }
0x1575   :  { %3607 = vmatpush.msrb.mxu1 %v3340_v14 }
0x1577   :  { %3383 = vrot.lane.b32.xlu2 %v3340_v14, %s4868_s0 }
0x1578   :  { %3371 = vrot.lane.b32.xlu0 %v6514_v56, %s4868_s0 }
0x157f   :  { %3374 = vrot.lane.b32.xlu2 %v6511_v35, %s4868_s0 }
0x1587   :  { %3365 = vrot.lane.b32.xlu2 %v6520_v59, %s4868_s0 }
0x15c9   :  { %v3393_v43 = vpop.permute.xlu2 %3392 }
0x15ca   :  { %v3394_v27 = vsel %vm494_vm3, %v3393_v43, %v3343_v22 }
0x15cb   :  { %3413 = vrot.lane.b32.xlu0 %v3394_v27, %s4868_s0 }
0x15d1   :  { %v3387_v30 = vpop.permute.xlu1 %3386  ;;  %v3384_v4 = vpop.permute.xlu2 %3383 }
0x15d2   :  { %v3388_v5 = vsel %vm494_vm3, %v3387_v30, %v3341_v7  ;;  %v3385_v17 = vsel %vm494_vm3, %v3384_v4, %v3340_v14  ;;  %v3360_v4 = vld [vmem:[#allocation7 + $0x618] sm:$0xff] }
0x15d3   :  { %3407 = vrot.lane.b32.xlu0 %v3385_v17, %s4868_s0  ;;  %3409 = vrot.lane.b32.xlu2 %v3388_v5, %s4868_s0  ;;  %v3354_v17 = vld [vmem:[#allocation7 + $0x5e8] sm:$0xff] }
0x15d9   :  { %v3390_v23 = vpop.permute.xlu0 %3389  ;;  %v3378_v13 = vpop.permute.xlu1 %3377 }
0x15da   :  { %v3391_v40 = vsel %vm494_vm3, %v3390_v23, %v6525_v3  ;;  %v3379_v33 = vsel %vm494_vm3, %v3378_v13, %v6508_v26  ;;  %v3375_v19 = vpop.permute.xlu2 %3374  ;;  %v3358_v23 = vld [vmem:[#allocation7 + $0x608] sm:$0xff]  ;;  %v3352_v13 = vld [vmem:[#allocation7 + $0x5d8] sm:$0xff] }
0x15db   :  { %v3376_v55 = vsel %vm494_vm3, %v3375_v19, %v6511_v35  ;;  %3411 = vrot.lane.b32.xlu1 %v3391_v40, %s4868_s0  ;;  %3403 = vrot.lane.b32.xlu2 %v3379_v33, %s4868_s0 }
0x15dc   :  { %3401 = vrot.lane.b32.xlu0 %v3376_v55, %s4868_s0 }
0x15e2   :  { %v3381_v20 = vpop.permute.xlu0 %3380  ;;  %v3369_v58 = vpop.permute.xlu1 %3368 }
0x15e3   :  { %v3382_v57 = vsel %vm494_vm3, %v3381_v20, %v6506_v36  ;;  %v3370_v45 = vsel %vm494_vm3, %v3369_v58, %v6517_v49  ;;  %v3366_v2 = vpop.permute.xlu2 %3365 }
0x15e4   :  { %v3367_v24 = vsel %vm494_vm3, %v3366_v2, %v6520_v59  ;;  %3405 = vrot.lane.b32.xlu1 %v3382_v57, %s4868_s0  ;;  %3397 = vrot.lane.b32.xlu2 %v3370_v45, %s4868_s0  ;;  %v3345_v2 = vld [vmem:[#allocation7 + $0x5a0] sm:$0xff] }
0x15e5   :  { %3395 = vrot.lane.b32.xlu0 %v3367_v24, %s4868_s0 }
0x15ea   :  { %v3372_v25 = vpop.permute.xlu0 %3371 }
0x15eb   :  { %v3373_v6 = vsel %vm494_vm3, %v3372_v25, %v6514_v56  ;;  %v3347_v25 = vld [vmem:[#allocation7 + $0x5b0] sm:$0xff] }
0x15ec   :  { %3399 = vrot.lane.b32.xlu1 %v3373_v6, %s4868_s0  ;;  %v3349_v6 = vld [vmem:[#allocation7 + $0x5c0] sm:$0xff] }
0x162d   :  { %v3410_v60 = vpop.permute.xlu2 %3409 }
0x162e   :  { %v3422_v31 = vsel %vm494_vm3, %v3410_v60, %v3341_v7  ;;  %v3351_v60 = vld [vmem:[#allocation7 + $0x5d0] sm:$0xff] }
0x162f   :  { %3449 = vrot.lane.b32.xlu0 %v3422_v31, %s4874_s6  ;;  %v3353_v31 = vld [vmem:[#allocation7 + $0x5e0] sm:$0xff] }
0x1635   :  { %v3404_v29 = vpop.permute.xlu2 %3403 }
0x1636   :  { %v3419_v52 = vsel %vm494_vm3, %v3404_v29, %v6508_v26  ;;  %v3355_v29 = vld [vmem:[#allocation7 + $0x5f0] sm:$0xff] }
0x1637   :  { %3443 = vrot.lane.b32.xlu0 %v3419_v52, %s4874_s6  ;;  %v3357_v52 = vld [vmem:[#allocation7 + $0x600] sm:$0xff] }
0x163d   :  { %v3414_v42 = vpop.permute.xlu0 %3413 }
0x163e   :  { %v3424_v54 = vsel %vm494_vm3, %v3414_v42, %v3343_v22  ;;  %v3398_v50 = vpop.permute.xlu2 %3397  ;;  %v3359_v42 = vld [vmem:[#allocation7 + $0x610] sm:$0xff] }
0x163f   :  { %v3416_v11 = vsel %vm494_vm3, %v3398_v50, %v6517_v49  ;;  %3453 = vrot.lane.b32.xlu1 %v3424_v54, %s4874_s6  ;;  %v3361_v54 = vld [vmem:[#allocation7 + $0x620] sm:$0xff]  ;;  %v3363_v50 = vld [vmem:[#allocation7 + $0x630] sm:$0xff] }
0x1640   :  { %3437 = vrot.lane.b32.xlu0 %v3416_v11, %s4874_s6 }
0x1645   :  { %v3408_v7 = vpop.permute.xlu0 %3407 }
0x1646   :  { %v3421_v48 = vsel %vm494_vm3, %v3408_v7, %v3340_v14 }
0x1647   :  { %3447 = vrot.lane.b32.xlu1 %v3421_v48, %s4874_s6 }
0x1648   :  { %3517 = vperm.xlu0 %4752, %v3362_v18  }
0x164d   :  { %v3412_v26 = vpop.permute.xlu1 %3411 }
0x164e   :  { %v3402_v38 = vpop.permute.xlu0 %3401  ;;  %v3423_v22 = vsel %vm494_vm3, %v3412_v26, %v6525_v3  ;;  %v3346_v3 = vld [vmem:[#allocation7 + $0x5a8] sm:$0xff] }
0x164f   :  { %v3418_v49 = vsel %vm494_vm3, %v3402_v38, %v6511_v35  ;;  %3451 = vrot.lane.b32.xlu2 %v3423_v22, %s4874_s6  ;;  %4646 = vmatmul.msk.f32.vlgmr.msrb.gmra.mxu1 %vm655_vm4, %v3346_v3 }
0x1650   :  { %3441 = vrot.lane.b32.xlu1 %v3418_v49, %s4874_s6  ;;  %3502 = vperm.xlu0 %4752, %v3356_v37  }
0x1656   :  { %v3406_v43 = vpop.permute.xlu1 %3405 }
0x1657   :  { %v3420_v14 = vsel %vm494_vm3, %v3406_v43, %v6506_v36  ;;  %v3396_v27 = vpop.permute.xlu0 %3395  ;;  %v3348_v36 = vld [vmem:[#allocation7 + $0x5b8] sm:$0xff] }
0x1658   :  { %v3415_v30 = vsel %vm494_vm3, %v3396_v27, %v6520_v59  ;;  %3445 = vrot.lane.b32.xlu2 %v3420_v14, %s4874_s6  ;;  %3487 = vperm.xlu0 %4752, %v3350_v39   ;;  %v3364_v59 = vld [vmem:[#allocation7 + $0x638] sm:$0xff] }
0x1659   :  { %3435 = vrot.lane.b32.xlu1 %v3415_v30, %s4874_s6  ;;  %4647 = vmatmul.msk.f32.gmra.mxu1 %vm655_vm4, %v3348_v36 }
0x165e   :  { %v3400_v35 = vpop.permute.xlu1 %3399 }
0x165f   :  { %v3417_v5 = vsel %vm494_vm3, %v3400_v35, %v6514_v56 }
0x1660   :  { %3439 = vrot.lane.b32.xlu2 %v3417_v5, %s4874_s6 }
0x1661   :  { %3512 = vperm.xlu1 %4750, %v3360_v4   ;;  %4648 = vmatmul.msk.f32.gmra.mxu1 %vm655_vm4, %v3350_v39 }
0x1668   :  { %3522 = vperm.xlu2 %4751, %v3364_v59  }
0x1669   :  { %3497 = vperm.xlu1 %4750, %v3354_v17   ;;  %4649 = vmatmul.msk.f32.gmra.mxu1 %vm655_vm4, %v3352_v13 }
0x1670   :  { %3507 = vperm.xlu2 %4751, %v3358_v23  }
0x1671   :  { %3482 = vperm.xlu1 %4750, %v3348_v36   ;;  %4650 = vmatmul.msk.f32.gmra.mxu1 %vm655_vm4, %v3354_v17 }
0x1678   :  { %3492 = vperm.xlu2 %4751, %v3352_v13  }
0x1679   :  { %4651 = vmatmul.msk.f32.gmra.mxu1 %vm655_vm4, %v3356_v37 }
0x1680   :  { %3477 = vperm.xlu2 %4751, %v3346_v3  }
0x1681   :  { %4652 = vmatmul.msk.f32.gmra.mxu1 %vm655_vm4, %v3358_v23 }
0x1689   :  { %4653 = vmatmul.msk.f32.gmra.mxu1 %vm655_vm4, %v3360_v4 }
0x1691   :  { %4654 = vmatmul.msk.f32.gmra.mxu1 %vm655_vm4, %v3362_v18 }
0x1699   :  { %4655 = vmatmul.msk.f32.gmra.mxu1 %vm655_vm4, %v3364_v59 }
0x16a1   :  { %v3450_v33 = vpop.permute.xlu0 %3449 }
0x16a9   :  { %v3452_v56 = vpop.permute.xlu2 %3451  ;;  %v3444_v20 = vpop.permute.xlu0 %3443 }
0x16b1   :  { %v3454_v40 = vpop.permute.xlu1 %3453 }
0x16b2   :  { %4636 = vmatpush.msk.msrb.mxu3 %vm3038_vm9, %v3454_v40  ;;  %v3446_v55 = vpop.permute.xlu2 %3445  ;;  %v3438_v45 = vpop.permute.xlu0 %3437 }
0x16b4   :  { %4637 = vmatpush.msk.msrb.mxu3 %vm3038_vm9, %v3452_v56 }
0x16b6   :  { %4638 = vmatpush.msk.msrb.mxu3 %vm3038_vm9, %v3450_v33 }
0x16b9   :  { %v3448_v19 = vpop.permute.xlu1 %3447 }
0x16ba   :  { %4639 = vmatpush.msk.msrb.mxu3 %vm3038_vm9, %v3448_v19  ;;  %v3440_v57 = vpop.permute.xlu2 %3439  ;;  %v6632_v38 = vpop.permute.xlu0 %3517 }
0x16bc   :  { %4640 = vmatpush.msk.msrb.mxu3 %vm3038_vm9, %v3446_v55 }
0x16be   :  { %4641 = vmatpush.msk.msrb.mxu3 %vm3038_vm9, %v3444_v20 }
0x16c2   :  { %v3442_v58 = vpop.permute.xlu1 %3441  ;;  %v6628_v11 = vpop.permute.xlu2 %3522 }
0x16c3   :  { %4642 = vmatpush.msk.msrb.mxu3 %vm3038_vm9, %v3442_v58  ;;  %v3503_v3 = vpop.permute.xlu0 %3502 }
0x16c5   :  { %4643 = vmatpush.msk.msrb.mxu3 %vm3038_vm9, %v3440_v57 }
0x16c7   :  { %4644 = vmatpush.msk.msrb.mxu3 %vm3038_vm9, %v3438_v45 }
0x16ca   :  { %v3508_v7 = vpop.permute.xlu2 %3507 }
0x16cb   :  { %v3436_v24 = vpop.permute.xlu1 %3435  ;;  %v3488_v56 = vpop.permute.xlu0 %3487 }
0x16cc   :  { %4645 = vmatpush.msk.msrb.mxu3 %vm3038_vm9, %v3436_v24  ;;  %v3609_v18 = vpop.f32.mrf.mxu1 }
0x16cd   :  { %3561 = vmatmul.f32.vlgmr.msrb.gmra.mxu3 %v3345_v2 }
0x16d2   :  { %v3493_v26 = vpop.permute.xlu2 %3492 }
0x16d3   :  { %v6630_v48 = vpop.permute.xlu1 %3512 }
0x16d5   :  { %3564 = vmatmul.f32.gmra.mxu3 %v3347_v25 }
0x16d6   :  { %v3612_v37 = vpop.f32.mrf.mxu1 }
0x16da   :  { %v3478_v49 = vpop.permute.xlu2 %3477 }
0x16db   :  { %v3498_v22 = vpop.permute.xlu1 %3497 }
0x16dd   :  { %3567 = vmatmul.f32.gmra.mxu3 %v3349_v6 }
0x16de   :  { %v3615_v14 = vpop.f32.mrf.mxu1 }
0x16e3   :  { %v3483_v4 = vpop.permute.xlu1 %3482 }
0x16e5   :  { %3570 = vmatmul.f32.gmra.mxu3 %v3351_v60 }
0x16e6   :  { %v3618_v17 = vpop.f32.mrf.mxu1 }
0x16ed   :  { %3573 = vmatmul.f32.gmra.mxu3 %v3353_v31 }
0x16ee   :  { %v3621_v20 = vpop.f32.mrf.mxu1 }
0x16f5   :  { %3576 = vmatmul.f32.gmra.mxu3 %v3355_v29 }
0x16f6   :  { %v3624_v6 = vpop.f32.mrf.mxu1 }
0x16fd   :  { %3579 = vmatmul.f32.gmra.mxu3 %v3357_v52 }
0x1705   :  { %3582 = vmatmul.f32.gmra.mxu3 %v3359_v42 }
0x170d   :  { %3585 = vmatmul.f32.gmra.mxu3 %v3361_v54  ;;  %v3627_v54 = vpop.f32.mrf.mxu1 }
0x1715   :  { %3588 = vmatmul.f32.gmra.mxu3 %v3363_v50 }
0x1750   :  { %v3562_v39 = vpop.f32.mrf.mxu3 }
0x1751   :  { %v3563_v43 = vadd.f32 %v3562_v39, %v3478_v49 }
0x1753   :  { %v3610_v27 = vadd.f32 %v3609_v18, %v3563_v43 }
0x1755   :  { %v3639_v30 = vmax.f32 %v3610_v27, 0.0  ;;  %v3630_v27 = vpop.f32.mrf.mxu1 }
0x1757   :  { %v6635_v35 = vadd.f32 %v3639_v30, %v6323_v16 }
0x1758   :  { %v3565_v5 = vpop.f32.mrf.mxu3 }
0x1759   :  { %v3566_v36 = vadd.f32 %v3565_v5, %v3483_v4 }
0x175b   :  { %v3613_v59 = vadd.f32 %v3612_v37, %v3566_v36 }
0x175d   :  { %v3640_v23 = vmax.f32 %v3613_v59, 0.0 }
0x175f   :  { %v6638_v13 = vadd.f32 %v3640_v23, %v6326_v9 }
0x1760   :  { %v3568_v40 = vpop.f32.mrf.mxu3 }
0x1761   :  { %v3569_v33 = vadd.f32 %v3568_v40, %v3488_v56 }
0x1763   :  { %v3616_v19 = vadd.f32 %v3615_v14, %v3569_v33 }
0x1765   :  { %v3641_v55 = vmax.f32 %v3616_v19, 0.0 }
0x1767   :  { %v6641_v58 = vadd.f32 %v3641_v55, %v6329_v63 }
0x1768   :  { %v3571_v16 = vpop.f32.mrf.mxu3 }
0x1769   :  { %v3572_v57 = vadd.f32 %v3571_v16, %v3493_v26 }
0x176b   :  { %v3619_v45 = vadd.f32 %v3618_v17, %v3572_v57 }
0x176d   :  { %v3642_v2 = vmax.f32 %v3619_v45, 0.0 }
0x176f   :  { %v6644_v24 = vadd.f32 %v3642_v2, %v6332_v12 }
0x1770   :  { %v3574_v25 = vpop.f32.mrf.mxu3 }
0x1771   :  { %v3575_v9 = vadd.f32 %v3574_v25, %v3498_v22  ;;  %v3662_v22 = vadd.f32 %v3642_v2, %v6350_v41 }
0x1773   :  { %v3622_v60 = vadd.f32 %v3621_v20, %v3575_v9 }
0x1775   :  { %v3643_v31 = vmax.f32 %v3622_v60, 0.0 }
0x1777   :  { %v6647_v29 = vadd.f32 %v3643_v31, %v6335_v44  ;;  %v3663_v18 = vadd.f32 %v3643_v31, %v6346_v53  ;;  %v3661_v44 = vadd.f32 %v3641_v55, %v6354_v46  ;;  %v3660_v53 = vadd.f32 %v3640_v23, %v6360_v34 }
0x1778   :  { %v3577_v52 = vpop.f32.mrf.mxu3 }
0x1779   :  { %v3578_v42 = vadd.f32 %v3577_v52, %v3503_v3  ;;  %v6658_v43 = vmax.f32 %v3663_v18, 0.0  ;;  %v6666_v41 = vmax.f32 %v3661_v44, 0.0  ;;  %v6672_v4 = vmax.f32 %v3660_v53, 0.0 }
0x177b   :  { %v3625_v63 = vadd.f32 %v3624_v6, %v3578_v42 }
0x177d   :  { %v3644_v50 = vmax.f32 %v3625_v63, 0.0 }
0x177f   :  { %v6651_v26 = vadd.f32 %v3644_v50, %v6339_v28  ;;  %v3664_v12 = vadd.f32 %v3644_v50, %v6343_v15  ;;  %v6662_v28 = vmax.f32 %v3662_v22, 0.0  ;;  %v3659_v15 = vadd.f32 %v3639_v30, %v6364_v62  ;;  %v3633_v30 = vpop.f32.mrf.mxu1 }
0x1780   :  { %v3580_v37 = vpop.f32.mrf.mxu3 }
0x1781   :  { %v6655_v49 = vmax.f32 %v3664_v12, 0.0  ;;  %v3581_v39 = vadd.f32 %v3580_v37, %v3508_v7  ;;  %v6676_v34 = vmax.f32 %v3659_v15, 0.0 }
0x1783   :  { %v3628_v14 = vadd.f32 %v3627_v54, %v3581_v39  ;;  %3881 = vmatpush.msrb.mxu2 %v6655_v49 }
0x1785   :  { %v3645_v3 = vmax.f32 %v3628_v14, 0.0  ;;  %3882 = vmatpush.msrb.mxu2 %v6658_v43 }
0x1787   :  { %v6669_v7 = vadd.f32 %v3645_v3, %v6357_v61  ;;  %3883 = vmatpush.msrb.mxu2 %v6662_v28  ;;  %v3665_v45 = vadd.f32 %v3645_v3, %v6403_v8 }
0x1788   :  { %v3583_v46 = vpop.f32.mrf.mxu3 }
0x1789   :  { %v3584_v5 = vadd.f32 %v3583_v46, %v6630_v48  ;;  %3884 = vmatpush.msrb.mxu2 %v6666_v41 }
0x178b   :  { %v3631_v36 = vadd.f32 %v3630_v27, %v3584_v5  ;;  %3885 = vmatpush.msrb.mxu2 %v6672_v4 }
0x178d   :  { %v3646_v62 = vmax.f32 %v3631_v36, 0.0  ;;  %3886 = vmatpush.msrb.mxu2 %v6676_v34 }
0x178f   :  { %v6681_v61 = vadd.f32 %v3646_v62, %v6369_v1  ;;  %v3666_v59 = vadd.f32 %v3646_v62, %v6372_v32  ;;  %v3636_v1 = vpop.f32.mrf.mxu1 }
0x1790   :  { %v3586_v17 = vpop.f32.mrf.mxu3 }
0x1791   :  { %v6684_v23 = vmax.f32 %v3666_v59, 0.0  ;;  %v3587_v48 = vadd.f32 %v3586_v17, %v6632_v38  ;;  %v3698_v59 = vld [vmem:[#allocation7 + $0x6c8] sm:$0xff] }
0x1793   :  { %v3634_v56 = vadd.f32 %v3633_v30, %v3587_v48  ;;  %3722 = vrot.lane.b32.xlu2 %v6684_v23, %s4868_s0 }
0x1795   :  { %v3647_v40 = vmax.f32 %v3634_v56, 0.0  ;;  %v3682_v56 = vld [vmem:[#allocation7 + $0x648] sm:$0xff] }
0x1797   :  { %v6690_v33 = vadd.f32 %v3647_v40, %v6378_v0  ;;  %v3667_v19 = vadd.f32 %v3647_v40, %v6381_v10  ;;  %v3700_v40 = vld [vmem:[#allocation7 + $0x6d8] sm:$0xff] }
0x1798   :  { %v3589_v55 = vpop.f32.mrf.mxu3 }
0x1799   :  { %v6693_v20 = vmax.f32 %v3667_v19, 0.0  ;;  %v3590_v32 = vadd.f32 %v3589_v55, %v6628_v11  ;;  %v3692_v19 = vld [vmem:[#allocation7 + $0x698] sm:$0xff] }
0x179b   :  { %v3637_v16 = vadd.f32 %v3636_v1, %v3590_v32  ;;  %3725 = vrot.lane.b32.xlu1 %v6693_v20, %s4868_s0  ;;  %3713 = vrot.lane.b32.xlu2 %v6658_v43, %s4868_s0  ;;  %v3694_v1 = vld [vmem:[#allocation7 + $0x6a8] sm:$0xff] }
0x179c   :  { %v3686_v32 = vld [vmem:[#allocation7 + $0x668] sm:$0xff] }
0x179d   :  { %v3648_v38 = vmax.f32 %v3637_v16, 0.0 }
0x179f   :  { %v6701_v57 = vadd.f32 %v3648_v38, %v6389_v51  ;;  %v3668_v0 = vadd.f32 %v3648_v38, %v6392_v21  ;;  %v6715_v51 = vmax.f32 %v3665_v45, 0.0 }
0x17a1   :  { %v6704_v10 = vmax.f32 %v3668_v0, 0.0  ;;  %v3688_v0 = vld [vmem:[#allocation7 + $0x678] sm:$0xff] }
0x17a3   :  { %3728 = vrot.lane.b32.xlu0 %v6704_v10, %s4868_s0  ;;  %3940 = vmatpush.msrb.mxu0 %v6704_v10 }
0x17a4   :  { %3716 = vrot.lane.b32.xlu1 %v6655_v49, %s4868_s0  ;;  %3704 = vrot.lane.b32.xlu2 %v6672_v4, %s4868_s0 }
0x17a5   :  { %3941 = vmatpush.msrb.mxu0 %v6693_v20 }
0x17a7   :  { %3942 = vmatpush.msrb.mxu0 %v6684_v23 }
0x17a9   :  { %3943 = vmatpush.msrb.mxu0 %v6715_v51 }
0x17aa   :  { %4666 = vmatmul.msk.f32.vlgmr.msrb.gmra.mxu0 %vm655_vm4, %v3682_v56 }
0x17ab   :  { %3719 = vrot.lane.b32.xlu0 %v6715_v51, %s4868_s0 }
0x17ac   :  { %3707 = vrot.lane.b32.xlu1 %v6666_v41, %s4868_s0 }
0x17b3   :  { %3710 = vrot.lane.b32.xlu0 %v6662_v28, %s4868_s0 }
0x17bb   :  { %3701 = vrot.lane.b32.xlu0 %v6676_v34, %s4868_s0 }
0x17ed   :  { %v3723_v21 = vpop.permute.xlu2 %3722 }
0x17ee   :  { %v3724_v8 = vsel %vm494_vm3, %v3723_v21, %v6684_v23  ;;  %v3684_v21 = vld [vmem:[#allocation7 + $0x658] sm:$0xff] }
0x17ef   :  { %3745 = vrot.lane.b32.xlu0 %v3724_v8, %s4868_s0  ;;  %4667 = vmatmul.msk.f32.gmra.mxu0 %vm655_vm4, %v3684_v21 }
0x17f5   :  { %v3714_v11 = vpop.permute.xlu2 %3713 }
0x17f6   :  { %v3715_v2 = vsel %vm494_vm3, %v3714_v11, %v6658_v43 }
0x17f7   :  { %3739 = vrot.lane.b32.xlu0 %v3715_v2, %s4868_s0  ;;  %4668 = vmatmul.msk.f32.gmra.mxu0 %vm655_vm4, %v3686_v32 }
0x17fe   :  { %v3705_v25 = vpop.permute.xlu2 %3704 }
0x17ff   :  { %v3706_v6 = vsel %vm494_vm3, %v3705_v25, %v6672_v4  ;;  %4669 = vmatmul.msk.f32.gmra.mxu0 %vm655_vm4, %v3688_v0 }
0x1800   :  { %3733 = vrot.lane.b32.xlu0 %v3706_v6, %s4868_s0  ;;  %v3696_v6 = vld [vmem:[#allocation7 + $0x6b8] sm:$0xff] }
0x180d   :  { %v3726_v9 = vpop.permute.xlu1 %3725 }
0x180e   :  { %v3727_v60 = vsel %vm494_vm3, %v3726_v9, %v6693_v20  ;;  %v3690_v9 = vld [vmem:[#allocation7 + $0x688] sm:$0xff] }
0x180f   :  { %3747 = vrot.lane.b32.xlu2 %v3727_v60, %s4868_s0  ;;  %4670 = vmatmul.msk.f32.gmra.mxu0 %vm655_vm4, %v3690_v9 }
0x1815   :  { %v3729_v31 = vpop.permute.xlu0 %3728 }
0x1816   :  { %v3730_v52 = vsel %vm494_vm3, %v3729_v31, %v6704_v10  ;;  %v3717_v42 = vpop.permute.xlu1 %3716 }
0x1817   :  { %v3718_v54 = vsel %vm494_vm3, %v3717_v42, %v6655_v49  ;;  %3749 = vrot.lane.b32.xlu1 %v3730_v52, %s4868_s0  ;;  %4671 = vmatmul.msk.f32.gmra.mxu0 %vm655_vm4, %v3692_v19 }
0x1818   :  { %3741 = vrot.lane.b32.xlu2 %v3718_v54, %s4868_s0 }
0x181d   :  { %v3720_v63 = vpop.permute.xlu0 %3719 }
0x181e   :  { %v3721_v50 = vsel %vm494_vm3, %v3720_v63, %v6715_v51  ;;  %v3708_v18 = vpop.permute.xlu1 %3707 }
0x181f   :  { %v3709_v12 = vsel %vm494_vm3, %v3708_v18, %v6666_v41  ;;  %3743 = vrot.lane.b32.xlu1 %v3721_v50, %s4868_s0  ;;  %4672 = vmatmul.msk.f32.gmra.mxu0 %vm655_vm4, %v3694_v1 }
0x1820   :  { %3735 = vrot.lane.b32.xlu2 %v3709_v12, %s4868_s0 }
0x1825   :  { %v3711_v37 = vpop.permute.xlu0 %3710 }
0x1826   :  { %v3712_v22 = vsel %vm494_vm3, %v3711_v37, %v6662_v28  ;;  %v3681_v37 = vld [vmem:[#allocation7 + $0x640] sm:$0xff] }
0x1827   :  { %3737 = vrot.lane.b32.xlu1 %v3712_v22, %s4868_s0  ;;  %4673 = vmatmul.msk.f32.gmra.mxu0 %vm655_vm4, %v3696_v6 }
0x182d   :  { %v3702_v39 = vpop.permute.xlu0 %3701 }
0x182e   :  { %v3703_v44 = vsel %vm494_vm3, %v3702_v39, %v6676_v34  ;;  %v3683_v39 = vld [vmem:[#allocation7 + $0x650] sm:$0xff] }
0x182f   :  { %3731 = vrot.lane.b32.xlu1 %v3703_v44, %s4868_s0  ;;  %4674 = vmatmul.msk.f32.gmra.mxu0 %vm655_vm4, %v3698_v59  ;;  %v3685_v44 = vld [vmem:[#allocation7 + $0x660] sm:$0xff] }
0x1837   :  { %4675 = vmatmul.msk.f32.gmra.mxu0 %vm655_vm4, %v3700_v40 }
0x1861   :  { %v3746_v14 = vpop.permute.xlu0 %3745 }
0x1862   :  { %v3758_v27 = vsel %vm494_vm3, %v3746_v14, %v6684_v23  ;;  %v3687_v14 = vld [vmem:[#allocation7 + $0x670] sm:$0xff] }
0x1863   :  { %3785 = vrot.lane.b32.xlu1 %v3758_v27, %s4875_s7  ;;  %v3689_v27 = vld [vmem:[#allocation7 + $0x680] sm:$0xff] }
0x1869   :  { %v3748_v53 = vpop.permute.xlu2 %3747  ;;  %v3740_v3 = vpop.permute.xlu0 %3739 }
0x186a   :  { %v3759_v15 = vsel %vm494_vm3, %v3748_v53, %v6693_v20  ;;  %v3755_v46 = vsel %vm494_vm3, %v3740_v3, %v6658_v43  ;;  %v3691_v53 = vld [vmem:[#allocation7 + $0x690] sm:$0xff]  ;;  %v3693_v3 = vld [vmem:[#allocation7 + $0x6a0] sm:$0xff] }
0x186b   :  { %3787 = vrot.lane.b32.xlu0 %v3759_v15, %s4875_s7  ;;  %3779 = vrot.lane.b32.xlu1 %v3755_v46, %s4875_s7  ;;  %v3695_v15 = vld [vmem:[#allocation7 + $0x6b0] sm:$0xff]  ;;  %v3697_v46 = vld [vmem:[#allocation7 + $0x6c0] sm:$0xff] }
0x1872   :  { %v3742_v5 = vpop.permute.xlu2 %3741  ;;  %v3734_v36 = vpop.permute.xlu0 %3733 }
0x1873   :  { %v3756_v62 = vsel %vm494_vm3, %v3742_v5, %v6655_v49  ;;  %v3752_v30 = vsel %vm494_vm3, %v3734_v36, %v6672_v4  ;;  %v3699_v5 = vld [vmem:[#allocation7 + $0x6d0] sm:$0xff]  ;;  %v3945_v36 = vpop.f32.mrf.mxu0 }
0x1874   :  { %3781 = vrot.lane.b32.xlu0 %v3756_v62, %s4875_s7  ;;  %3773 = vrot.lane.b32.xlu1 %v3752_v30, %s4875_s7 }
0x187a   :  { %v3736_v17 = vpop.permute.xlu2 %3735 }
0x187b   :  { %v3753_v48 = vsel %vm494_vm3, %v3736_v17, %v6666_v41  ;;  %v3948_v62 = vpop.f32.mrf.mxu0 }
0x187c   :  { %3775 = vrot.lane.b32.xlu0 %v3753_v48, %s4875_s7  ;;  %3853 = vperm.xlu1 %4750, %v3698_v59  }
0x1883   :  { %v3951_v59 = vpop.f32.mrf.mxu0 }
0x1884   :  { %3858 = vperm.xlu0 %4752, %v3700_v40   ;;  %3838 = vperm.xlu1 %4750, %v3692_v19  }
0x1889   :  { %v3750_v55 = vpop.permute.xlu1 %3749 }
0x188a   :  { %v3760_v16 = vsel %vm494_vm3, %v3750_v55, %v6704_v10 }
0x188b   :  { %3789 = vrot.lane.b32.xlu2 %v3760_v16, %s4875_s7  ;;  %v3954_v48 = vpop.f32.mrf.mxu0 }
0x188c   :  { %3843 = vperm.xlu0 %4752, %v3694_v1   ;;  %3823 = vperm.xlu1 %4750, %v3686_v32  }
0x1891   :  { %v3744_v38 = vpop.permute.xlu1 %3743 }
0x1892   :  { %v3757_v45 = vsel %vm494_vm3, %v3744_v38, %v6715_v51 }
0x1893   :  { %3783 = vrot.lane.b32.xlu2 %v3757_v45, %s4875_s7  ;;  %v3957_v55 = vpop.f32.mrf.mxu0 }
0x1894   :  { %3828 = vperm.xlu0 %4752, %v3688_v0  }
0x1899   :  { %v3738_v8 = vpop.permute.xlu1 %3737 }
0x189a   :  { %v3754_v11 = vsel %vm494_vm3, %v3738_v8, %v6662_v28 }
0x189b   :  { %3777 = vrot.lane.b32.xlu2 %v3754_v11, %s4875_s7  ;;  %v3960_v45 = vpop.f32.mrf.mxu0 }
0x189c   :  { %3813 = vperm.xlu0 %4752, %v3682_v56  }
0x18a1   :  { %v3732_v2 = vpop.permute.xlu1 %3731 }
0x18a2   :  { %v3751_v25 = vsel %vm494_vm3, %v3732_v2, %v6676_v34 }
0x18a3   :  { %3771 = vrot.lane.b32.xlu2 %v3751_v25, %s4875_s7 }
0x18ab   :  { %3848 = vperm.xlu2 %4751, %v3696_v6  }
0x18b3   :  { %3833 = vperm.xlu2 %4751, %v3690_v9  }
0x18bb   :  { %3818 = vperm.xlu2 %4751, %v3684_v21  }
0x18d5   :  { %v3786_v31 = vpop.permute.xlu1 %3785 }
0x18dd   :  { %v3788_v60 = vpop.permute.xlu0 %3787  ;;  %v3780_v63 = vpop.permute.xlu1 %3779 }
0x18e5   :  { %v3790_v52 = vpop.permute.xlu2 %3789 }
0x18e6   :  { %4656 = vmatpush.msk.msrb.mxu2 %vm3679_vm10, %v3790_v52  ;;  %v3782_v42 = vpop.permute.xlu0 %3781  ;;  %v3774_v12 = vpop.permute.xlu1 %3773 }
0x18e8   :  { %4657 = vmatpush.msk.msrb.mxu2 %vm3679_vm10, %v3788_v60  ;;  %v3963_v60 = vpop.f32.mrf.mxu0 }
0x18ea   :  { %4658 = vmatpush.msk.msrb.mxu2 %vm3679_vm10, %v3786_v31 }
0x18ed   :  { %v3784_v54 = vpop.permute.xlu2 %3783 }
0x18ee   :  { %4659 = vmatpush.msk.msrb.mxu2 %vm3679_vm10, %v3784_v54  ;;  %v3776_v18 = vpop.permute.xlu0 %3775  ;;  %v3854_v19 = vpop.permute.xlu1 %3853 }
0x18f0   :  { %4660 = vmatpush.msk.msrb.mxu2 %vm3679_vm10, %v3782_v42 }
0x18f2   :  { %4661 = vmatpush.msk.msrb.mxu2 %vm3679_vm10, %v3780_v63 }
0x18f5   :  { %v3778_v50 = vpop.permute.xlu2 %3777 }
0x18f6   :  { %4662 = vmatpush.msk.msrb.mxu2 %vm3679_vm10, %v3778_v50  ;;  %v6818_v56 = vpop.permute.xlu0 %3858  ;;  %v3839_v38 = vpop.permute.xlu1 %3838 }
0x18f8   :  { %4663 = vmatpush.msk.msrb.mxu2 %vm3679_vm10, %v3776_v18 }
0x18fa   :  { %4664 = vmatpush.msk.msrb.mxu2 %vm3679_vm10, %v3774_v12 }
0x18fd   :  { %v3772_v22 = vpop.permute.xlu2 %3771 }
0x18fe   :  { %4665 = vmatpush.msk.msrb.mxu2 %vm3679_vm10, %v3772_v22  ;;  %v3844_v16 = vpop.permute.xlu0 %3843  ;;  %v3824_v9 = vpop.permute.xlu1 %3823 }
0x18ff   :  { %3897 = vmatmul.f32.vlgmr.msrb.gmra.mxu2 %v3681_v37 }
0x1905   :  { %v3849_v1 = vpop.permute.xlu2 %3848 }
0x1906   :  { %v3829_v8 = vpop.permute.xlu0 %3828 }
0x1907   :  { %3900 = vmatmul.f32.gmra.mxu2 %v3683_v39 }
0x190d   :  { %v3834_v21 = vpop.permute.xlu2 %3833 }
0x190e   :  { %v3814_v12 = vpop.permute.xlu0 %3813 }
0x190f   :  { %3903 = vmatmul.f32.gmra.mxu2 %v3685_v44 }
0x1915   :  { %v3819_v54 = vpop.permute.xlu2 %3818 }
0x1917   :  { %3906 = vmatmul.f32.gmra.mxu2 %v3687_v14 }
0x191f   :  { %3909 = vmatmul.f32.gmra.mxu2 %v3689_v27 }
0x1927   :  { %3912 = vmatmul.f32.gmra.mxu2 %v3691_v53 }
0x192f   :  { %3915 = vmatmul.f32.gmra.mxu2 %v3693_v3 }
0x1937   :  { %3918 = vmatmul.f32.gmra.mxu2 %v3695_v15  ;;  %v3966_v15 = vpop.f32.mrf.mxu0 }
0x193f   :  { %3921 = vmatmul.f32.gmra.mxu2 %v3697_v46 }
0x1947   :  { %3924 = vmatmul.f32.gmra.mxu2 %v3699_v5 }
0x1982   :  { %v3898_v30 = vpop.f32.mrf.mxu2 }
0x1983   :  { %v3899_v37 = vadd.f32 %v3898_v30, %v3814_v12 }
0x1985   :  { %v3946_v53 = vadd.f32 %v3945_v36, %v3899_v37 }
0x1987   :  { %v6838_v5 = vmax.f32 %v3946_v53, 0.0 }
0x198a   :  { %v3901_v17 = vpop.f32.mrf.mxu2 }
0x198b   :  { %v3902_v63 = vadd.f32 %v3901_v17, %v3819_v54  ;;  %v3969_v17 = vpop.f32.mrf.mxu0 }
0x198d   :  { %v3949_v14 = vadd.f32 %v3948_v62, %v3902_v63 }
0x198f   :  { %v6834_v46 = vmax.f32 %v3949_v14, 0.0 }
0x1992   :  { %v3904_v40 = vpop.f32.mrf.mxu2 }
0x1993   :  { %v3905_v31 = vadd.f32 %v3904_v40, %v3824_v9 }
0x1995   :  { %v3952_v22 = vadd.f32 %v3951_v59, %v3905_v31 }
0x1997   :  { %v6830_v3 = vmax.f32 %v3952_v22, 0.0 }
0x199a   :  { %v3907_v32 = vpop.f32.mrf.mxu2 }
0x199b   :  { %v3908_v25 = vadd.f32 %v3907_v32, %v3829_v8 }
0x199d   :  { %v3955_v50 = vadd.f32 %v3954_v48, %v3908_v25 }
0x199f   :  { %v6826_v27 = vmax.f32 %v3955_v50, 0.0 }
0x19a2   :  { %v3910_v0 = vpop.f32.mrf.mxu2 }
0x19a3   :  { %v3911_v11 = vadd.f32 %v3910_v0, %v3834_v21 }
0x19a5   :  { %v3958_v52 = vadd.f32 %v3957_v55, %v3911_v11 }
0x19a7   :  { %v6822_v39 = vmax.f32 %v3958_v52, 0.0 }
0x19aa   :  { %v3913_v2 = vpop.f32.mrf.mxu2 }
0x19ab   :  { %v3914_v6 = vadd.f32 %v3913_v2, %v3839_v38  ;;  %v3972_v38 = vpop.f32.mrf.mxu0 }
0x19ad   :  { %v3961_v42 = vadd.f32 %v3960_v45, %v3914_v6 }
0x19af   :  { %v6820_v18 = vmax.f32 %v3961_v42, 0.0 }
0x19b1   :  { %4186 = vmatpush.msra.mxu2 %v6820_v18  ;;  %4696 = vmatpush.msra.mxu3 %v6820_v18 }
0x19b2   :  { %v3916_v44 = vpop.f32.mrf.mxu2 }
0x19b3   :  { %4187 = vmatpush.msra.mxu2 %v6822_v39  ;;  %4697 = vmatpush.msra.mxu3 %v6822_v39  ;;  %v3917_v45 = vadd.f32 %v3916_v44, %v3844_v16 }
0x19b5   :  { %4188 = vmatpush.msra.mxu2 %v6826_v27  ;;  %4698 = vmatpush.msra.mxu3 %v6826_v27  ;;  %v3964_v11 = vadd.f32 %v3963_v60, %v3917_v45 }
0x19b7   :  { %4189 = vmatpush.msra.mxu2 %v6830_v3  ;;  %4699 = vmatpush.msra.mxu3 %v6830_v3 }
0x19b9   :  { %4190 = vmatpush.msra.mxu2 %v6834_v46  ;;  %4700 = vmatpush.msra.mxu3 %v6834_v46 }
0x19ba   :  { %v3919_v36 = vpop.f32.mrf.mxu2 }
0x19bb   :  { %v3920_v62 = vadd.f32 %v3919_v36, %v3849_v1  ;;  %4191 = vmatpush.msra.mxu2 %v6838_v5  ;;  %4701 = vmatpush.msra.mxu3 %v6838_v5  ;;  %v3987_v36 = vld [vmem:[#allocation7 + $0x6e8] sm:$0xff] }
0x19bd   :  { %v3967_v30 = vadd.f32 %v3966_v15, %v3920_v62 }
0x19bf   :  { %v6844_v59 = vmax.f32 %v3967_v30, 0.0 }
0x19c1   :  { %4027 = vrot.lane.b32.xlu0 %v6844_v59, %s4868_s0 }
0x19c2   :  { %v3922_v48 = vpop.f32.mrf.mxu2 }
0x19c3   :  { %v3923_v40 = vadd.f32 %v3922_v48, %v3854_v19  ;;  %v6865_v19 = vmax.f32 %v3964_v11, 0.0 }
0x19c5   :  { %v3970_v55 = vadd.f32 %v3969_v17, %v3923_v40 }
0x19c7   :  { %v6848_v32 = vmax.f32 %v3970_v55, 0.0 }
0x19c9   :  { %4030 = vrot.lane.b32.xlu2 %v6848_v32, %s4868_s0  ;;  %4018 = vrot.lane.b32.xlu0 %v6822_v39, %s4868_s0 }
0x19ca   :  { %v3925_v1 = vpop.f32.mrf.mxu2 }
0x19cb   :  { %v3926_v0 = vadd.f32 %v3925_v1, %v6818_v56  ;;  %v3989_v1 = vld [vmem:[#allocation7 + $0x6f8] sm:$0xff] }
0x19cd   :  { %v3973_v21 = vadd.f32 %v3972_v38, %v3926_v0 }
0x19cf   :  { %v6855_v8 = vmax.f32 %v3973_v21, 0.0 }
0x19d1   :  { %4033 = vrot.lane.b32.xlu1 %v6855_v8, %s4868_s0  ;;  %4245 = vmatpush.msra.mxu1 %v6855_v8 }
0x19d2   :  { %4021 = vrot.lane.b32.xlu2 %v6820_v18, %s4868_s0  ;;  %4009 = vrot.lane.b32.xlu0 %v6834_v46, %s4868_s0 }
0x19d3   :  { %4246 = vmatpush.msra.mxu1 %v6848_v32 }
0x19d5   :  { %4247 = vmatpush.msra.mxu1 %v6844_v59 }
0x19d7   :  { %4248 = vmatpush.msra.mxu1 %v6865_v19 }
0x19d8   :  { %4686 = vmatmul.msk.f32.vlgmr.msra.gmra.mxu1 %vm655_vm4, %v3987_v36 }
0x19d9   :  { %4024 = vrot.lane.b32.xlu1 %v6865_v19, %s4868_s0 }
0x19da   :  { %4012 = vrot.lane.b32.xlu2 %v6830_v3, %s4868_s0 }
0x19e0   :  { %4687 = vmatmul.msk.f32.gmra.mxu1 %vm655_vm4, %v3989_v1 }
0x19e1   :  { %4015 = vrot.lane.b32.xlu1 %v6826_v27, %s4868_s0 }
0x19e9   :  { %4006 = vrot.lane.b32.xlu1 %v6838_v5, %s4868_s0 }
0x1a23   :  { %v4031_v56 = vpop.permute.xlu2 %4030 }
0x1a24   :  { %v4032_v16 = vsel %vm494_vm3, %v4031_v56, %v6848_v32 }
0x1a25   :  { %4052 = vrot.lane.b32.xlu0 %v4032_v16, %s4868_s0 }
0x1a2c   :  { %v4022_v2 = vpop.permute.xlu2 %4021 }
0x1a2d   :  { %v4023_v25 = vsel %vm494_vm3, %v4022_v2, %v6820_v18 }
0x1a2e   :  { %4046 = vrot.lane.b32.xlu0 %v4023_v25, %s4868_s0 }
0x1a33   :  { %v4028_v6 = vpop.permute.xlu0 %4027 }
0x1a34   :  { %v4029_v9 = vsel %vm494_vm3, %v4028_v6, %v6844_v59  ;;  %v4013_v60 = vpop.permute.xlu2 %4012 }
0x1a35   :  { %v4014_v31 = vsel %vm494_vm3, %v4013_v60, %v6830_v3  ;;  %4050 = vrot.lane.b32.xlu1 %v4029_v9, %s4868_s0 }
0x1a36   :  { %4040 = vrot.lane.b32.xlu0 %v4014_v31, %s4868_s0 }
0x1a3b   :  { %v4019_v52 = vpop.permute.xlu0 %4018 }
0x1a3c   :  { %v4020_v42 = vsel %vm494_vm3, %v4019_v52, %v6822_v39 }
0x1a3d   :  { %4044 = vrot.lane.b32.xlu1 %v4020_v42, %s4868_s0  ;;  %v3997_v42 = vld [vmem:[#allocation7 + $0x738] sm:$0xff] }
0x1a43   :  { %v4034_v54 = vpop.permute.xlu1 %4033 }
0x1a44   :  { %v4035_v63 = vsel %vm494_vm3, %v4034_v54, %v6855_v8  ;;  %v4010_v50 = vpop.permute.xlu0 %4009  ;;  %v4001_v54 = vld [vmem:[#allocation7 + $0x758] sm:$0xff] }
0x1a45   :  { %v4011_v12 = vsel %vm494_vm3, %v4010_v50, %v6834_v46  ;;  %4054 = vrot.lane.b32.xlu2 %v4035_v63, %s4868_s0 }
0x1a46   :  { %4038 = vrot.lane.b32.xlu1 %v4011_v12, %s4868_s0 }
0x1a4b   :  { %v4025_v37 = vpop.permute.xlu1 %4024 }
0x1a4c   :  { %v4026_v22 = vsel %vm494_vm3, %v4025_v37, %v6865_v19 }
0x1a4d   :  { %4048 = vrot.lane.b32.xlu2 %v4026_v22, %s4868_s0 }
0x1a53   :  { %v4016_v44 = vpop.permute.xlu1 %4015 }
0x1a54   :  { %v4017_v14 = vsel %vm494_vm3, %v4016_v44, %v6826_v27 }
0x1a55   :  { %4042 = vrot.lane.b32.xlu2 %v4017_v14, %s4868_s0 }
0x1a5b   :  { %v4007_v53 = vpop.permute.xlu1 %4006 }
0x1a5c   :  { %v4008_v15 = vsel %vm494_vm3, %v4007_v53, %v6838_v5 }
0x1a5d   :  { %4036 = vrot.lane.b32.xlu2 %v4008_v15, %s4868_s0 }
0x1a97   :  { %v4053_v62 = vpop.permute.xlu0 %4052 }
0x1a98   :  { %v4064_v30 = vsel %vm494_vm3, %v4053_v62, %v6848_v32  ;;  %v3988_v62 = vld [vmem:[#allocation7 + $0x6f0] sm:$0xff] }
0x1a99   :  { %4092 = vrot.lane.b32.xlu1 %v4064_v30, %s4875_s7 }
0x1a9f   :  { %v4055_v17 = vpop.permute.xlu2 %4054 }
0x1aa0   :  { %v4065_v48 = vsel %vm494_vm3, %v4055_v17, %v6855_v8  ;;  %v4047_v40 = vpop.permute.xlu0 %4046  ;;  %v3990_v17 = vld [vmem:[#allocation7 + $0x700] sm:$0xff] }
0x1aa1   :  { %v4061_v55 = vsel %vm494_vm3, %v4047_v40, %v6820_v18  ;;  %4094 = vrot.lane.b32.xlu0 %v4065_v48, %s4875_s7  ;;  %v3991_v18 = vld [vmem:[#allocation7 + $0x708] sm:$0xff]  ;;  %v3992_v48 = vld [vmem:[#allocation7 + $0x710] sm:$0xff] }
0x1aa2   :  { %4086 = vrot.lane.b32.xlu1 %v4061_v55, %s4875_s7  ;;  %4688 = vmatmul.msk.f32.gmra.mxu1 %vm655_vm4, %v3991_v18  ;;  %v3996_v40 = vld [vmem:[#allocation7 + $0x730] sm:$0xff]  ;;  %v4250_v55 = vpop.f32.mrf.mxu1 }
0x1aa7   :  { %v4049_v38 = vpop.permute.xlu2 %4048  ;;  %v4051_v0 = vpop.permute.xlu1 %4050 }
0x1aa8   :  { %v4062_v45 = vsel %vm494_vm3, %v4049_v38, %v6865_v19  ;;  %v4041_v21 = vpop.permute.xlu0 %4040  ;;  %v4063_v11 = vsel %vm494_vm3, %v4051_v0, %v6844_v59 }
0x1aa9   :  { %v4058_v56 = vsel %vm494_vm3, %v4041_v21, %v6830_v3  ;;  %4088 = vrot.lane.b32.xlu0 %v4062_v45, %s4875_s7  ;;  %4090 = vrot.lane.b32.xlu2 %v4063_v11, %s4875_s7  ;;  %v3993_v3 = vld [vmem:[#allocation7 + $0x718] sm:$0xff] }
0x1aaa   :  { %4080 = vrot.lane.b32.xlu1 %v4058_v56, %s4875_s7  ;;  %4689 = vmatmul.msk.f32.gmra.mxu1 %vm655_vm4, %v3993_v3 }
0x1aaf   :  { %v4043_v16 = vpop.permute.xlu2 %4042  ;;  %v4045_v2 = vpop.permute.xlu1 %4044 }
0x1ab0   :  { %v4059_v25 = vsel %vm494_vm3, %v4043_v16, %v6826_v27  ;;  %v4060_v6 = vsel %vm494_vm3, %v4045_v2, %v6822_v39  ;;  %v3995_v39 = vld [vmem:[#allocation7 + $0x728] sm:$0xff] }
0x1ab1   :  { %4082 = vrot.lane.b32.xlu0 %v4059_v25, %s4875_s7  ;;  %4084 = vrot.lane.b32.xlu2 %v4060_v6, %s4875_s7  ;;  %v3999_v27 = vld [vmem:[#allocation7 + $0x748] sm:$0xff] }
0x1ab2   :  { %4118 = vperm.xlu1 %4750, %v3987_v36   ;;  %4690 = vmatmul.msk.f32.gmra.mxu1 %vm655_vm4, %v3995_v39  ;;  %v3986_v36 = vld [vmem:[#allocation7 + $0x6e0] sm:$0xff] }
0x1ab7   :  { %v4037_v9 = vpop.permute.xlu2 %4036 }
0x1ab8   :  { %v4056_v60 = vsel %vm494_vm3, %v4037_v9, %v6838_v5  ;;  %v4039_v31 = vpop.permute.xlu1 %4038  ;;  %v4005_v5 = vld [vmem:[#allocation7 + $0x778] sm:$0xff] }
0x1ab9   :  { %v4057_v52 = vsel %vm494_vm3, %v4039_v31, %v6834_v46  ;;  %4076 = vrot.lane.b32.xlu0 %v4056_v60, %s4875_s7  ;;  %v4003_v46 = vld [vmem:[#allocation7 + $0x768] sm:$0xff] }
0x1aba   :  { %4133 = vperm.xlu1 %4750, %v3993_v3   ;;  %4078 = vrot.lane.b32.xlu2 %v4057_v52, %s4875_s7 }
0x1abb   :  { %4691 = vmatmul.msk.f32.gmra.mxu1 %vm655_vm4, %v3997_v42 }
0x1ac1   :  { %4128 = vperm.xlu0 %4752, %v3991_v18  }
0x1ac2   :  { %4148 = vperm.xlu1 %4750, %v3999_v27   ;;  %4123 = vperm.xlu2 %4751, %v3989_v1   ;;  %v4253_v1 = vpop.f32.mrf.mxu1 }
0x1ac3   :  { %4692 = vmatmul.msk.f32.gmra.mxu1 %vm655_vm4, %v3999_v27 }
0x1ac9   :  { %4143 = vperm.xlu0 %4752, %v3997_v42  }
0x1aca   :  { %4163 = vperm.xlu1 %4750, %v4005_v5   ;;  %4138 = vperm.xlu2 %4751, %v3995_v39  }
0x1ad1   :  { %4158 = vperm.xlu0 %4752, %v4003_v46  }
0x1ad2   :  { %4153 = vperm.xlu2 %4751, %v4001_v54  }
0x1b03   :  { %v4091_v50 = vpop.permute.xlu2 %4090 }
0x1b0b   :  { %v4093_v63 = vpop.permute.xlu1 %4092  ;;  %v4085_v44 = vpop.permute.xlu2 %4084 }
0x1b13   :  { %v4095_v12 = vpop.permute.xlu0 %4094 }
0x1b14   :  { %4676 = vmatpush.msk.msra.mxu2 %vm3679_vm10, %v4095_v12  ;;  %4702 = vmatpush.msk.msra.mxu3 %vm3679_vm10, %v4095_v12  ;;  %v4087_v37 = vpop.permute.xlu1 %4086  ;;  %v4079_v15 = vpop.permute.xlu2 %4078 }
0x1b16   :  { %4677 = vmatpush.msk.msra.mxu2 %vm3679_vm10, %v4093_v63  ;;  %4703 = vmatpush.msk.msra.mxu3 %vm3679_vm10, %v4093_v63 }
0x1b18   :  { %4678 = vmatpush.msk.msra.mxu2 %vm3679_vm10, %v4091_v50  ;;  %4704 = vmatpush.msk.msra.mxu3 %vm3679_vm10, %v4091_v50 }
0x1b1b   :  { %v4089_v22 = vpop.permute.xlu0 %4088 }
0x1b1c   :  { %4679 = vmatpush.msk.msra.mxu2 %vm3679_vm10, %v4089_v22  ;;  %4705 = vmatpush.msk.msra.mxu3 %vm3679_vm10, %v4089_v22  ;;  %v4081_v53 = vpop.permute.xlu1 %4080  ;;  %v4124_v38 = vpop.permute.xlu2 %4123 }
0x1b1e   :  { %4680 = vmatpush.msk.msra.mxu2 %vm3679_vm10, %v4087_v37  ;;  %4706 = vmatpush.msk.msra.mxu3 %vm3679_vm10, %v4087_v37 }
0x1b1f   :  { %v4256_v45 = vpop.f32.mrf.mxu1 }
0x1b20   :  { %4681 = vmatpush.msk.msra.mxu2 %vm3679_vm10, %v4085_v44  ;;  %4707 = vmatpush.msk.msra.mxu3 %vm3679_vm10, %v4085_v44 }
0x1b23   :  { %v4083_v14 = vpop.permute.xlu0 %4082 }
0x1b24   :  { %4682 = vmatpush.msk.msra.mxu2 %vm3679_vm10, %v4083_v14  ;;  %4708 = vmatpush.msk.msra.mxu3 %vm3679_vm10, %v4083_v14  ;;  %v4119_v0 = vpop.permute.xlu1 %4118 }
0x1b26   :  { %4683 = vmatpush.msk.msra.mxu2 %vm3679_vm10, %v4081_v53  ;;  %4709 = vmatpush.msk.msra.mxu3 %vm3679_vm10, %v4081_v53 }
0x1b27   :  { %v4259_v63 = vpop.f32.mrf.mxu1 }
0x1b28   :  { %4684 = vmatpush.msk.msra.mxu2 %vm3679_vm10, %v4079_v15  ;;  %4710 = vmatpush.msk.msra.mxu3 %vm3679_vm10, %v4079_v15 }
0x1b2b   :  { %v4077_v30 = vpop.permute.xlu0 %4076 }
0x1b2c   :  { %4685 = vmatpush.msk.msra.mxu2 %vm3679_vm10, %v4077_v30  ;;  %4711 = vmatpush.msk.msra.mxu3 %vm3679_vm10, %v4077_v30  ;;  %v4134_v53 = vpop.permute.xlu1 %4133 }
0x1b2d   :  { %4202 = vmatmul.f32.vlgmr.msra.gmra.mxu2 %v3986_v36  ;;  %4205 = vmatmul.f32.vlgmr.msra.gmra.mxu3 %v3988_v62 }
0x1b2e   :  { %4712 = vmatpush.msrb.mxu2 %v6855_v8  ;;  %v3998_v8 = vld [vmem:[#allocation7 + $0x740] sm:$0xff] }
0x1b30   :  { %4713 = vmatpush.msrb.mxu2 %v6848_v32  ;;  %v4000_v32 = vld [vmem:[#allocation7 + $0x750] sm:$0xff] }
0x1b32   :  { %4714 = vmatpush.msrb.mxu2 %v6844_v59  ;;  %v4002_v59 = vld [vmem:[#allocation7 + $0x760] sm:$0xff] }
0x1b33   :  { %v4129_v60 = vpop.permute.xlu0 %4128 }
0x1b34   :  { %4715 = vmatpush.msrb.mxu2 %v6865_v19  ;;  %v4004_v19 = vld [vmem:[#allocation7 + $0x770] sm:$0xff] }
0x1b35   :  { %4208 = vmatmul.f32.gmra.mxu3 %v3990_v17  ;;  %4693 = vmatmul.msk.f32.vlgmr.msrb.gmra.mxu2 %vm655_vm4, %v4001_v54  ;;  %v4331_v54 = vld [vmem:[#allocation5 + $0xf8] sm:$0xff]  ;;  %v4332_v17 = vld [vmem:[#allocation5 + $0x100] sm:$0xff] }
0x1b3d   :  { %4211 = vmatmul.f32.gmra.mxu3 %v3992_v48  ;;  %4694 = vmatmul.msk.f32.gmra.mxu2 %vm655_vm4, %v4003_v46  ;;  %v4330_v46 = vld [vmem:[#allocation5 + $0xf0] sm:$0xff] }
0x1b45   :  { %4214 = vmatmul.f32.gmra.mxu3 %v3994_v47  ;;  %4695 = vmatmul.msk.f32.gmra.mxu2 %vm655_vm4, %v4005_v5 }
0x1b4d   :  { %4217 = vmatmul.f32.gmra.mxu3 %v3996_v40  ;;  %v4262_v40 = vpop.f32.mrf.mxu1 }
0x1b55   :  { %4220 = vmatmul.f32.gmra.mxu3 %v3998_v8 }
0x1b5d   :  { %4223 = vmatmul.f32.gmra.mxu3 %v4000_v32 }
0x1b65   :  { %4226 = vmatmul.f32.gmra.mxu3 %v4002_v59 }
0x1b6d   :  { %4229 = vmatmul.f32.gmra.mxu3 %v4004_v19 }
0x1bb0   :  { %v4203_v21 = vpop.f32.mrf.mxu2  ;;  %v4206_v11 = vpop.f32.mrf.mxu3 }
0x1bb1   :  { %v4204_v56 = vadd.f32 %v4203_v21, %v4119_v0  ;;  %v4207_v18 = vadd.f32 %v4206_v11, %v4124_v38 }
0x1bb3   :  { %v4251_v16 = vadd.f32 %v4250_v55, %v4204_v56  ;;  %v4254_v2 = vadd.f32 %v4253_v1, %v4207_v18  ;;  %v4139_v55 = vpop.permute.xlu2 %4138 }
0x1bb5   :  { %v4280_v25 = vmax.f32 %v4251_v16, 0.0  ;;  %v4281_v6 = vmax.f32 %v4254_v2, 0.0  ;;  %v4265_v16 = vpop.f32.mrf.mxu1 }
0x1bb7   :  { %v4300_v3 = vadd.f32 %v4280_v25, %v6676_v34  ;;  %v4301_v9 = vadd.f32 %v4281_v6, %v6672_v4  ;;  %v4290_v31 = vadd.f32 %v4280_v25, %v6635_v35  ;;  %v4291_v27 = vadd.f32 %v4281_v6, %v6638_v13  ;;  %v4144_v6 = vpop.permute.xlu0 %4143 }
0x1bb8   :  { %v4209_v52 = vpop.f32.mrf.mxu3 }
0x1bb9   :  { %v4310_v39 = vmax.f32 %v4300_v3, 0.0  ;;  %v4311_v42 = vmax.f32 %v4301_v9, 0.0  ;;  %v4210_v5 = vadd.f32 %v4209_v52, %v4129_v60 }
0x1bbb   :  { %v4320_v50 = vadd.f32 %v4310_v39, %v4290_v31  ;;  %v4321_v12 = vadd.f32 %v4311_v42, %v4291_v27  ;;  %v4257_v37 = vadd.f32 %v4256_v45, %v4210_v5  ;;  %v4149_v5 = vpop.permute.xlu1 %4148 }
0x1bbd   :  { %v4341_v22 = vmul.f32 %v4330_v46, %v4320_v50  ;;  %v4342_v34 = vmul.f32 %v4331_v54, %v4321_v12  ;;  %v4282_v44 = vmax.f32 %v4257_v37, 0.0 }
0x1bbf   :  { %v4352_v4 = vsel %vm4351_vm11, %v4341_v22, 0.0  ;;  %v4353_v35 = vsel %vm4351_vm11, %v4342_v34, 0.0  ;;  %v4302_v14 = vadd.f32 %v4282_v44, %v6666_v41  ;;  %v4292_v36 = vadd.f32 %v4282_v44, %v6641_v58  ;;  %v4333_v58 = vld [vmem:[#allocation5 + $0x108] sm:$0xff] }
0x1bc0   :  { %v4354_v13 = vadd.f32 %v4353_v35, %v4352_v4  ;;  %v4212_v15 = vpop.f32.mrf.mxu3  ;;  %v4271_v4 = vpop.f32.mrf.mxu2 }
0x1bc1   :  { %v4312_v62 = vmax.f32 %v4302_v14, 0.0  ;;  %v4213_v30 = vadd.f32 %v4212_v15, %v4134_v53  ;;  %v4154_v15 = vpop.permute.xlu2 %4153 }
0x1bc3   :  { %v4322_v48 = vadd.f32 %v4312_v62, %v4292_v36  ;;  %v4260_v47 = vadd.f32 %v4259_v63, %v4213_v30 }
0x1bc5   :  { %v4343_v8 = vmul.f32 %v4332_v17, %v4322_v48  ;;  %v4283_v32 = vmax.f32 %v4260_v47, 0.0 }
0x1bc7   :  { %v4355_v59 = vsel %vm4351_vm11, %v4343_v8, 0.0  ;;  %v4303_v19 = vadd.f32 %v4283_v32, %v6662_v28  ;;  %v4293_v38 = vadd.f32 %v4283_v32, %v6644_v24  ;;  %v4334_v24 = vld [vmem:[#allocation5 + $0x110] sm:$0xff] }
0x1bc8   :  { %v4356_v1 = vadd.f32 %v4355_v59, %v4354_v13  ;;  %v4215_v41 = vpop.f32.mrf.mxu3  ;;  %v4274_v32 = vpop.f32.mrf.mxu2 }
0x1bc9   :  { %v4313_v0 = vmax.f32 %v4303_v19, 0.0  ;;  %v4216_v45 = vadd.f32 %v4215_v41, %v4139_v55  ;;  %v4159_v55 = vpop.permute.xlu0 %4158 }
0x1bcb   :  { %v4323_v21 = vadd.f32 %v4313_v0, %v4293_v38  ;;  %v4263_v11 = vadd.f32 %v4262_v40, %v4216_v45 }
0x1bcd   :  { %v4344_v56 = vmul.f32 %v4333_v58, %v4323_v21  ;;  %v4284_v18 = vmax.f32 %v4263_v11, 0.0 }
0x1bcf   :  { %v4357_v2 = vsel %vm4351_vm11, %v4344_v56, 0.0  ;;  %v4304_v25 = vadd.f32 %v4284_v18, %v6658_v43  ;;  %v4294_v9 = vadd.f32 %v4284_v18, %v6647_v29  ;;  %v4268_v43 = vpop.f32.mrf.mxu1  ;;  %v4335_v29 = vld [vmem:[#allocation5 + $0x118] sm:$0xff]  ;;  %v4164_v56 = vpop.permute.xlu1 %4163 }
0x1bd0   :  { %v4358_v3 = vadd.f32 %v4357_v2, %v4356_v1  ;;  %v4218_v28 = vpop.f32.mrf.mxu3 }
0x1bd1   :  { %v4314_v60 = vmax.f32 %v4304_v25, 0.0  ;;  %v4219_v31 = vadd.f32 %v4218_v28, %v4144_v6  ;;  %v4277_v25 = vpop.f32.mrf.mxu2 }
0x1bd3   :  { %v4324_v52 = vadd.f32 %v4314_v60, %v4294_v9  ;;  %v4266_v39 = vadd.f32 %v4265_v16, %v4219_v31 }
0x1bd5   :  { %v4345_v27 = vmul.f32 %v4334_v24, %v4324_v52  ;;  %v4285_v42 = vmax.f32 %v4266_v39, 0.0 }
0x1bd7   :  { %v4359_v46 = vsel %vm4351_vm11, %v4345_v27, 0.0  ;;  %v4305_v54 = vadd.f32 %v4285_v42, %v6655_v49  ;;  %v4295_v12 = vadd.f32 %v4285_v42, %v6651_v26  ;;  %v4336_v26 = vld [vmem:[#allocation5 + $0x120] sm:$0xff] }
0x1bd8   :  { %v4360_v63 = vadd.f32 %v4359_v46, %v4358_v3  ;;  %v4221_v50 = vpop.f32.mrf.mxu3 }
0x1bd9   :  { %v4315_v37 = vmax.f32 %v4305_v54, 0.0  ;;  %v4222_v22 = vadd.f32 %v4221_v50, %v4149_v5  ;;  %v4339_v5 = vld [vmem:[#allocation5 + $0x138] sm:$0xff] }
0x1bdb   :  { %v4325_v34 = vadd.f32 %v4315_v37, %v4295_v12  ;;  %v4269_v44 = vadd.f32 %v4268_v43, %v4222_v22 }
0x1bdd   :  { %v4346_v35 = vmul.f32 %v4335_v29, %v4325_v34  ;;  %v4286_v14 = vmax.f32 %v4269_v44, 0.0  ;;  %v4340_v34 = vld [vmem:[#allocation5 + $0xf0] sm:$0x1] }
0x1bdf   :  { %v4361_v53 = vsel %vm4351_vm11, %v4346_v35, 0.0  ;;  %v4306_v13 = vadd.f32 %v4286_v14, %v6715_v51  ;;  %v4296_v62 = vadd.f32 %v4286_v14, %v6669_v7  ;;  %v4337_v7 = vld [vmem:[#allocation5 + $0x128] sm:$0xff] }
0x1be0   :  { %v4362_v36 = vadd.f32 %v4361_v53, %v4360_v63  ;;  %v4224_v49 = vpop.f32.mrf.mxu3 }
0x1be1   :  { %v4316_v30 = vmax.f32 %v4306_v13, 0.0  ;;  %v4225_v17 = vadd.f32 %v4224_v49, %v4154_v15 }
0x1be3   :  { %v4326_v48 = vadd.f32 %v4316_v30, %v4296_v62  ;;  %v4272_v47 = vadd.f32 %v4271_v4, %v4225_v17 }
0x1be5   :  { %v4347_v40 = vmul.f32 %v4336_v26, %v4326_v48  ;;  %v4287_v8 = vmax.f32 %v4272_v47, 0.0 }
0x1be7   :  { %v4363_v59 = vsel %vm4351_vm11, %v4347_v40, 0.0  ;;  %v4307_v19 = vadd.f32 %v4287_v8, %v6684_v23  ;;  %v4297_v41 = vadd.f32 %v4287_v8, %v6681_v61  ;;  %v4338_v61 = vld [vmem:[#allocation5 + $0x130] sm:$0xff] }
0x1be8   :  { %v4227_v1 = vpop.f32.mrf.mxu3  ;;  %v4364_v51 = vadd.f32 %v4363_v59, %v4362_v36 }
0x1be9   :  { %v4317_v38 = vmax.f32 %v4307_v19, 0.0  ;;  %v4228_v0 = vadd.f32 %v4227_v1, %v4159_v55 }
0x1beb   :  { %v4327_v45 = vadd.f32 %v4317_v38, %v4297_v41  ;;  %v4275_v58 = vadd.f32 %v4274_v32, %v4228_v0 }
0x1bed   :  { %v4348_v21 = vmul.f32 %v4337_v7, %v4327_v45  ;;  %v4288_v11 = vmax.f32 %v4275_v58, 0.0 }
0x1bef   :  { %v4308_v18 = vadd.f32 %v4288_v11, %v6693_v20  ;;  %v4365_v16 = vsel %vm4351_vm11, %v4348_v21, 0.0  ;;  %v4298_v6 = vadd.f32 %v4288_v11, %v6690_v33 }
0x1bf0   :  { %v4230_v2 = vpop.f32.mrf.mxu3  ;;  %v4366_v23 = vadd.f32 %v4365_v16, %v4364_v51 }
0x1bf1   :  { %v4318_v3 = vmax.f32 %v4308_v18, 0.0  ;;  %v4231_v28 = vadd.f32 %v4230_v2, %v4164_v56 }
0x1bf3   :  { %v4328_v9 = vadd.f32 %v4318_v3, %v4298_v6  ;;  %v4278_v60 = vadd.f32 %v4277_v25, %v4231_v28 }
0x1bf5   :  { %v4349_v31 = vmul.f32 %v4338_v61, %v4328_v9  ;;  %v4289_v24 = vmax.f32 %v4278_v60, 0.0 }
0x1bf7   :  { %v4309_v52 = vadd.f32 %v4289_v24, %v6704_v10  ;;  %v4367_v39 = vsel %vm4351_vm11, %v4349_v31, 0.0  ;;  %v4299_v20 = vadd.f32 %v4289_v24, %v6701_v57 }
0x1bf8   :  { %v4368_v27 = vadd.f32 %v4367_v39, %v4366_v23 }
0x1bf9   :  { %v4319_v42 = vmax.f32 %v4309_v52, 0.0 }
0x1bfb   :  { %v4329_v46 = vadd.f32 %v4319_v42, %v4299_v20 }
0x1bfd   :  { %v4350_v54 = vmul.f32 %v4339_v5, %v4329_v46 }
0x1bff   :  { %v4369_v33 = vsel %vm4351_vm11, %v4350_v54, 0.0 }
0x1c00   :  { %v4370_v63 = vadd.f32 %v4369_v33, %v4368_v27 }
0x1c02   :  { %4371 = vadd.xlane.f32.xlu2 %v4370_v63 }
0x1c75   :  { %v4372_v50 = vpop.xlane.xlu2 %4371 }
0x1c76   :  { %v4373_v43 = vrot.slane %v4372_v50, 4 }
0x1c78   :  { %v4374_v12 = vadd.f32 %v4373_v43, %v4372_v50 }
0x1c7a   :  { %v4375_v37 = vrot.slane %v4374_v12, 2 }
0x1c7c   :  { %v4376_v22 = vadd.f32 %v4375_v37, %v4374_v12 }
0x1c7e   :  { %v4377_v29 = vrot.slane %v4376_v22, 1 }
0x1c80   :  { %v4378_v10 = vadd.f32 %v4377_v29, %v4376_v22 }
0x1c82   :  { %4716 = vpush %v4378_v10 }
0x1cb3   :  { %s4717_s8 = spop %4716 }
0x1cb4   :  { %v4380_v44 = vstv %s4717_s8 }
0x1cb5   :  { %v4381_v57 = vadd.f32 %v4380_v44, %v4340_v34 }
0x1cb7   :  { %v4382_v4 = vsub.f32 0.0, %v4381_v57 }
0x1cb9   :  { %v4383_v35 = vmul.f32 1.442695, %v4382_v4 }
0x1cbb   :  { %4753 = vpow2.f32 %v4383_v35 }
0x1cc1   :  { %v4754_v14 = vpop.eup %4753 }
0x1cc2   :  { %v4385_v53 = vadd.f32 1.0, %v4754_v14 }
0x1cc4   :  { %4755 = vrcp.f32 %v4385_v53  ;;  %v4397_v49 = vand.u32 2147483648, %v4385_v53  ;;  %v4395_v30 = vand.u32 2147483647, %v4385_v53  ;;  %vm4391_vm13 = vweird.f32 %v4385_v53 }
0x1cc6   :  { %v4398_v26 = vor.u32 1.1754944e-38, %v4397_v49  ;;  %vm4396_vm15 = vcmp.eq.f32.partialorder %v4395_v30, 8.507059e+37 }
0x1cca   :  { %v4756_v13 = vpop.eup %4755 }
0x1ccb   :  { %v4387_v15 = vmul.f32 %v4756_v13, %v4385_v53  ;;  %vm4392_vm12 = vweird.f32 %v4756_v13 }
0x1ccc   :  { %vm4393_vm14 = vmor %vm4391_vm13, %vm4392_vm12 }
0x1ccd   :  { %v4388_v36 = vsub.f32 1.0, %v4387_v15 }
0x1ccf   :  { %v4389_v62 = vmul.f32 %v4756_v13, %v4388_v36 }
0x1cd1   :  { %v4390_v17 = vadd.f32 %v4756_v13, %v4389_v62 }
0x1cd3   :  { %v4394_v48 = vsel %vm4393_vm14, %v4756_v13, %v4390_v17 }
0x1cd4   :  { %v4399_v47 = vsel %vm4396_vm15, %v4398_v26, %v4394_v48 }
0x1cd5   :  { %4402 = vrot.lane.b32.xlu0 %v4399_v47, %s4868_s0 }
0x1d47   :  { %v4403_v40 = vpop.permute.xlu0 %4402 }
0x1d48   :  { %4406 = vst.msk [vmem:[#allocation8] sm:$0x1] %vm4405_vm0, %v4403_v40 }
0x1d49   :  { %4417 = dma.vmem_to_hbm [thread:$0]  %s4413_s10, 16, %s4415_s13, [#allocation4]  }
0x1d4a   :  { %4857 = dma.done.wait [#allocation4], 16  }
0x1d4b   :  { %4858 = vsyncadd [#allocation4], 4294967280 }
0x1d4c   :  { %4422 = vsyncpa [#allocation3], 1 }
0x1d4d   :  { %4423 = vsyncpa [#allocation6], 1 }
0x1d4e   :  { %4424 = vsyncpa [#allocation4], 1 }

</bundles_post_ra>
